<compile_context>
chip_gen: v6e
topology: v6e:2x2x1
jax: 0.10.0
libtpu: 0.0.40
codegen_flags: <defaults>
</compile_context>

<pallas_src>
import math

import jax
import jax.numpy as jnp
from jax.experimental import pallas as pl
from jax.experimental.pallas import tpu as pltpu


_ROW_TILE_CAP = 1024              # cap for M (row) tiles, multiple of 8
_COL_TILE_CAP = 2048              # cap for lane-dense column tiles, mult of 128
_VMEM_LIMIT = 8 * 1024 * 1024     # honest per-call footprint is ~1-2 MiB


def _pick_tile(n, unit, cap):
    """~n/2 rounded up to `unit` (>=2 parallel grid steps for v7x megacore),
    capped, or the full extent when n is tiny."""
    if n <= unit:
        return n
    t = min(cap, -(-((n + 1) // 2) // unit) * unit)
    return n if t >= n else t


def _compiler_params():
    return pltpu.CompilerParams(dimension_semantics=("parallel",),
                                vmem_limit_bytes=_VMEM_LIMIT)


# ----------------------------------------------------------------------------
# Pallas kernels
# ----------------------------------------------------------------------------
def _enc_front_kernel(x_ref, w1_ref, b1_ref, m_ref, w2_ref, b2_ref, o_ref):
    """Fused enc1+enc2 on one row tile (rows = (batch, enc2 output position))."""
    # enc1 for the 3x3 grid of h1 positions each enc2 output needs (block-
    # structured weight); mask zeroes the positions that fall in enc2's padding
    # (otherwise ReLU(b1) would leak where the input window is all zeros).
    h1 = jnp.dot(x_ref[...], w1_ref[...], preferred_element_type=jnp.float32)
    h1 = jnp.maximum(h1 + b1_ref[...], 0.0) * m_ref[...]
    # enc2: the 16-channel intermediate never leaves VMEM.
    h2 = jnp.dot(h1.astype(jnp.bfloat16), w2_ref[...],
                 preferred_element_type=jnp.float32)
    o_ref[...] = jnp.maximum(h2 + b2_ref[...], 0.0).astype(o_ref.dtype)


def _bottleneck_kernel(x_ref, w3_ref, b3_ref, w4_ref, b4_ref, o_ref):
    """Fused Conv2d(32,64,7,valid) -> ReLU(ConvTranspose2d(64,32,7)); both are
    1x1-spatial at the bottleneck, so two matmuls with the latent on-chip."""
    z = jnp.dot(x_ref[...], w3_ref[...], preferred_element_type=jnp.float32)
    z = (z + b3_ref[...]).astype(jnp.bfloat16)            # 64-wide latent
    y = jnp.dot(z, w4_ref[...], preferred_element_type=jnp.float32)
    o_ref[...] = jnp.maximum(y + b4_ref[...], 0.0).astype(o_ref.dtype)


def _matmul_bias_relu_kernel(x_ref, w_ref, b_ref, o_ref):
    acc = jnp.dot(x_ref[...], w_ref[...], preferred_element_type=jnp.float32)
    o_ref[...] = jnp.maximum(acc + b_ref[...], 0.0).astype(o_ref.dtype)


def _out_sigmoid_kernel(w_ref, x_ref, b_ref, o_ref):
    """Transposed output layer: lane-dense [4, cols] stores; EUP-tanh sigmoid."""
    acc = jnp.dot(w_ref[...], x_ref[...], preferred_element_type=jnp.float32)
    acc = acc + b_ref[...]
    o_ref[...] = (0.5 * (jnp.tanh(0.5 * acc) + 1.0)).astype(o_ref.dtype)


# ----------------------------------------------------------------------------
# pallas_call wrappers
# ----------------------------------------------------------------------------
def enc_front(rf, mask, w1big, b1rep, w2m, b2):
    """rf: [B*49, 49] bf16 receptive-field patches -> [B*49, 32] bf16."""
    M = rf.shape[0]
    tm = _pick_tile(M, 8, _ROW_TILE_CAP)
    return pl.pallas_call(
        _enc_front_kernel,
        out_shape=jax.ShapeDtypeStruct((M, 32), jnp.bfloat16),
        grid=(pl.cdiv(M, tm),),
        in_specs=[
            pl.BlockSpec((tm, 49), lambda i: (i, 0)),     # RF patches (tiled M)
            pl.BlockSpec((49, 144), lambda i: (0, 0)),    # enc1 weight (resident)
            pl.BlockSpec((1, 144), lambda i: (0, 0)),
            pl.BlockSpec((tm, 144), lambda i: (i, 0)),    # enc2-padding mask
            pl.BlockSpec((144, 32), lambda i: (0, 0)),    # enc2 weight (resident)
            pl.BlockSpec((1, 32), lambda i: (0, 0)),
        ],
        out_specs=pl.BlockSpec((tm, 32), lambda i: (i, 0)),
        compiler_params=_compiler_params(),
    )(rf, w1big, b1rep, mask, w2m, b2)


def bottleneck(h2_flat, w3m, b3, w4m, b4rep):
    """[B, 1568] -> [B, 1568]; grid over 2 lane-dense column tiles (parallel)."""
    B, K1 = h2_flat.shape
    N1 = w3m.shape[1]
    N2 = w4m.shape[1]
    tn = 896 if N2 > 896 else N2                          # 896 = 7 * 128
    return pl.pallas_call(
        _bottleneck_kernel,
        out_shape=jax.ShapeDtypeStruct((B, N2), jnp.bfloat16),
        grid=(pl.cdiv(N2, tn),),
        in_specs=[
            pl.BlockSpec((B, K1), lambda j: (0, 0)),
            pl.BlockSpec((K1, N1), lambda j: (0, 0)),
            pl.BlockSpec((1, N1), lambda j: (0, 0)),
            pl.BlockSpec((N1, tn), lambda j: (0, j)),
            pl.BlockSpec((1, tn), lambda j: (0, j)),
        ],
        out_specs=pl.BlockSpec((B, tn), lambda j: (0, j)),
        compiler_params=_compiler_params(),
    )(h2_flat, w3m, b3, w4m, b4rep)


def matmul_bias_relu(x, w, b, out_dtype):
    """relu(x @ w + b); x:[M,K] bf16, w:[K,N] bf16, b:[1,N] f32."""
    M, K = x.shape
    N = w.shape[1]
    tm = _pick_tile(M, 8, _ROW_TILE_CAP)
    return pl.pallas_call(
        _matmul_bias_relu_kernel,
        out_shape=jax.ShapeDtypeStruct((M, N), out_dtype),
        grid=(pl.cdiv(M, tm),),
        in_specs=[pl.BlockSpec((tm, K), lambda i: (i, 0)),
                  pl.BlockSpec((K, N), lambda i: (0, 0)),
                  pl.BlockSpec((1, N), lambda i: (0, 0))],
        out_specs=pl.BlockSpec((tm, N), lambda i: (i, 0)),
        compiler_params=_compiler_params(),
    )(x, w, b)


def out_layer(patches_t, w6t, b6col):
    """sigmoid(w6t @ patches_t + b); output [4, B*196] (lane-dense stores)."""
    K, C = patches_t.shape
    P = w6t.shape[0]
    tn = _pick_tile(C, 128, _COL_TILE_CAP)
    return pl.pallas_call(
        _out_sigmoid_kernel,
        out_shape=jax.ShapeDtypeStruct((P, C), jnp.float32),
        grid=(pl.cdiv(C, tn),),
        in_specs=[pl.BlockSpec((P, K), lambda j: (0, 0)),
                  pl.BlockSpec((K, tn), lambda j: (0, j)),
                  pl.BlockSpec((P, 1), lambda j: (0, 0))],
        out_specs=pl.BlockSpec((P, tn), lambda j: (0, j)),
        compiler_params=_compiler_params(),
    )(w6t, patches_t, b6col)


# ----------------------------------------------------------------------------
# Parameter init + one-time packing into matmul layout
# ----------------------------------------------------------------------------
def _init_conv(key, cout, cin, k):
    kw, kb = jax.random.split(key)
    bound = 1.0 / math.sqrt(cin * k * k)
    w = jax.random.uniform(kw, (cout, cin, k, k), jnp.float32, -bound, bound)
    b = jax.random.uniform(kb, (cout,), jnp.float32, -bound, bound)
    return w, b


def _init_convT(key, cin, cout, k):
    kw, kb = jax.random.split(key)
    bound = 1.0 / math.sqrt(cout * k * k)
    w = jax.random.uniform(kw, (cin, cout, k, k), jnp.float32, -bound, bound)
    b = jax.random.uniform(kb, (cout,), jnp.float32, -bound, bound)
    return w, b


def _pack_conv(w):
    """[Cout, Cin, k, k] -> [k*k*Cin, Cout] bf16 (rows ordered (i, j, cin))."""
    cout, cin, k, _ = w.shape
    return w.transpose(2, 3, 1, 0).reshape(k * k * cin, cout).astype(jnp.bfloat16)


def _pack_enc_front(w1):
    """Conv2d(1,16,3,s2,p1) weight -> block-structured [49, 144] matmul weight.
    Rows: pixel offset (a,b) inside the 7x7 stride-4 receptive field of one
    enc2 output.  Cols: (i1, j1, c) = the 3x3 grid of enc1 outputs that enc2
    consumes (same ordering as _pack_conv(w2) rows)."""
    W = jnp.zeros((7, 7, 3, 3, 16), jnp.float32)
    for i1 in range(3):
        for j1 in range(3):
            for ti in range(3):
                for tj in range(3):
                    W = W.at[2 * i1 + ti, 2 * j1 + tj, i1, j1, :].set(
                        w1[:, 0, ti, tj])
    return W.reshape(49, 144).astype(jnp.bfloat16)


def _make_enc2_pad_mask():
    """[49, 144] f32: zero where the enc1 output consumed by enc2 lies in
    enc2's zero padding (h1 row/col == -1); prevents ReLU(b1) from leaking."""
    ho = jnp.arange(7).reshape(7, 1, 1, 1)
    wo = jnp.arange(7).reshape(1, 7, 1, 1)
    i1 = jnp.arange(3).reshape(1, 1, 3, 1)
    j1 = jnp.arange(3).reshape(1, 1, 1, 3)
    bad = ((ho == 0) & (i1 == 0)) | ((wo == 0) & (j1 == 0))
    mask = jnp.where(bad, 0.0, 1.0).reshape(49, 9)
    return jnp.repeat(mask, 16, axis=1)                    # (i1, j1, c) columns


# output phase (ph, pw) -> [(shift-view index, kh, kw)] for k=3, s=2, p=1, op=1.
_PHASE_TAPS = {
    0: [(0, 1, 1)],                                        # phase (0, 0)
    1: [(0, 1, 2), (1, 1, 0)],                             # phase (0, 1)
    2: [(0, 2, 1), (2, 0, 1)],                             # phase (1, 0)
    3: [(0, 2, 2), (1, 2, 0), (2, 0, 2), (3, 0, 0)],       # phase (1, 1)
}
_SHIFTS = [(0, 0), (0, 1), (1, 0), (1, 1)]                 # shift-view order


def _pack_convT_phase(w):
    """ConvTranspose2d(k=3,s=2,p=1,op=1) weight [Cin,Cout,3,3] -> [4*Cin,4*Cout].
    Rows = (shift view (dr,dc), ci); cols = (output phase (ph,pw), co).
    Exact sub-pixel decomposition: no zero-dilated input is ever built."""
    cin, cout = w.shape[0], w.shape[1]
    Wb = jnp.zeros((4, cin, 4, cout), jnp.float32)
    for phase, taps in _PHASE_TAPS.items():
        for v, kh, kw in taps:
            Wb = Wb.at[v, :, phase, :].set(w[:, :, kh, kw])
    return Wb.reshape(4 * cin, 4 * cout).astype(jnp.bfloat16)


def init_autoencoder_params(key):
    keys = jax.random.split(key, 6)
    w1, b1 = _init_conv(keys[0], 16, 1, 3)     # Conv2d(1, 16, 3, s=2, p=1)
    w2, b2 = _init_conv(keys[1], 32, 16, 3)    # Conv2d(16, 32, 3, s=2, p=1)
    w3, b3 = _init_conv(keys[2], 64, 32, 7)    # Conv2d(32, 64, 7)
    w4, b4 = _init_convT(keys[3], 64, 32, 7)   # ConvT(64, 32, 7)
    w5, b5 = _init_convT(keys[4], 32, 16, 3)   # ConvT(32, 16, 3, s=2, p=1, op=1)
    w6, b6 = _init_convT(keys[5], 16, 1, 3)    # ConvT(16, 1, 3, s=2, p=1, op=1)

    return {
        "enc_front": (
            _pack_enc_front(w1),                                  # [49, 144]
            jnp.tile(b1, 9).reshape(1, 144),                      # per (i1,j1,c)
            _pack_conv(w2),                                       # [144, 32]
            b2.reshape(1, 32),
        ),
        "enc2_mask": _make_enc2_pad_mask(),                       # [49, 144]
        "bottleneck": (
            _pack_conv(w3),                                       # [1568, 64]
            b3.reshape(1, 64),
            w4.transpose(0, 2, 3, 1).reshape(64, 49 * 32).astype(jnp.bfloat16),
            jnp.tile(b4, 49).reshape(1, 49 * 32),
        ),
        "dec5": (_pack_convT_phase(w5),                           # [128, 64]
                 jnp.tile(b5, 4).reshape(1, 64)),
        "dec6": (_pack_convT_phase(w6).T,                         # [4, 64]
                 jnp.tile(b6.reshape(1, 1), (4, 1)).astype(jnp.float32)),
    }


# ----------------------------------------------------------------------------
# Forward pass (semantics identical to the PyTorch Autoencoder)
# ----------------------------------------------------------------------------
_RF_OFFSETS = [(a, b) for a in range(7) for b in range(7)]


def autoencoder_forward(x, params):
    """x: [B, 1, 28, 28] f32 (NCHW) -> [B, 1, 28, 28] f32 in [0, 1]."""
    B = x.shape[0]
    img = x[:, 0].astype(jnp.bfloat16)                            # [B, 28, 28]

    # ---- fused enc1 + enc2 -------------------------------------------------
    # 7x7 / stride-4 receptive-field patches of each enc2 output (pad 3 top/left)
    xp = jnp.pad(img, ((0, 0), (3, 0), (3, 0)))                   # [B, 31, 31]
    rf = jnp.stack([xp[:, a:a + 25:4, b:b + 25:4] for a, b in _RF_OFFSETS],
                   axis=-1)                                       # [B, 7, 7, 49]
    rf = rf.reshape(B * 49, 49)
    mask = jnp.tile(params["enc2_mask"], (B, 1))                  # [B*49, 144]
    h2 = enc_front(rf, mask, *params["enc_front"])                # [B*49, 32]

    # ---- bottleneck: Conv2d(32,64,7) -> ReLU(ConvTranspose2d(64,32,7)) -----
    d4 = bottleneck(h2.reshape(B, 49 * 32), *params["bottleneck"])
    d4 = d4.reshape(B, 7, 7, 32)                                  # NHWC

    # ---- dec5: ConvT(32,16,3,s2,p1,op1) + ReLU, phase-decomposed -----------
    d4p = jnp.pad(d4, ((0, 0), (0, 1), (0, 1), (0, 0)))           # [B, 8, 8, 32]
    p5 = jnp.concatenate(
        [d4p[:, dr:dr + 7, dc:dc + 7, :] for dr, dc in _SHIFTS], axis=-1)
    y5 = matmul_bias_relu(p5.reshape(B * 49, 128), *params["dec5"],
                          out_dtype=jnp.bfloat16)                 # [B*49, 64]
    y5 = (y5.reshape(B, 7, 7, 2, 2, 16)
            .transpose(0, 1, 3, 2, 4, 5).reshape(B, 14, 14, 16))

    # ---- dec6: ConvT(16,1,3,s2,p1,op1) + Sigmoid, phase-decomposed,
    #      computed transposed so stores are lane-dense --------------------
    y5p = jnp.pad(y5, ((0, 0), (0, 1), (0, 1), (0, 0)))           # [B, 15, 15, 16]
    p6 = jnp.stack([y5p[:, dr:dr + 14, dc:dc + 14, :] for dr, dc in _SHIFTS],
                   axis=0)                                        # [4, B, 14, 14, 16]
    p6 = p6.transpose(0, 4, 1, 2, 3).reshape(64, B * 196)         # rows (view, ci)
    out_t = out_layer(p6, *params["dec6"])                        # [4, B*196] f32

    # interleave phases back into pixel order
    y = (out_t.reshape(2, 2, B, 14, 14)
              .transpose(2, 3, 0, 4, 1).reshape(B, 1, 28, 28))
    return y


if __name__ == "__main__":
    key = jax.random.PRNGKey(0)
    pkey, xkey = jax.random.split(key)
    params = init_autoencoder_params(pkey)
    # 28x28 input is required by the 7x7 valid conv at the bottleneck.
    x = jax.random.normal(xkey, (2, 1, 28, 28), dtype=jnp.float32)

    fwd = jax.jit(autoencoder_forward)
    y = jax.block_until_ready(fwd(x, params))

    assert y.shape == (2, 1, 28, 28), y.shape
    assert bool(jnp.all(jnp.isfinite(y)))
    assert bool(jnp.all((y >= 0.0) & (y <= 1.0)))   # sigmoid output range
    print("KERNEL_OK")
</pallas_src>

<mosaic_0001>
module attributes {stable_mosaic.version = 11 : i64} {
  func.func @_bottleneck_kernel(%arg0: i32, %arg1: memref<2x1568xbf16, #tpu.memory_space<vmem>>, %arg2: memref<1568x64xbf16, #tpu.memory_space<vmem>>, %arg3: memref<1x64xf32, #tpu.memory_space<vmem>>, %arg4: memref<64x896xbf16, #tpu.memory_space<vmem>>, %arg5: memref<1x896xf32, #tpu.memory_space<vmem>>, %arg6: memref<2x896xbf16, #tpu.memory_space<vmem>>) attributes {dimension_semantics = [#tpu.dimension_semantics<parallel>], iteration_bounds = array<i64: 2>, scalar_prefetch = 0 : i64, scratch_operands = 0 : i64, tpu.core_type = #tpu.core_type<tc>, window_params = [{pipeline_mode = #tpu.pipeline_mode<synchronous>, transform_indices = @transform_0, window_bounds = array<i64: 2, 1568>}, {pipeline_mode = #tpu.pipeline_mode<synchronous>, transform_indices = @transform_1, window_bounds = array<i64: 1568, 64>}, {pipeline_mode = #tpu.pipeline_mode<synchronous>, transform_indices = @transform_2, window_bounds = array<i64: 1, 64>}, {transform_indices = @transform_3, window_bounds = array<i64: 64, 896>}, {transform_indices = @transform_4, window_bounds = array<i64: 1, 896>}, {transform_indices = @transform_5, window_bounds = array<i64: 2, 896>}]} {
    %c0 = arith.constant 0 : index
    %c0_0 = arith.constant 0 : index
    %0 = vector.load %arg1[%c0, %c0_0] : memref<2x1568xbf16, #tpu.memory_space<vmem>>, vector<2x1568xbf16>
    %c0_1 = arith.constant 0 : index
    %c0_2 = arith.constant 0 : index
    %1 = vector.load %arg2[%c0_1, %c0_2] : memref<1568x64xbf16, #tpu.memory_space<vmem>>, vector<1568x64xbf16>
    %cst = arith.constant dense<0.000000e+00> : vector<2x64xf32>
    %2 = tpu.matmul %0, %1, %cst {dimension_numbers = #tpu.dot_dimension_numbers<[1], [0], [0], [1], [0, 0, 1, 1], [], []>} : vector<2x1568xbf16>, vector<1568x64xbf16>, vector<2x64xf32> -> vector<2x64xf32>
    %c0_3 = arith.constant 0 : index
    %c0_4 = arith.constant 0 : index
    %3 = vector.load %arg3[%c0_3, %c0_4] : memref<1x64xf32, #tpu.memory_space<vmem>>, vector<1x64xf32>
    %4 = vector.broadcast %3 : vector<1x64xf32> to vector<2x64xf32>
    %5 = arith.addf %2, %4 : vector<2x64xf32>
    %6 = arith.truncf %5 : vector<2x64xf32> to vector<2x64xbf16>
    %c0_5 = arith.constant 0 : index
    %c0_6 = arith.constant 0 : index
    %7 = vector.load %arg4[%c0_5, %c0_6] : memref<64x896xbf16, #tpu.memory_space<vmem>>, vector<64x896xbf16>
    %cst_7 = arith.constant dense<0.000000e+00> : vector<2x896xf32>
    %8 = tpu.matmul %6, %7, %cst_7 {dimension_numbers = #tpu.dot_dimension_numbers<[1], [0], [0], [1], [0, 0, 1, 1], [], []>} : vector<2x64xbf16>, vector<64x896xbf16>, vector<2x896xf32> -> vector<2x896xf32>
    %c0_8 = arith.constant 0 : index
    %c0_9 = arith.constant 0 : index
    %9 = vector.load %arg5[%c0_8, %c0_9] : memref<1x896xf32, #tpu.memory_space<vmem>>, vector<1x896xf32>
    %10 = vector.broadcast %9 : vector<1x896xf32> to vector<2x896xf32>
    %11 = arith.addf %8, %10 : vector<2x896xf32>
    %cst_10 = arith.constant 0.000000e+00 : f32
    %12 = vector.broadcast %cst_10 : f32 to vector<2x896xf32>
    %13 = arith.maximumf %11, %12 : vector<2x896xf32>
    %14 = arith.truncf %13 : vector<2x896xf32> to vector<2x896xbf16>
    %c0_11 = arith.constant 0 : index
    %c0_12 = arith.constant 0 : index
    %15 = vector.load %arg6[%c0_11, %c0_12] : memref<2x896xbf16, #tpu.memory_space<vmem>>, vector<2x896xbf16>
    tpu.vector_store %arg6[%c0_11, %c0_12], %14 {strides = array<i32>} : memref<2x896xbf16, #tpu.memory_space<vmem>>, vector<2x896xbf16>,
    return
  }
  func.func @transform_0(%arg0: i32) -> (i32, i32) {
    %c0_i32 = arith.constant 0 : i32
    %c0_i32_0 = arith.constant 0 : i32
    %c0_i32_1 = arith.constant 0 : i32
    return %c0_i32, %c0_i32_0 : i32, i32
  }
  func.func @transform_1(%arg0: i32) -> (i32, i32) {
    %c0_i32 = arith.constant 0 : i32
    %c0_i32_0 = arith.constant 0 : i32
    %c0_i32_1 = arith.constant 0 : i32
    return %c0_i32, %c0_i32_0 : i32, i32
  }
  func.func @transform_2(%arg0: i32) -> (i32, i32) {
    %c0_i32 = arith.constant 0 : i32
    %c0_i32_0 = arith.constant 0 : i32
    %c0_i32_1 = arith.constant 0 : i32
    return %c0_i32, %c0_i32_0 : i32, i32
  }
  func.func @transform_3(%arg0: i32) -> (i32, i32) {
    %c0_i32 = arith.constant 0 : i32
    %c0_i32_0 = arith.constant 0 : i32
    return %c0_i32, %arg0 : i32, i32
  }
  func.func @transform_4(%arg0: i32) -> (i32, i32) {
    %c0_i32 = arith.constant 0 : i32
    %c0_i32_0 = arith.constant 0 : i32
    return %c0_i32, %arg0 : i32, i32
  }
  func.func @transform_5(%arg0: i32) -> (i32, i32) {
    %c0_i32 = arith.constant 0 : i32
    %c0_i32_0 = arith.constant 0 : i32
    return %c0_i32, %arg0 : i32, i32
  }
}

module attributes {stable_mosaic.version = 11 : i64} {
  func.func @_enc_front_kernel(%arg0: i32, %arg1: memref<56x49xbf16, #tpu.memory_space<vmem>>, %arg2: memref<49x144xbf16, #tpu.memory_space<vmem>>, %arg3: memref<1x144xf32, #tpu.memory_space<vmem>>, %arg4: memref<56x144xf32, #tpu.memory_space<vmem>>, %arg5: memref<144x32xbf16, #tpu.memory_space<vmem>>, %arg6: memref<1x32xf32, #tpu.memory_space<vmem>>, %arg7: memref<56x32xbf16, #tpu.memory_space<vmem>>) attributes {dimension_semantics = [#tpu.dimension_semantics<parallel>], iteration_bounds = array<i64: 2>, scalar_prefetch = 0 : i64, scratch_operands = 0 : i64, tpu.core_type = #tpu.core_type<tc>, window_params = [{transform_indices = @transform_0, window_bounds = array<i64: 56, 49>}, {pipeline_mode = #tpu.pipeline_mode<synchronous>, transform_indices = @transform_1, window_bounds = array<i64: 49, 144>}, {pipeline_mode = #tpu.pipeline_mode<synchronous>, transform_indices = @transform_2, window_bounds = array<i64: 1, 144>}, {transform_indices = @transform_3, window_bounds = array<i64: 56, 144>}, {pipeline_mode = #tpu.pipeline_mode<synchronous>, transform_indices = @transform_4, window_bounds = array<i64: 144, 32>}, {pipeline_mode = #tpu.pipeline_mode<synchronous>, transform_indices = @transform_5, window_bounds = array<i64: 1, 32>}, {transform_indices = @transform_6, window_bounds = array<i64: 56, 32>}]} {
    %c0 = arith.constant 0 : index
    %c0_0 = arith.constant 0 : index
    %0 = vector.load %arg1[%c0, %c0_0] : memref<56x49xbf16, #tpu.memory_space<vmem>>, vector<56x49xbf16>
    %c0_1 = arith.constant 0 : index
    %c0_2 = arith.constant 0 : index
    %1 = vector.load %arg2[%c0_1, %c0_2] : memref<49x144xbf16, #tpu.memory_space<vmem>>, vector<49x144xbf16>
    %cst = arith.constant dense<0.000000e+00> : vector<56x144xf32>
    %2 = tpu.matmul %0, %1, %cst {dimension_numbers = #tpu.dot_dimension_numbers<[1], [0], [0], [1], [0, 0, 1, 1], [], []>} : vector<56x49xbf16>, vector<49x144xbf16>, vector<56x144xf32> -> vector<56x144xf32>
    %c0_3 = arith.constant 0 : index
    %c0_4 = arith.constant 0 : index
    %3 = vector.load %arg3[%c0_3, %c0_4] : memref<1x144xf32, #tpu.memory_space<vmem>>, vector<1x144xf32>
    %4 = vector.broadcast %3 : vector<1x144xf32> to vector<56x144xf32>
    %5 = arith.addf %2, %4 : vector<56x144xf32>
    %cst_5 = arith.constant 0.000000e+00 : f32
    %6 = vector.broadcast %cst_5 : f32 to vector<56x144xf32>
    %7 = arith.maximumf %5, %6 : vector<56x144xf32>
    %c0_6 = arith.constant 0 : index
    %c0_7 = arith.constant 0 : index
    %8 = vector.load %arg4[%c0_6, %c0_7] : memref<56x144xf32, #tpu.memory_space<vmem>>, vector<56x144xf32>
    %9 = vector.shape_cast %8 : vector<56x144xf32> to vector<56x144xf32>
    %10 = arith.mulf %7, %9 : vector<56x144xf32>
    %11 = arith.truncf %10 : vector<56x144xf32> to vector<56x144xbf16>
    %c0_8 = arith.constant 0 : index
    %c0_9 = arith.constant 0 : index
    %12 = vector.load %arg5[%c0_8, %c0_9] : memref<144x32xbf16, #tpu.memory_space<vmem>>, vector<144x32xbf16>
    %cst_10 = arith.constant dense<0.000000e+00> : vector<56x32xf32>
    %13 = tpu.matmul %11, %12, %cst_10 {dimension_numbers = #tpu.dot_dimension_numbers<[1], [0], [0], [1], [0, 0, 1, 1], [], []>} : vector<56x144xbf16>, vector<144x32xbf16>, vector<56x32xf32> -> vector<56x32xf32>
    %c0_11 = arith.constant 0 : index
    %c0_12 = arith.constant 0 : index
    %14 = vector.load %arg6[%c0_11, %c0_12] : memref<1x32xf32, #tpu.memory_space<vmem>>, vector<1x32xf32>
    %15 = vector.broadcast %14 : vector<1x32xf32> to vector<56x32xf32>
    %16 = arith.addf %13, %15 : vector<56x32xf32>
    %cst_13 = arith.constant 0.000000e+00 : f32
    %17 = vector.broadcast %cst_13 : f32 to vector<56x32xf32>
    %18 = arith.maximumf %16, %17 : vector<56x32xf32>
    %19 = arith.truncf %18 : vector<56x32xf32> to vector<56x32xbf16>
    %c0_14 = arith.constant 0 : index
    %c0_15 = arith.constant 0 : index
    %20 = vector.load %arg7[%c0_14, %c0_15] : memref<56x32xbf16, #tpu.memory_space<vmem>>, vector<56x32xbf16>
    tpu.vector_store %arg7[%c0_14, %c0_15], %19 {strides = array<i32>} : memref<56x32xbf16, #tpu.memory_space<vmem>>, vector<56x32xbf16>,
    return
  }
  func.func @transform_0(%arg0: i32) -> (i32, i32) {
    %c0_i32 = arith.constant 0 : i32
    %c0_i32_0 = arith.constant 0 : i32
    return %arg0, %c0_i32 : i32, i32
  }
  func.func @transform_1(%arg0: i32) -> (i32, i32) {
    %c0_i32 = arith.constant 0 : i32
    %c0_i32_0 = arith.constant 0 : i32
    %c0_i32_1 = arith.constant 0 : i32
    return %c0_i32, %c0_i32_0 : i32, i32
  }
  func.func @transform_2(%arg0: i32) -> (i32, i32) {
    %c0_i32 = arith.constant 0 : i32
    %c0_i32_0 = arith.constant 0 : i32
    %c0_i32_1 = arith.constant 0 : i32
    return %c0_i32, %c0_i32_0 : i32, i32
  }
  func.func @transform_3(%arg0: i32) -> (i32, i32) {
    %c0_i32 = arith.constant 0 : i32
    %c0_i32_0 = arith.constant 0 : i32
    return %arg0, %c0_i32 : i32, i32
  }
  func.func @transform_4(%arg0: i32) -> (i32, i32) {
    %c0_i32 = arith.constant 0 : i32
    %c0_i32_0 = arith.constant 0 : i32
    %c0_i32_1 = arith.constant 0 : i32
    return %c0_i32, %c0_i32_0 : i32, i32
  }
  func.func @transform_5(%arg0: i32) -> (i32, i32) {
    %c0_i32 = arith.constant 0 : i32
    %c0_i32_0 = arith.constant 0 : i32
    %c0_i32_1 = arith.constant 0 : i32
    return %c0_i32, %c0_i32_0 : i32, i32
  }
  func.func @transform_6(%arg0: i32) -> (i32, i32) {
    %c0_i32 = arith.constant 0 : i32
    %c0_i32_0 = arith.constant 0 : i32
    return %arg0, %c0_i32 : i32, i32
  }
}

module attributes {stable_mosaic.version = 11 : i64} {
  func.func @_matmul_bias_relu_kernel(%arg0: i32, %arg1: memref<56x128xbf16, #tpu.memory_space<vmem>>, %arg2: memref<128x64xbf16, #tpu.memory_space<vmem>>, %arg3: memref<1x64xf32, #tpu.memory_space<vmem>>, %arg4: memref<56x64xbf16, #tpu.memory_space<vmem>>) attributes {dimension_semantics = [#tpu.dimension_semantics<parallel>], iteration_bounds = array<i64: 2>, scalar_prefetch = 0 : i64, scratch_operands = 0 : i64, tpu.core_type = #tpu.core_type<tc>, window_params = [{transform_indices = @transform_0, window_bounds = array<i64: 56, 128>}, {pipeline_mode = #tpu.pipeline_mode<synchronous>, transform_indices = @transform_1, window_bounds = array<i64: 128, 64>}, {pipeline_mode = #tpu.pipeline_mode<synchronous>, transform_indices = @transform_2, window_bounds = array<i64: 1, 64>}, {transform_indices = @transform_3, window_bounds = array<i64: 56, 64>}]} {
    %c0 = arith.constant 0 : index
    %c0_0 = arith.constant 0 : index
    %0 = vector.load %arg1[%c0, %c0_0] : memref<56x128xbf16, #tpu.memory_space<vmem>>, vector<56x128xbf16>
    %c0_1 = arith.constant 0 : index
    %c0_2 = arith.constant 0 : index
    %1 = vector.load %arg2[%c0_1, %c0_2] : memref<128x64xbf16, #tpu.memory_space<vmem>>, vector<128x64xbf16>
    %cst = arith.constant dense<0.000000e+00> : vector<56x64xf32>
    %2 = tpu.matmul %0, %1, %cst {dimension_numbers = #tpu.dot_dimension_numbers<[1], [0], [0], [1], [0, 0, 1, 1], [], []>} : vector<56x128xbf16>, vector<128x64xbf16>, vector<56x64xf32> -> vector<56x64xf32>
    %c0_3 = arith.constant 0 : index
    %c0_4 = arith.constant 0 : index
    %3 = vector.load %arg3[%c0_3, %c0_4] : memref<1x64xf32, #tpu.memory_space<vmem>>, vector<1x64xf32>
    %4 = vector.broadcast %3 : vector<1x64xf32> to vector<56x64xf32>
    %5 = arith.addf %2, %4 : vector<56x64xf32>
    %cst_5 = arith.constant 0.000000e+00 : f32
    %6 = vector.broadcast %cst_5 : f32 to vector<56x64xf32>
    %7 = arith.maximumf %5, %6 : vector<56x64xf32>
    %8 = arith.truncf %7 : vector<56x64xf32> to vector<56x64xbf16>
    %c0_6 = arith.constant 0 : index
    %c0_7 = arith.constant 0 : index
    %9 = vector.load %arg4[%c0_6, %c0_7] : memref<56x64xbf16, #tpu.memory_space<vmem>>, vector<56x64xbf16>
    tpu.vector_store %arg4[%c0_6, %c0_7], %8 {strides = array<i32>} : memref<56x64xbf16, #tpu.memory_space<vmem>>, vector<56x64xbf16>,
    return
  }
  func.func @transform_0(%arg0: i32) -> (i32, i32) {
    %c0_i32 = arith.constant 0 : i32
    %c0_i32_0 = arith.constant 0 : i32
    return %arg0, %c0_i32 : i32, i32
  }
  func.func @transform_1(%arg0: i32) -> (i32, i32) {
    %c0_i32 = arith.constant 0 : i32
    %c0_i32_0 = arith.constant 0 : i32
    %c0_i32_1 = arith.constant 0 : i32
    return %c0_i32, %c0_i32_0 : i32, i32
  }
  func.func @transform_2(%arg0: i32) -> (i32, i32) {
    %c0_i32 = arith.constant 0 : i32
    %c0_i32_0 = arith.constant 0 : i32
    %c0_i32_1 = arith.constant 0 : i32
    return %c0_i32, %c0_i32_0 : i32, i32
  }
  func.func @transform_3(%arg0: i32) -> (i32, i32) {
    %c0_i32 = arith.constant 0 : i32
    %c0_i32_0 = arith.constant 0 : i32
    return %arg0, %c0_i32 : i32, i32
  }
}

module attributes {stable_mosaic.version = 11 : i64} {
  func.func @_out_sigmoid_kernel(%arg0: i32, %arg1: memref<4x64xbf16, #tpu.memory_space<vmem>>, %arg2: memref<64x256xbf16, #tpu.memory_space<vmem>>, %arg3: memref<4x1xf32, #tpu.memory_space<vmem>>, %arg4: memref<4x256xf32, #tpu.memory_space<vmem>>) attributes {dimension_semantics = [#tpu.dimension_semantics<parallel>], iteration_bounds = array<i64: 2>, scalar_prefetch = 0 : i64, scratch_operands = 0 : i64, tpu.core_type = #tpu.core_type<tc>, window_params = [{pipeline_mode = #tpu.pipeline_mode<synchronous>, transform_indices = @transform_0, window_bounds = array<i64: 4, 64>}, {transform_indices = @transform_1, window_bounds = array<i64: 64, 256>}, {pipeline_mode = #tpu.pipeline_mode<synchronous>, transform_indices = @transform_2, window_bounds = array<i64: 4, 1>}, {transform_indices = @transform_3, window_bounds = array<i64: 4, 256>}]} {
    %c0 = arith.constant 0 : index
    %c0_0 = arith.constant 0 : index
    %0 = vector.load %arg1[%c0, %c0_0] : memref<4x64xbf16, #tpu.memory_space<vmem>>, vector<4x64xbf16>
    %c0_1 = arith.constant 0 : index
    %c0_2 = arith.constant 0 : index
    %1 = vector.load %arg2[%c0_1, %c0_2] : memref<64x256xbf16, #tpu.memory_space<vmem>>, vector<64x256xbf16>
    %cst = arith.constant dense<0.000000e+00> : vector<4x256xf32>
    %2 = tpu.matmul %0, %1, %cst {dimension_numbers = #tpu.dot_dimension_numbers<[1], [0], [0], [1], [0, 0, 1, 1], [], []>} : vector<4x64xbf16>, vector<64x256xbf16>, vector<4x256xf32> -> vector<4x256xf32>
    %c0_3 = arith.constant 0 : index
    %c0_4 = arith.constant 0 : index
    %3 = vector.load %arg3[%c0_3, %c0_4] : memref<4x1xf32, #tpu.memory_space<vmem>>, vector<4x1xf32>
    %4 = vector.broadcast %3 : vector<4x1xf32> to vector<4x256xf32>
    %5 = arith.addf %2, %4 : vector<4x256xf32>
    %cst_5 = arith.constant 5.000000e-01 : f32
    %6 = vector.broadcast %cst_5 : f32 to vector<4x256xf32>
    %7 = arith.mulf %6, %5 : vector<4x256xf32>
    %8 = math.tanh %7 : vector<4x256xf32>
    %cst_6 = arith.constant 1.000000e+00 : f32
    %9 = vector.broadcast %cst_6 : f32 to vector<4x256xf32>
    %10 = arith.addf %8, %9 : vector<4x256xf32>
    %cst_7 = arith.constant 5.000000e-01 : f32
    %11 = vector.broadcast %cst_7 : f32 to vector<4x256xf32>
    %12 = arith.mulf %11, %10 : vector<4x256xf32>
    %c0_8 = arith.constant 0 : index
    %c0_9 = arith.constant 0 : index
    %13 = vector.load %arg4[%c0_8, %c0_9] : memref<4x256xf32, #tpu.memory_space<vmem>>, vector<4x256xf32>
    tpu.vector_store %arg4[%c0_8, %c0_9], %12 {strides = array<i32>} : memref<4x256xf32, #tpu.memory_space<vmem>>, vector<4x256xf32>,
    return
  }
  func.func @transform_0(%arg0: i32) -> (i32, i32) {
    %c0_i32 = arith.constant 0 : i32
    %c0_i32_0 = arith.constant 0 : i32
    %c0_i32_1 = arith.constant 0 : i32
    return %c0_i32, %c0_i32_0 : i32, i32
  }
  func.func @transform_1(%arg0: i32) -> (i32, i32) {
    %c0_i32 = arith.constant 0 : i32
    %c0_i32_0 = arith.constant 0 : i32
    return %c0_i32, %arg0 : i32, i32
  }
  func.func @transform_2(%arg0: i32) -> (i32, i32) {
    %c0_i32 = arith.constant 0 : i32
    %c0_i32_0 = arith.constant 0 : i32
    %c0_i32_1 = arith.constant 0 : i32
    return %c0_i32, %c0_i32_0 : i32, i32
  }
  func.func @transform_3(%arg0: i32) -> (i32, i32) {
    %c0_i32 = arith.constant 0 : i32
    %c0_i32_0 = arith.constant 0 : i32
    return %c0_i32, %arg0 : i32, i32
  }
}

</mosaic_0001>

<bundles_post_ra>
// kernel: tile.9
= control target key start
LH: loop header
LB: loop body
LE: loop exit
PB: predicated region body
PF: predicated region fallthrough
CT: control target
= control target key end

     0   :  { %vm4_vm0 = vcmask 130048   ;;  %s33_s6 = smov 3  ;;  %s108_s24 = smov 3  ;;  %s452_s0 = inlined_call_operand.vmem [shape: f32[2,49,144], index: 0, kind: input, shape index: {}]   ;;  %s453_s1 = inlined_call_operand.vmem [shape: f32[98,144], index: 1, kind: output, shape index: {}]  }
   0x1   :  { %v152_v0 = vld [vmem:[%s452_s0 + $0x8] sm:$0xff]   ;;  %v154_v1 = vld [vmem:[%s452_s0 + $0x18] sm:$0xff]   ;;  %v85_v14 = vld [vmem:[%s452_s0] sm:$0xff]  }
   0x2   :  { %v156_v2 = vld [vmem:[%s452_s0 + $0x28] sm:$0xff]   ;;  %153 = vst.msk [vmem:[%s453_s1 + $0x8] sm:$0xff] %vm4_vm0, %v152_v0   ;;  %155 = vst.msk [vmem:[%s453_s1 + $0x18] sm:$0xff] %vm4_vm0, %v154_v1   ;;  %v158_v3 = vld [vmem:[%s452_s0 + $0x38] sm:$0xff]  }
   0x3   :  { %157 = vst.msk [vmem:[%s453_s1 + $0x28] sm:$0xff] %vm4_vm0, %v156_v2   ;;  %v160_v4 = vld [vmem:[%s452_s0 + $0x48] sm:$0xff]   ;;  %v162_v5 = vld [vmem:[%s452_s0 + $0x58] sm:$0xff]   ;;  %159 = vst.msk [vmem:[%s453_s1 + $0x38] sm:$0xff] %vm4_vm0, %v158_v3  }
   0x4   :  { %161 = vst.msk [vmem:[%s453_s1 + $0x48] sm:$0xff] %vm4_vm0, %v160_v4   ;;  %163 = vst.msk [vmem:[%s453_s1 + $0x58] sm:$0xff] %vm4_vm0, %v162_v5   ;;  %v164_v6 = vld [vmem:[%s452_s0 + $0x68] ss:$16 sm:%s33_s6]  }
   0x5   :  { %v166_v7 = vld [vmem:[%s452_s0 + $0x79] sm:$0x7f]   ;;  %v169_v8 = vld [vmem:[%s452_s0 + $0x88] sm:$0xff]   ;;  %165 = vst.msk [vmem:[%s453_s1 + $0x68] sm:$0x3] %vm4_vm0, %v164_v6   ;;  %86 = vst [vmem:[%s453_s1] sm:$0xff] %v85_v14  }
   0x6   :  { %167 = vst.msk [vmem:[%s453_s1 + $0x6a] sm:$0x3f] %vm4_vm0, %v166_v7   ;;  %168 = vst.msk [vmem:[%s453_s1 + $0x72] sm:$0x40] %vm4_vm0, %v166_v7   ;;  %v172_v9 = vld [vmem:[%s452_s0 + $0x98] sm:$0xff]   ;;  %v175_v10 = vld [vmem:[%s452_s0 + $0xa8] sm:$0xff]  }
   0x7   :  { %170 = vst.msk [vmem:[%s453_s1 + $0x79] sm:$0x7f] %vm4_vm0, %v169_v8   ;;  %171 = vst.msk [vmem:[%s453_s1 + $0x81] sm:$0x80] %vm4_vm0, %v169_v8   ;;  %v178_v11 = vld [vmem:[%s452_s0 + $0xb8] sm:$0xff]   ;;  %v181_v12 = vld [vmem:[%s452_s0 + $0xc8] sm:$0xff]  }
   0x8   :  { %173 = vst.msk [vmem:[%s453_s1 + $0x89] sm:$0x7f] %vm4_vm0, %v172_v9   ;;  %174 = vst.msk [vmem:[%s453_s1 + $0x91] sm:$0x80] %vm4_vm0, %v172_v9   ;;  %v184_v13 = vld [vmem:[%s452_s0 + $0xd8] sm:$0x1]  }
   0x9   :  { %176 = vst.msk [vmem:[%s453_s1 + $0x99] sm:$0x7f] %vm4_vm0, %v175_v10   ;;  %177 = vst.msk [vmem:[%s453_s1 + $0xa1] sm:$0x80] %vm4_vm0, %v175_v10   ;;  %v186_v15 = vld [vmem:[%s452_s0 + $0x10] sm:$0xff]   ;;  %v188_v16 = vld [vmem:[%s452_s0 + $0x20] sm:$0xff]  }
   0xa   :  { %179 = vst.msk [vmem:[%s453_s1 + $0xa9] sm:$0x7f] %vm4_vm0, %v178_v11   ;;  %180 = vst.msk [vmem:[%s453_s1 + $0xb1] sm:$0x80] %vm4_vm0, %v178_v11   ;;  %v190_v17 = vld [vmem:[%s452_s0 + $0x30] sm:$0xff]   ;;  %v192_v18 = vld [vmem:[%s452_s0 + $0x40] sm:$0xff]  }
   0xb   :  { %182 = vst.msk [vmem:[%s453_s1 + $0xb9] sm:$0x7f] %vm4_vm0, %v181_v12   ;;  %183 = vst.msk [vmem:[%s453_s1 + $0xc1] sm:$0x80] %vm4_vm0, %v181_v12   ;;  %v194_v19 = vld [vmem:[%s452_s0 + $0x50] sm:$0xff]   ;;  %v201_v22 = vld [vmem:[%s452_s0 + $0x80] sm:$0xff]  }
   0xc   :  { %185 = vst.msk [vmem:[%s453_s1 + $0xc9] sm:$0x1] %vm4_vm0, %v184_v13   ;;  %187 = vst [vmem:[%s453_s1 + $0x10] sm:$0xff] %v186_v15   ;;  %v196_v20 = vld [vmem:[%s452_s0 + $0x60] ss:$16 sm:%s108_s24]  }
   0xd   :  { %189 = vst [vmem:[%s453_s1 + $0x20] sm:$0xff] %v188_v16   ;;  %191 = vst [vmem:[%s453_s1 + $0x30] sm:$0xff] %v190_v17   ;;  %v198_v21 = vld [vmem:[%s452_s0 + $0x71] sm:$0x7f]   ;;  %v207_v24 = vld [vmem:[%s452_s0 + $0xa0] sm:$0xff]  }
   0xe   :  { %193 = vst [vmem:[%s453_s1 + $0x40] sm:$0xff] %v192_v18   ;;  %195 = vst [vmem:[%s453_s1 + $0x50] sm:$0xff] %v194_v19   ;;  %v204_v23 = vld [vmem:[%s452_s0 + $0x90] sm:$0xff]   ;;  %v213_v26 = vld [vmem:[%s452_s0 + $0xc0] sm:$0xff]  }
   0xf   :  { %197 = vst [vmem:[%s453_s1 + $0x60] sm:$0x3] %v196_v20   ;;  %199 = vst [vmem:[%s453_s1 + $0x62] sm:$0x3f] %v198_v21   ;;  %v210_v25 = vld [vmem:[%s452_s0 + $0xb0] sm:$0xff]  }
  0x10   :  { %200 = vst [vmem:[%s453_s1 + $0x6a] sm:$0x40] %v198_v21   ;;  %202 = vst [vmem:[%s453_s1 + $0x71] sm:$0x7f] %v201_v22   ;;  %v216_v27 = vld [vmem:[%s452_s0 + $0xd0] sm:$0x1]  }
  0x11   :  { %203 = vst [vmem:[%s453_s1 + $0x79] sm:$0x80] %v201_v22   ;;  %205 = vst [vmem:[%s453_s1 + $0x81] sm:$0x7f] %v204_v23  }
  0x12   :  { %206 = vst [vmem:[%s453_s1 + $0x89] sm:$0x80] %v204_v23   ;;  %208 = vst [vmem:[%s453_s1 + $0x91] sm:$0x7f] %v207_v24  }
  0x13   :  { %209 = vst [vmem:[%s453_s1 + $0x99] sm:$0x80] %v207_v24   ;;  %211 = vst [vmem:[%s453_s1 + $0xa1] sm:$0x7f] %v210_v25  }
  0x14   :  { %212 = vst [vmem:[%s453_s1 + $0xa9] sm:$0x80] %v210_v25   ;;  %214 = vst [vmem:[%s453_s1 + $0xb1] sm:$0x7f] %v213_v26  }
  0x15   :  { %215 = vst [vmem:[%s453_s1 + $0xb9] sm:$0x80] %v213_v26   ;;  %217 = vst [vmem:[%s453_s1 + $0xc1] sm:$0x1] %v216_v27  }

// kernel: autoencoder_forward.4
= control target key start
LH: loop header
LB: loop body
LE: loop exit
PB: predicated region body
PF: predicated region fallthrough
CT: control target
= control target key end

     0   :  { %s1326_s21 = smov 0   ;;  %s1328_s22 = smov 0   ;;  %s1568_s0 = inlined_call_operand.vmem [shape: bf16[98,49], index: 0, kind: input, shape index: {}]   ;;  %s1569_s1 = inlined_call_operand.vmem [shape: bf16[49,144], index: 1, kind: input, shape index: {}]   ;;  %s1570_s2 = inlined_call_operand.vmem [shape: f32[1,144], index: 2, kind: input, shape index: {}]   ;;  %s1571_s3 = inlined_call_operand.vmem [shape: f32[98,144], index: 3, kind: input, shape index: {}]   ;;  %s1572_s4 = inlined_call_operand.vmem [shape: bf16[144,32], index: 4, kind: input, shape index: {}]   ;;  %s1573_s5 = inlined_call_operand.vmem [shape: f32[1,32], index: 5, kind: input, shape index: {}]   ;;  %s1574_s6 = inlined_call_operand.vmem [shape: bf16[98,32], index: 6, kind: output, shape index: {}]  }
   0x1   :  { %s1330_s23 = smov 0  }
   0x2 LB: > { %s1339_s24 = sadd.s32 4294967295, %s1256_s23   ;;  %s1341_s25 = sadd.s32 1, %s1256_s23   ;;  %s1256_s23 = sphi %s1330_s23, %s1581_s23   ;;  %s1252_s22 = sphi %s1328_s22, %s1580_s22   ;;  %s1248_s21 = sphi %s1326_s21, %s1579_s21  }
   0x3   : > { %s156_s26 = ssub.s32 %s1256_s23, %s1341_s25  ;;  %s159_s27 = sadd.s32 1, %s1252_s22 }
   0x4   : > { %p157_p0 = scmp.eq.s32.totalorder %s156_s26, 0  ;;  %p169_p1 = scmp.ne.s32.totalorder %s1252_s22, %s1248_s21 }
   0x5   : > { %p170_p2 = scmp.eq.s32.totalorder %s1339_s24, 1  ;;  %p1003_p3 = scmp.ge.s32.totalorder %s1256_s23, 1 }
   0x6   : > { %s1349_s28 = scalar_select %p157_p0, %s1252_s22, %s159_s27  }
   0x7   : > { %p1351_p4 = por %p170_p2, %p169_p1  ;;  %p243_p5 = scmp.lt.s32.totalorder %s1256_s23, 3 }
   0x9   : > { %p244_p6 = pnand %p1003_p3, %p243_p5 }
   0xa   : > { %s1362_s8 = smul.u32 (!%p244_p6), 7, %s1339_s24 }
   0xb   : > { %247 = sbr.rel (%p244_p6) target bundleno = 527 (0x20f), region = 44 }
   0xc   : > { %p292_p7 = scmp.lt.s32.totalorder (!%p244_p6), %s1362_s8, 12 }
  0x10   : > { %v337_v0 = vld [vmem:[%s1569_s1 + $0x30] sm:$0x11]  ;;  %vm416_vm0 = vcmask 1040384   ;;  %v1290_v2 = vmov 0   ;;  %v1176_v7 = vld [vmem:[%s1569_s1 + $0x24] ss:$8 sps:$4 sm:$0xff]   ;;  %v340_v26 = vlaneseq }
  0x11   : > { %v1018_v1 = vcombine.high %v337_v0, %v337_v0  ;;  %v418_v3 = vsel %vm416_vm0, 65535, %v1290_v2  ;;  %v1017_v4 = vcombine.low %v337_v0, %v337_v0  ;;  %457 = vmatprep.mubr.bf16.mxu0 %v1290_v2  ;;  %1065 = vmatprep.subr.bf16.mxu1 %v1290_v2  ;;  %v1178_v8 = vld [vmem:[%s1569_s1 + $0x20] ss:$8 sps:$4 sm:$0xff]   ;;  %v1189_v9 = vld [vmem:[%s1572_s4 + $0x38] sm:$0xff]   ;;  %s1375_s15 = scalar_select %p292_p7, %s1362_s8, 12  ;;  %v1190_v11 = vld [vmem:[%s1572_s4 + $0x30] sm:$0xff]  }
  0x12   : > { %1074 = vmatpush1.bf16.msra.mxu1 %v1189_v9  ;;  %v1179_v10 = vld [vmem:[%s1569_s1 + $0x14] ss:$8 sps:$4 sm:$0xff]   ;;  %v1181_v12 = vld [vmem:[%s1569_s1 + $0x10] ss:$8 sps:$4 sm:$0xff]   ;;  %v1182_v13 = vld [vmem:[%s1569_s1 + $0x4] ss:$8 sps:$4 sm:$0xff]  }
  0x13   : > { %v423_v5 = vand.u32 %v1018_v1, %v418_v3  ;;  %v420_v6 = vand.u32 %v1017_v4, %v418_v3  ;;  %1066 = vmatprep.subr.bf16.mxu1 %v1290_v2  ;;  %s1004_s18 = sshll.u32 %s1375_s15, 2  ;;  %v1191_v14 = vld [vmem:[%s1572_s4 + $0x28] sm:$0xff]   ;;  %v1192_v16 = vld [vmem:[%s1572_s4 + $0x20] sm:$0xff]   ;;  %vm403_vm1 = vcmask 400384   ;;  %v1193_v18 = vld [vmem:[%s1572_s4 + $0x18] sm:$0xff]   ;;  %v341_v27 = vshrl.u32 %v340_v26, 7 }
  0x14   : > { %s1388_s27 = scalar_lea.vmem %s1568_s0, %s1004_s18  ;;  %v1184_v15 = vld [vmem:[%s1569_s1] ss:$8 sps:$4 sm:$0xff]   ;;  %v1194_v22 = vld [vmem:[%s1572_s4 + $0x10] sm:$0xff]   ;;  %s1056_s13 = sshll.u32 %s1375_s15, 4  ;;  %vm625_vm2 = vcmask 130048   ;;  %vm738_vm3 = vcmask 257024  }
  0x15   : > { %433 = vmatprep.subr.bf16.mxu0 %v423_v5  ;;  %v1185_v17 = vld [vmem:[%s1388_s27] sm:$0xff]   ;;  %v1186_v19 = vld [vmem:[%s1388_s27 + $0x8] sm:$0xff]   ;;  %v1187_v20 = vld [vmem:[%s1388_s27 + $0x10] sm:$0xff]   ;;  %v346_v28 = vsub.s32 1, %v341_v27  ;;  %v342_v29 = vsub.s32 0, %v341_v27  ;;  %s1461_s17 = scalar_lea.vmem %s1571_s3, %s1056_s13  ;;  %s284_s15 = sand.u32 1, %s1248_s21  }
  0x16   : > { %434 = vmatpush1.bf16.msra.mxu0 %v420_v6  ;;  %1075 = vmatpush1.bf16.msra.mxu1 %v1190_v11  ;;  %v1188_v21 = vld [vmem:[%s1388_s27 + $0x18] ss:$0 sps:$4 sm:$0xff]   ;;  %v1195_v23 = vld [vmem:[%s1572_s4 + $0x8] sm:$0xff]   ;;  %v1196_v24 = vld [vmem:[%s1572_s4] sm:$0xff]   ;;  %s1083_s20 = smul.u32 28, %s284_s15  ;;  %s754_s21 = ssub.s32 (%p1351_p4), 13, %s1362_s8 }
  0x17   : > { %435 = vmatprep.subr.bf16.mxu0 %v1176_v7  ;;  %1067 = vmatprep.subr.bf16.mxu1 %v1290_v2  ;;  %v1197_v25 = vld [vmem:[%s1572_s4 + $0x40] sm:$0xff]   ;;  %v512_v42 = vld [vmem:[%s1461_s17 + $0x10] sm:$0xff]  ;;  %v511_v45 = vld [vmem:[%s1461_s17 + $0x8] sm:$0xff]  ;;  %s1064_s26 = smul.u32 (%p1351_p4), 28, %s1339_s24  ;;  %p755_p8 = scmp.lt.s32.totalorder (%p1351_p4), %s754_s21, 7 }
  0x18   : > { %v338_v30 = vld [vmem:[%s1570_s2] sm:$0x3]  ;;  %v513_v46 = vld [vmem:[%s1461_s17 + $0x18] sm:$0xff]  ;;  %v516_v0 = vld [vmem:[%s1461_s17 + $0x30] sm:$0xff]  ;;  %s1496_s23 = scalar_lea.vmem [#allocation2], %s1083_s20  }
  0x19   : > { %v1450_v31 = vrot.slane %v338_v30, %v346_v28  ;;  %v1452_v32 = vrot.slane %v338_v30, %v342_v29  ;;  %v510_v48 = vld [vmem:[%s1461_s17] sm:$0xff]  ;;  %v515_v3 = vld [vmem:[%s1461_s17 + $0x28] sm:$0xff]  ;;  %v517_v4 = vld [vmem:[%s1461_s17 + $0x38] sm:$0xff]  ;;  %s1519_s7 = scalar_lea.vmem (%p1351_p4), %s1574_s6, %s1064_s26  }
  0x1a   : > { %436 = vmatpush1.bf16.msra.mxu0 %v1178_v8  ;;  %1076 = vmatpush1.bf16.msra.mxu1 %v1191_v14  ;;  %v514_v6 = vld [vmem:[%s1461_s17 + $0x20] sm:$0xff]  ;;  %v521_v26 = vld [vmem:[%s1461_s17 + $0x58] sm:$0xff] }
  0x1b   : > { %437 = vmatprep.subr.bf16.mxu0 %v1179_v10  ;;  %1068 = vmatprep.subr.bf16.mxu1 %v1290_v2  ;;  %v518_v28 = vld [vmem:[%s1461_s17 + $0x40] sm:$0xff] }
  0x1e   : > { %438 = vmatpush1.bf16.msra.mxu0 %v1181_v12  ;;  %1077 = vmatpush1.bf16.msra.mxu1 %v1192_v16 }
  0x1f   : > { %439 = vmatprep.subr.bf16.mxu0 %v1182_v13  ;;  %1069 = vmatprep.subr.bf16.mxu1 %v1290_v2 }
  0x22   : > { %440 = vmatpush1.bf16.msra.mxu0 %v1184_v15  ;;  %1078 = vmatpush1.bf16.msra.mxu1 %v1193_v18 }
  0x23   : > { %638 = vmatprep.subr.bf16.mxu0 %v1290_v2  ;;  %1070 = vmatprep.subr.bf16.mxu1 %v1290_v2 }
  0x25   : > { %1019 = vmatmul.mubr.msk.bf16.vlgmr.msra.gmra.mxu0 %vm403_vm1, %v1185_v17 }
  0x26   : > { %467 = vmatprep.mubr.bf16.mxu0 %v1290_v2  ;;  %639 = vmatpush1.bf16.msra.mxu0 %v1189_v9 }
  0x27   : > { %640 = vmatprep.subr.bf16.mxu0 %v1290_v2  ;;  %1079 = vmatpush1.bf16.msra.mxu1 %v1194_v22 }
  0x28   : > { %1071 = vmatprep.subr.bf16.mxu1 %v1290_v2 }
  0x2a   : > { %641 = vmatpush1.bf16.msra.mxu0 %v1190_v11 }
  0x2b   : > { %642 = vmatprep.subr.bf16.mxu0 %v1290_v2  ;;  %1080 = vmatpush1.bf16.msra.mxu1 %v1195_v23 }
  0x2c   : > { %1072 = vmatprep.subr.bf16.mxu1 %v1290_v2 }
  0x2d   : > { %1020 = vmatmul.mubr.msk.bf16.gmra.mxu0 %vm403_vm1, %v1186_v19 }
  0x2e   : > { %477 = vmatprep.mubr.bf16.mxu0 %v1290_v2  ;;  %643 = vmatpush1.bf16.msra.mxu0 %v1191_v14 }
  0x2f   : > { %644 = vmatprep.subr.bf16.mxu0 %v1290_v2  ;;  %1081 = vmatpush1.bf16.msra.mxu1 %v1196_v24 }
  0x30   : > { %1073 = vmatprep.subr.bf16.mxu1 %v1290_v2 }
  0x32   : > { %645 = vmatpush1.bf16.msra.mxu0 %v1192_v16 }
  0x33   : > { %646 = vmatprep.subr.bf16.mxu0 %v1290_v2  ;;  %1082 = vmatpush2.bf16.msra.mxu1 %v1197_v25 }
  0x35   : > { %1021 = vmatmul.mubr.msk.bf16.gmra.mxu0 %vm403_vm1, %v1187_v20 }
  0x36   : > { %487 = vmatprep.mubr.bf16.mxu0 %v1290_v2  ;;  %647 = vmatpush1.bf16.msra.mxu0 %v1193_v18 }
  0x37   : > { %648 = vmatprep.subr.bf16.mxu0 %v1290_v2 }
  0x3a   : > { %649 = vmatpush1.bf16.msra.mxu0 %v1194_v22  ;;  %v520_v22 = vld [vmem:[%s1461_s17 + $0x50] sm:$0xff] }
  0x3b   : > { %650 = vmatprep.subr.bf16.mxu0 %v1290_v2 }
  0x3d   : > { %1022 = vmatmul.mubr.msk.bf16.gmra.mxu0 %vm403_vm1, %v1188_v21 }
  0x3e   : > { %651 = vmatpush1.bf16.msra.mxu0 %v1195_v23 }
  0x3f   : > { %652 = vmatprep.subr.bf16.mxu0 %v1290_v2 }
  0x42   : > { %653 = vmatpush1.bf16.msra.mxu0 %v1196_v24 }
  0x43   : > { %668 = vmatprep.subr.bf16.mxu0 %v1290_v2 }
  0x46   : > { %669 = vmatpush2.bf16.msra.mxu0 %v1197_v25  ;;  %v519_v25 = vld [vmem:[%s1461_s17 + $0x48] sm:$0xff] }
  0xe5   : > { %v459_v33 = vpop.f32.mrf.mxu0 }
  0xe6   : > { %v460_v36 = vadd.f32 %v459_v33, %v1452_v32 }
  0xe7   : > { %v461_v34 = vpop.f32.mrf.mxu0 }
  0xe8   : > { %v462_v35 = vadd.f32 %v461_v34, %v1450_v31  ;;  %v496_v44 = vmax.f32 %v460_v36, 0.0 }
  0xe9   : > { %v463_v37 = vpop.f32.mrf.mxu0 }
  0xea   : > { %v464_v38 = vadd.f32 %v463_v37, %v1452_v32  ;;  %v497_v40 = vmax.f32 %v462_v35, 0.0  ;;  %v524_v55 = vmul.f32 %v510_v48, %v496_v44 }
  0xeb   : > { %v465_v39 = vpop.f32.mrf.mxu0 }
  0xec   : > { %v498_v41 = vmax.f32 %v464_v38, 0.0  ;;  %v466_v43 = vadd.f32 %v465_v39, %v1450_v31  ;;  %v525_v52 = vmul.f32 %v511_v45, %v497_v40  ;;  %v523_v39 = vld [vmem:[%s1461_s17 + $0x68] sm:$0xff] }
  0xed   : > { %v469_v47 = vpop.f32.mrf.mxu0 }
  0xee   : > { %v499_v49 = vmax.f32 %v466_v43, 0.0  ;;  %v526_v50 = vmul.f32 %v512_v42, %v498_v41  ;;  %v470_v56 = vadd.f32 %v469_v47, %v1452_v32 }
  0xef   : > { %v471_v51 = vpop.f32.mrf.mxu0 }
  0xf0   : > { %v527_v53 = vmul.f32 %v513_v46, %v499_v49  ;;  %v472_v54 = vadd.f32 %v471_v51, %v1450_v31  ;;  %v538_v60 = vpack.c.bf16 %v526_v50, %v524_v55  ;;  %v500_v2 = vmax.f32 %v470_v56, 0.0  ;;  %v522_v46 = vld [vmem:[%s1461_s17 + $0x60] sm:$0xff] }
  0xf1   : > { %v473_v57 = vpop.f32.mrf.mxu0 }
  0xf2   : > { %v539_v58 = vpack.c.bf16 %v527_v53, %v525_v52  ;;  %v474_v59 = vadd.f32 %v473_v57, %v1452_v32  ;;  %v501_v62 = vmax.f32 %v472_v54, 0.0  ;;  %v528_v13 = vmul.f32 %v514_v6, %v500_v2 }
  0xf3   : > { %v475_v61 = vpop.f32.mrf.mxu0 }
  0xf4   : > { %v502_v63 = vmax.f32 %v474_v59, 0.0  ;;  %v476_v1 = vadd.f32 %v475_v61, %v1450_v31  ;;  %1033 = vmatprep.mubr.msk.bf16.mxu0 %vm625_vm2, %v539_v58  ;;  %v529_v10 = vmul.f32 %v515_v3, %v501_v62 }
  0xf5   : > { %v479_v5 = vpop.f32.mrf.mxu0  ;;  %671 = vmatmul.mubr.bf16.vlgmr.msra.gmra.mxu0 %v538_v60 }
  0xf6   : > { %v503_v7 = vmax.f32 %v476_v1, 0.0  ;;  %v530_v8 = vmul.f32 %v516_v0, %v502_v63  ;;  %v480_v14 = vadd.f32 %v479_v5, %v1452_v32 }
  0xf7   : > { %v481_v9 = vpop.f32.mrf.mxu0 }
  0xf8   : > { %v531_v11 = vmul.f32 %v517_v4, %v503_v7  ;;  %v482_v12 = vadd.f32 %v481_v9, %v1450_v31  ;;  %v540_v19 = vpack.c.bf16 %v530_v8, %v528_v13  ;;  %v504_v24 = vmax.f32 %v480_v14, 0.0 }
  0xf9   : > { %v483_v15 = vpop.f32.mrf.mxu0 }
  0xfa   : > { %v484_v16 = vadd.f32 %v483_v15, %v1452_v32  ;;  %v541_v17 = vpack.c.bf16 %v531_v11, %v529_v10  ;;  %v505_v20 = vmax.f32 %v482_v12, 0.0  ;;  %v532_v38 = vmul.f32 %v518_v28, %v504_v24 }
  0xfb   : > { %v485_v18 = vpop.f32.mrf.mxu0 }
  0xfc   : > { %v506_v21 = vmax.f32 %v484_v16, 0.0  ;;  %v486_v23 = vadd.f32 %v485_v18, %v1450_v31  ;;  %1034 = vmatprep.mubr.msk.bf16.mxu1 %vm625_vm2, %v541_v17  ;;  %v533_v35 = vmul.f32 %v519_v25, %v505_v20 }
  0xfd   : > { %v489_v27 = vpop.f32.mrf.mxu0  ;;  %679 = vmatmul.mubr.bf16.vlgmr.msra.gmra.mxu1 %v540_v19 }
  0xfe   : > { %v507_v29 = vmax.f32 %v486_v23, 0.0  ;;  %v534_v30 = vmul.f32 %v520_v22, %v506_v21  ;;  %v490_v33 = vadd.f32 %v489_v27, %v1452_v32 }
  0xff   : > { %v491_v34 = vpop.f32.mrf.mxu0 }
 0x100   : > { %v535_v36 = vmul.f32 %v521_v26, %v507_v29  ;;  %v492_v37 = vadd.f32 %v491_v34, %v1450_v31  ;;  %v508_v43 = vmax.f32 %v490_v33, 0.0  ;;  %v542_v45 = vpack.c.bf16 %v534_v30, %v532_v38  ;;  %v1023_v31 = vld [vmem:[%s1573_s5] ss:$0 sm:$0xff] }
 0x101   : > { %v493_v40 = vpop.f32.mrf.mxu0 }
 0x102   : > { %v543_v41 = vpack.c.bf16 %v535_v36, %v533_v35  ;;  %v509_v42 = vmax.f32 %v492_v37, 0.0  ;;  %v536_v48 = vmul.f32 %v522_v46, %v508_v43 }
 0x103   : > { %v494_v44 = vpop.f32.mrf.mxu0 }
 0x104   : > { %v537_v47 = vmul.f32 %v523_v39, %v509_v42  ;;  %1035 = vmatprep.mubr.msk.bf16.mxu1 %vm625_vm2, %v543_v41  ;;  %v544_v49 = vpack.c.bf16 %v536_v48, %v536_v48 }
 0x105   : > { %687 = vmatmul.mubr.bf16.gmra.mxu1 %v542_v45 }
 0x106   : > { %v545_v32 = vpack.c.bf16 %v537_v47, %v537_v47 }
 0x108   : > { %1036 = vmatprep.mubr.msk.bf16.mxu1 %vm625_vm2, %v545_v32 }
 0x10d   : > { %695 = vmatmul.mubr.bf16.gmra.mxu1 %v544_v49 }
 0x1b5   : > { %v672_v50 = vpop.f32.mrf.mxu0 }
 0x1b6   : > { %v673_v51 = vadd.f32 %v1023_v31, %v672_v50 }
 0x1b7   : > { %v674_v52 = vpop.f32.mrf.mxu0 }
 0x1b8   : > { %v702_v53 = vmax.f32 %v673_v51, 0.0 }
 0x1b9   : > { %v675_v54 = vpop.f32.mrf.mxu0 }
 0x1ba   : > { %v1057_v55 = vpack.c.bf16 %v702_v53, %v702_v53  ;;  %v676_v56 = vadd.f32 %v1023_v31, %v675_v54 }
 0x1bb   : > { %v677_v57 = vpop.f32.mrf.mxu0 }
 0x1bc   : > { %739 = vst.msk [vmem:[%s1496_s23] sm:$0xf] %vm738_vm3, %v1057_v55  ;;  %v703_v58 = vmax.f32 %v676_v56, 0.0 }
 0x1bd   : > { %v680_v59 = vpop.f32.mrf.mxu1 }
 0x1be   : > { %v1058_v60 = vpack.c.bf16 %v703_v58, %v703_v58  ;;  %v681_v61 = vadd.f32 %v1023_v31, %v680_v59 }
 0x1bf   : > { %v682_v62 = vpop.f32.mrf.mxu1 }
 0x1c0   : > { %740 = vst.msk [vmem:[%s1496_s23 + $0x4] sm:$0xf] %vm738_vm3, %v1058_v60  ;;  %v704_v63 = vmax.f32 %v681_v61, 0.0 }
 0x1c1   : > { %v683_v0 = vpop.f32.mrf.mxu1 }
 0x1c2   : > { %v1059_v1 = vpack.c.bf16 %v704_v63, %v704_v63  ;;  %v684_v2 = vadd.f32 %v1023_v31, %v683_v0 }
 0x1c3   : > { %v685_v3 = vpop.f32.mrf.mxu1 }
 0x1c4   : > { %741 = vst.msk [vmem:[%s1496_s23 + $0x8] sm:$0xf] %vm738_vm3, %v1059_v1  ;;  %v705_v4 = vmax.f32 %v684_v2, 0.0 }
 0x1c5   : > { %v688_v5 = vpop.f32.mrf.mxu1 }
 0x1c6   : > { %v1060_v6 = vpack.c.bf16 %v705_v4, %v705_v4  ;;  %v689_v7 = vadd.f32 %v1023_v31, %v688_v5 }
 0x1c7   : > { %v690_v8 = vpop.f32.mrf.mxu1 }
 0x1c8   : > { %742 = vst.msk [vmem:[%s1496_s23 + $0xc] sm:$0xf] %vm738_vm3, %v1060_v6  ;;  %v706_v9 = vmax.f32 %v689_v7, 0.0 }
 0x1c9   : > { %v691_v10 = vpop.f32.mrf.mxu1 }
 0x1ca   : > { %v1061_v11 = vpack.c.bf16 %v706_v9, %v706_v9  ;;  %v692_v12 = vadd.f32 %v1023_v31, %v691_v10 }
 0x1cb   : > { %v693_v13 = vpop.f32.mrf.mxu1 }
 0x1cc   : > { %743 = vst.msk [vmem:[%s1496_s23 + $0x10] sm:$0xf] %vm738_vm3, %v1061_v11  ;;  %v707_v14 = vmax.f32 %v692_v12, 0.0 }
 0x1cd   : > { %v696_v15 = vpop.f32.mrf.mxu1 }
 0x1ce   : > { %v1062_v16 = vpack.c.bf16 %v707_v14, %v707_v14  ;;  %v697_v17 = vadd.f32 %v1023_v31, %v696_v15 }
 0x1cf   : > { %v698_v18 = vpop.f32.mrf.mxu1 }
 0x1d0   : > { %744 = vst.msk [vmem:[%s1496_s23 + $0x14] sm:$0xf] %vm738_vm3, %v1062_v16  ;;  %v708_v19 = vmax.f32 %v697_v17, 0.0  ;;  %752 = sbr.rel (!%p1351_p4) target bundleno = 527 (0x20f), region = 48 }
 0x1d1   : > { %v699_v20 = vpop.f32.mrf.mxu1 }
 0x1d2   : > { %v1063_v21 = vpack.c.bf16 %v708_v19, %v708_v19 }
 0x1d3   : > { %v700_v22 = vpop.f32.mrf.mxu1 }
 0x1d4   : > { %745 = vst.msk [vmem:[%s1496_s23 + $0x18] sm:$0xf] %vm738_vm3, %v1063_v21 }
 0x1d5   : > { %s1583_s21 = smov (!%p755_p8, %s754_s21), 7 }
 0x1d6   : > { %s1044_s9 = sshll.u32 %s1583_s21, 6 }
 0x1d7   : > { %p1047_p9 = scmp.eq.s32.totalorder %s1044_s9, 0 }
 0x1d8   : > { %1198 = sdivrem.u32 (!%p1047_p9), %s1583_s21, 7 }
 0x1d9   : > { %763 = sbr.rel (%p1047_p9) target bundleno = 527 (0x20f), region = 52 }
 0x1e1   : > { %s1525_s29 = spop.drf %1198 }
 0x1e2   : > { %p1048_p10 = scmp.le.s32.totalorder %s1525_s29, 0 }
 0x1e3   : > { %s1576_s24 = smov (!%p1048_p10), %s1519_s7  ;;  %s1577_s8 = smov (!%p1048_p10), %s1496_s23 }
 0x1e4   : > { %950 = sbr.rel (%p1048_p10) target bundleno = 502 (0x1f6), region = 127  ;;  %s1534_s10 = smov (!%p1048_p10), 0  }
 0x1e5   : > { %s1536_s11 = smov (!%p1048_p10), 0  }
 0x1e9 LB: >> { %v781_v23 = vld [vmem:[%s1264_s8] sm:$0xf]  ;;  %v783_v24 = vld [vmem:[%s1264_s8 + $0x4] sm:$0xf]  ;;  %v785_v25 = vld [vmem:[%s1264_s8 + $0x8] sm:$0xf]  ;;  %s1272_s11 = sphi %s1536_s11, %s775_s11   ;;  %s1268_s10 = sphi %s1534_s10, %s1578_s10   ;;  %s1264_s8 = sphi %s1577_s8, %s800_s8   ;;  %s1260_s24 = sphi %s1576_s24, %s801_s24  }
 0x1ea   : >> { %782 = vst [vmem:[%s1260_s24] sm:$0xf] %v781_v23  ;;  %784 = vst [vmem:[%s1260_s24 + $0x4] sm:$0xf] %v783_v24  ;;  %v787_v26 = vld [vmem:[%s1264_s8 + $0xc] sm:$0xf]  ;;  %s795_s12 = sadd.s32 1, %s1268_s10 }
 0x1eb   : >> { %786 = vst [vmem:[%s1260_s24 + $0x8] sm:$0xf] %v785_v25  ;;  %v789_v27 = vld [vmem:[%s1264_s8 + $0x10] sm:$0xf]  ;;  %v791_v28 = vld [vmem:[%s1264_s8 + $0x14] sm:$0xf]  ;;  %p796_p11 = scmp.ge.s32.totalorder %s795_s12, %s1525_s29 }
 0x1ec   : >> { %788 = vst [vmem:[%s1260_s24 + $0xc] sm:$0xf] %v787_v26  ;;  %790 = vst [vmem:[%s1260_s24 + $0x10] sm:$0xf] %v789_v27  ;;  %v793_v29 = vld [vmem:[%s1264_s8 + $0x18] sm:$0xf] }
 0x1ed   : >> { %792 = vst [vmem:[%s1260_s24 + $0x14] sm:$0xf] %v791_v28  ;;  %794 = vst [vmem:[%s1260_s24 + $0x18] sm:$0xf] %v793_v29  ;;  %s1585_s12 = smov (%p796_p11, %s795_s12), 0  ;;  %s775_s11 = sadd.s32 1, %s1272_s11  }
 0x1ee   : >> { %s798_s13 = smul.u32 28, %s1585_s12  ;;  %p774_p12 = scmp.ge.s32.totalorder %s775_s11, %s1525_s29 }
 0x1ef   : >> { %s1578_s10 = smov %s1585_s12 }
 0x1f0   : >> { %s800_s8 = scalar_lea.vmem %s1496_s23, %s798_s13 [#allocation2]   ;;  %s801_s24 = scalar_lea.vmem %s1519_s7, %s798_s13  }
 0x1f1   : > { %777 = sbr.rel (!%p774_p12) target bundleno = 489 (0x1e9), region = 133 }
 0x1f6 PF: > { %1200 = sdivrem.u32 %s1583_s21, 7 }
 0x1f7   : > { %s1049_s14 = smul.u32 28, %s1525_s29 }
 0x1f9   : > { %s806_s16 = scalar_lea.vmem %s1496_s23, %s1049_s14 [#allocation2]   ;;  %s808_s17 = scalar_lea.vmem %s1519_s7, %s1049_s14  }
 0x1ff   : > { %s1201_s15 = spop.drf %1200 }
 0x200   : > { %p1051_p13 = scmp.le.s32.totalorder %s1201_s15, 0 }
 0x201   : > { %s1274_s18 = smov (!%p1051_p13), %s808_s17   ;;  %s1278_s19 = smov (!%p1051_p13), %s806_s16  }
 0x202   : > { %964 = sbr.rel (%p1051_p13) target bundleno = 527 (0x20f), region = 138  ;;  %s1282_s20 = smov (!%p1051_p13), 0  }
 0x203   : > { %s1286_s26 = smov (!%p1051_p13), 0  }
 0x207 LB: >> { %v818_v30 = vld [vmem:[%s1280_s19] sm:$0xf]  ;;  %s820_s30 = sadd.s32 1, %s1284_s20  ;;  %s812_s26 = sadd.s32 1, %s1288_s26   ;;  %s1288_s26 = sphi %s1286_s26, %s812_s26   ;;  %s1284_s20 = sphi %s1282_s20, %s1283_s20   ;;  %s1280_s19 = sphi %s1278_s19, %s825_s19   ;;  %s1276_s18 = sphi %s1274_s18, %s826_s18  }
 0x208   : >> { %819 = vst [vmem:[%s1276_s18] sm:$0xf] %v818_v30  ;;  %p821_p0 = scmp.ge.s32.totalorder %s820_s30, %s1201_s15  ;;  %p811_p1 = scmp.ge.s32.totalorder %s812_s26, %s1201_s15 }
 0x20a   : >> { %s1587_s30 = smov (%p821_p0, %s820_s30), 0  ;;  %814 = sbr.rel (!%p811_p1) target bundleno = 519 (0x207), region = 144 }
 0x20b   : >> { %s1052_s23 = sshll.u32 %s1587_s30, 2  ;;  %s1283_s20 = smov %s1587_s30  }
 0x20c   : >> { %s825_s19 = scalar_lea.vmem %s806_s16, %s1052_s23 [#allocation2]   ;;  %s826_s18 = scalar_lea.vmem %s808_s17, %s1052_s23  }
 0x20f PF: > { %p13_p2 = scmp.ge.s32.totalorder %s1341_s25, 4   ;;  %s1579_s21 = smov %s1252_s22 }
 0x210   : > { %s1580_s22 = smov %s1349_s28  ;;  %s1581_s23 = smov %s1341_s25 }
 0x211   :  { %15 = sbr.rel (!%p13_p2) target bundleno = 2 (0x2), region = 155 }

// kernel: autoencoder_forward.5
= control target key start
LH: loop header
LB: loop body
LE: loop exit
PB: predicated region body
PF: predicated region fallthrough
CT: control target
= control target key end

     0   :  { %s4124_s18 = smov 0   ;;  %s4126_s19 = smov 0   ;;  %s5481_s0 = inlined_call_operand.vmem [shape: bf16[2,1568], index: 0, kind: input, shape index: {}]   ;;  %s5482_s1 = inlined_call_operand.vmem [shape: bf16[1568,64], index: 1, kind: input, shape index: {}]   ;;  %s5483_s2 = inlined_call_operand.vmem [shape: f32[1,64], index: 2, kind: input, shape index: {}]   ;;  %s5484_s3 = inlined_call_operand.vmem [shape: bf16[64,1568], index: 3, kind: input, shape index: {}]   ;;  %s5485_s4 = inlined_call_operand.vmem [shape: f32[1,1568], index: 4, kind: input, shape index: {}]   ;;  %s5486_s5 = inlined_call_operand.vmem [shape: bf16[2,1568], index: 5, kind: output, shape index: {}]  }
   0x1   :  { %s4128_s20 = smov 0  }
   0x2 LB: > { %s5487_s21 = sadd.s32 4294967295, %s3956_s20   ;;  %s4141_s22 = sadd.s32 1, %s3956_s20   ;;  %s3956_s20 = sphi %s4128_s20, %s5518_s20   ;;  %s3952_s19 = sphi %s4126_s19, %s5517_s19   ;;  %s3948_s18 = sphi %s4124_s18, %s5516_s18  }
   0x3   : > { %s82_s23 = ssub.s32 %s3956_s20, %s4141_s22  ;;  %s85_s24 = sadd.s32 1, %s3952_s19 }
   0x4   : > { %p83_p0 = scmp.eq.s32.totalorder %s82_s23, 0  ;;  %p92_p1 = scmp.ne.s32.totalorder %s3952_s19, %s3948_s18 }
   0x5   : > { %p93_p2 = scmp.eq.s32.totalorder %s3956_s20, 0  ;;  %p148_p3 = scmp.eq.s32.totalorder %s5487_s21, 1 }
   0x6   : > { %s4152_s25 = scalar_select %p83_p0, %s3952_s19, %s85_s24  }
   0x7   : > { %p94_p4 = por %p93_p2, %p92_p1  ;;  %p4154_p5 = por %p148_p3, %p92_p1 }
   0x8   : > { %p3015_p6 = scmp.ge.s32.totalorder %s3956_s20, 2 }
   0xa   : > { %179 = sbr.rel (%p3015_p6) target bundleno = 179 (0xb3), region = 28 }
   0xf   : > { %182 = sbr.rel (!%p94_p4) target bundleno = 179 (0xb3), region = 32  ;;  %s184_s27 = sand.u32 (%p94_p4), 1, %s3952_s19  }
  0x10   : > { %s187_s28 = smul.u32 (%p94_p4), 7, %s3956_s20 }
  0x11   : > { %s3375_s29 = smul.u32 (%p94_p4), 224, %s184_s27 }
  0x12   : > { %s188_s30 = ssub.s32 (%p94_p4), 13, %s187_s28  ;;  %s3206_s6 = smul.u32 (%p94_p4), 28, %s3956_s20 }
  0x13   : > { %p189_p7 = scmp.lt.s32.totalorder (%p94_p4), %s188_s30, 7  ;;  %s4169_s12 = scalar_lea.vmem (%p94_p4), [#allocation2], %s3375_s29  }
  0x14   : > { %s4165_s9 = scalar_lea.vmem %s5484_s3, %s3206_s6  }
  0x15   : > { %s5520_s30 = smov (!%p189_p7, %s188_s30), 7 }
  0x16   : > { %s3016_s10 = sshll.u32 %s5520_s30, 9  ;;  %s4167_s11 = sshll.u32 %s5520_s30, 2 }
  0x17   : > { %p3020_p8 = scmp.eq.s32.totalorder %s3016_s10, 0 }
  0x18   : > { %p199_p9 = scmp.lt.u32.totalorder (!%p3020_p8), %s4167_s11, 8 }
  0x19   : > { %198 = sbr.rel (%p3020_p8) target bundleno = 179 (0xb3), region = 36 }
  0x1e   : > { %202 = sbr.rel (%p199_p9) target bundleno = 164 (0xa4), region = 40  ;;  %s4173_s13 = sand.u32 (!%p199_p9), 7, %s4167_s11  }
  0x1f   : > { %p233_p10 = scmp.eq.s32.totalorder (!%p199_p9), %s4173_s13, 0  ;;  %p3021_p11 = scmp.ne.s32.totalorder (!%p199_p9), %s4173_s13, 0 }
  0x23   : > { %236 = sbr.rel (%p3021_p11) target bundleno = 94 (0x5e), region = 55  ;;  %s237_s14 = sshrl.u32 (!%p3021_p11), %s4167_s11, 3 }
  0x24   : > { %s4180_s15 = sshrl.u32 (!%p3021_p11), %s237_s14, 3 }
  0x25   : > { %p3022_p12 = scmp.le.s32.totalorder (!%p3021_p11), %s4180_s15, 0 }
  0x28   : > { %2879 = sbr.rel (%p3022_p12) target bundleno = 78 (0x4e), region = 240  ;;  %s5489_s16 = smov (!%p3022_p12), %s4169_s12 }
  0x29   : > { %s5490_s17 = smov (!%p3022_p12), %s4165_s9  ;;  %s4189_s23 = smov (!%p3022_p12), 0  }
  0x2a   : > { %s4191_s24 = smov (!%p3022_p12), 0  }
  0x2d LB: >> { %v262_v0 = vld [vmem:[%s3964_s17 + $0x30] sm:$0xff]  ;;  %v264_v1 = vld [vmem:[%s3964_s17 + $0x38] sm:$0xff]  ;;  %v278_v2 = vld [vmem:[%s3964_s17 + $0x64] sm:$0xff]  ;;  %s378_s27 = sadd.s32 1, %s3968_s23  ;;  %s244_s24 = sadd.s32 1, %s3972_s24   ;;  %s3972_s24 = sphi %s4191_s24, %s244_s24   ;;  %s3968_s23 = sphi %s4189_s23, %s5493_s23   ;;  %s3964_s17 = sphi %s5490_s17, %s5492_s17   ;;  %s3960_s16 = sphi %s5489_s16, %s5491_s16  }
  0x2e   : >> { %263 = vst [vmem:[%s3960_s16 + $0x30] sm:$0xff] %v262_v0  ;;  %265 = vst [vmem:[%s3960_s16 + $0x38] sm:$0xff] %v264_v1  ;;  %v280_v3 = vld [vmem:[%s3964_s17 + $0x6c] sm:$0xff]  ;;  %v294_v4 = vld [vmem:[%s3964_s17 + $0x98] sm:$0xff]  ;;  %p379_p13 = scmp.ge.s32.totalorder %s378_s27, %s4180_s15  ;;  %p243_p0 = scmp.ge.s32.totalorder %s244_s24, %s4180_s15 }
  0x2f   : >> { %279 = vst [vmem:[%s3960_s16 + $0x4c] sm:$0xff] %v278_v2  ;;  %v296_v5 = vld [vmem:[%s3964_s17 + $0xa0] sm:$0xff]  ;;  %281 = vst [vmem:[%s3960_s16 + $0x54] sm:$0xff] %v280_v3  ;;  %v310_v6 = vld [vmem:[%s3964_s17 + $0xcc] sm:$0xff] }
  0x30   : >> { %295 = vst [vmem:[%s3960_s16 + $0x68] sm:$0xff] %v294_v4  ;;  %297 = vst [vmem:[%s3960_s16 + $0x70] sm:$0xff] %v296_v5  ;;  %v312_v7 = vld [vmem:[%s3964_s17 + $0xd4] sm:$0xff]  ;;  %v326_v8 = vld [vmem:[%s3964_s17 + $0x100] sm:$0xff]  ;;  %s5522_s27 = smov (%p379_p13, %s378_s27), 0 }
  0x31   : >> { %311 = vst [vmem:[%s3960_s16 + $0x84] sm:$0xff] %v310_v6  ;;  %313 = vst [vmem:[%s3960_s16 + $0x8c] sm:$0xff] %v312_v7  ;;  %v328_v9 = vld [vmem:[%s3964_s17 + $0x108] sm:$0xff]  ;;  %v342_v10 = vld [vmem:[%s3964_s17 + $0x134] sm:$0xff]  ;;  %s3023_s28 = sshll.u32 %s5522_s27, 6  ;;  %s5493_s23 = smov %s5522_s27 }
  0x32   : >> { %327 = vst [vmem:[%s3960_s16 + $0xa0] sm:$0xff] %v326_v8  ;;  %v344_v11 = vld [vmem:[%s3964_s17 + $0x13c] sm:$0xff]  ;;  %329 = vst [vmem:[%s3960_s16 + $0xa8] sm:$0xff] %v328_v9  ;;  %v260_v14 = vld [vmem:[%s3964_s17 + $0x28] sm:$0xff]  ;;  %s4262_s29 = scalar_lea.vmem %s4165_s9, %s3023_s28   ;;  %s4265_s30 = scalar_lea.vmem %s4169_s12, %s3023_s28 [#allocation2]  }
  0x33   : >> { %343 = vst [vmem:[%s3960_s16 + $0xbc] sm:$0xff] %v342_v10  ;;  %345 = vst [vmem:[%s3960_s16 + $0xc4] sm:$0xff] %v344_v11  ;;  %v256_v12 = vld [vmem:[%s3964_s17 + $0x18] sm:$0xff]  ;;  %v258_v13 = vld [vmem:[%s3964_s17 + $0x20] sm:$0xff] }
  0x34   : >> { %257 = vst [vmem:[%s3960_s16 + $0x18] sm:$0xff] %v256_v12  ;;  %259 = vst [vmem:[%s3960_s16 + $0x20] sm:$0xff] %v258_v13  ;;  %v272_v15 = vld [vmem:[%s3964_s17 + $0x4c] sm:$0xff]  ;;  %v274_v16 = vld [vmem:[%s3964_s17 + $0x54] sm:$0xff] }
  0x35   : >> { %261 = vst [vmem:[%s3960_s16 + $0x28] sm:$0xff] %v260_v14  ;;  %v276_v17 = vld [vmem:[%s3964_s17 + $0x5c] sm:$0xff]  ;;  %273 = vst [vmem:[%s3960_s16 + $0x34] sm:$0xff] %v272_v15  ;;  %v290_v19 = vld [vmem:[%s3964_s17 + $0x88] sm:$0xff] }
  0x36   : >> { %275 = vst [vmem:[%s3960_s16 + $0x3c] sm:$0xff] %v274_v16  ;;  %277 = vst [vmem:[%s3960_s16 + $0x44] sm:$0xff] %v276_v17  ;;  %v288_v18 = vld [vmem:[%s3964_s17 + $0x80] sm:$0xff]  ;;  %v292_v20 = vld [vmem:[%s3964_s17 + $0x90] sm:$0xff] }
  0x37   : >> { %289 = vst [vmem:[%s3960_s16 + $0x50] sm:$0xff] %v288_v18  ;;  %291 = vst [vmem:[%s3960_s16 + $0x58] sm:$0xff] %v290_v19  ;;  %v304_v21 = vld [vmem:[%s3964_s17 + $0xb4] sm:$0xff]  ;;  %v306_v22 = vld [vmem:[%s3964_s17 + $0xbc] sm:$0xff] }
  0x38   : >> { %293 = vst [vmem:[%s3960_s16 + $0x60] sm:$0xff] %v292_v20  ;;  %v308_v23 = vld [vmem:[%s3964_s17 + $0xc4] sm:$0xff]  ;;  %305 = vst [vmem:[%s3960_s16 + $0x6c] sm:$0xff] %v304_v21  ;;  %v322_v25 = vld [vmem:[%s3964_s17 + $0xf0] sm:$0xff] }
  0x39   : >> { %307 = vst [vmem:[%s3960_s16 + $0x74] sm:$0xff] %v306_v22  ;;  %309 = vst [vmem:[%s3960_s16 + $0x7c] sm:$0xff] %v308_v23  ;;  %v320_v24 = vld [vmem:[%s3964_s17 + $0xe8] sm:$0xff]  ;;  %v324_v26 = vld [vmem:[%s3964_s17 + $0xf8] sm:$0xff] }
  0x3a   : >> { %321 = vst [vmem:[%s3960_s16 + $0x88] sm:$0xff] %v320_v24  ;;  %323 = vst [vmem:[%s3960_s16 + $0x90] sm:$0xff] %v322_v25  ;;  %v336_v27 = vld [vmem:[%s3964_s17 + $0x11c] sm:$0xff]  ;;  %v338_v28 = vld [vmem:[%s3964_s17 + $0x124] sm:$0xff] }
  0x3b   : >> { %325 = vst [vmem:[%s3960_s16 + $0x98] sm:$0xff] %v324_v26  ;;  %v340_v29 = vld [vmem:[%s3964_s17 + $0x12c] sm:$0xff]  ;;  %337 = vst [vmem:[%s3960_s16 + $0xa4] sm:$0xff] %v336_v27  ;;  %v354_v31 = vld [vmem:[%s3964_s17 + $0x158] sm:$0xff] }
  0x3c   : >> { %339 = vst [vmem:[%s3960_s16 + $0xac] sm:$0xff] %v338_v28  ;;  %341 = vst [vmem:[%s3960_s16 + $0xb4] sm:$0xff] %v340_v29  ;;  %v352_v30 = vld [vmem:[%s3964_s17 + $0x150] sm:$0xff]  ;;  %v356_v32 = vld [vmem:[%s3964_s17 + $0x160] sm:$0xff] }
  0x3d   : >> { %353 = vst [vmem:[%s3960_s16 + $0xc0] sm:$0xff] %v352_v30  ;;  %355 = vst [vmem:[%s3960_s16 + $0xc8] sm:$0xff] %v354_v31  ;;  %v358_v33 = vld [vmem:[%s3964_s17 + $0x168] sm:$0xff]  ;;  %v360_v34 = vld [vmem:[%s3964_s17 + $0x170] sm:$0xff] }
  0x3e   : >> { %357 = vst [vmem:[%s3960_s16 + $0xd0] sm:$0xff] %v356_v32  ;;  %v250_v35 = vld [vmem:[%s3964_s17] sm:$0xff]  ;;  %359 = vst [vmem:[%s3960_s16 + $0xd8] sm:$0xff] %v358_v33  ;;  %v252_v36 = vld [vmem:[%s3964_s17 + $0x8] sm:$0xff] }
  0x3f   : >> { %361 = vst [vmem:[%s3960_s16 + $0xe0] sm:$0xff] %v360_v34  ;;  %251 = vst [vmem:[%s3960_s16] sm:$0xff] %v250_v35  ;;  %v254_v37 = vld [vmem:[%s3964_s17 + $0x10] sm:$0xff]  ;;  %v268_v39 = vld [vmem:[%s3964_s17 + $0x3c] sm:$0xff] }
  0x40   : >> { %v266_v38 = vld [vmem:[%s3964_s17 + $0x34] sm:$0xff]  ;;  %253 = vst [vmem:[%s3960_s16 + $0x8] sm:$0xff] %v252_v36  ;;  %255 = vst [vmem:[%s3960_s16 + $0x10] sm:$0xff] %v254_v37  ;;  %v270_v40 = vld [vmem:[%s3964_s17 + $0x44] sm:$0xff] }
  0x41   : >> { %267 = vst [vmem:[%s3960_s16 + $0x1c] sm:$0xff] %v266_v38  ;;  %v282_v41 = vld [vmem:[%s3964_s17 + $0x68] sm:$0xff]  ;;  %269 = vst [vmem:[%s3960_s16 + $0x24] sm:$0xff] %v268_v39  ;;  %v284_v42 = vld [vmem:[%s3964_s17 + $0x70] sm:$0xff] }
  0x42   : >> { %271 = vst [vmem:[%s3960_s16 + $0x2c] sm:$0xff] %v270_v40  ;;  %283 = vst [vmem:[%s3960_s16 + $0x38] sm:$0xff] %v282_v41  ;;  %v286_v43 = vld [vmem:[%s3964_s17 + $0x78] sm:$0xff]  ;;  %v300_v45 = vld [vmem:[%s3964_s17 + $0xa4] sm:$0xff] }
  0x43   : >> { %v298_v44 = vld [vmem:[%s3964_s17 + $0x9c] sm:$0xff]  ;;  %285 = vst [vmem:[%s3960_s16 + $0x40] sm:$0xff] %v284_v42  ;;  %287 = vst [vmem:[%s3960_s16 + $0x48] sm:$0xff] %v286_v43  ;;  %v302_v46 = vld [vmem:[%s3964_s17 + $0xac] sm:$0xff] }
  0x44   : >> { %299 = vst [vmem:[%s3960_s16 + $0x54] sm:$0xff] %v298_v44  ;;  %v314_v47 = vld [vmem:[%s3964_s17 + $0xd0] sm:$0xff]  ;;  %301 = vst [vmem:[%s3960_s16 + $0x5c] sm:$0xff] %v300_v45  ;;  %v316_v48 = vld [vmem:[%s3964_s17 + $0xd8] sm:$0xff] }
  0x45   : >> { %303 = vst [vmem:[%s3960_s16 + $0x64] sm:$0xff] %v302_v46  ;;  %315 = vst [vmem:[%s3960_s16 + $0x70] sm:$0xff] %v314_v47  ;;  %v318_v49 = vld [vmem:[%s3964_s17 + $0xe0] sm:$0xff]  ;;  %v332_v51 = vld [vmem:[%s3964_s17 + $0x10c] sm:$0xff] }
  0x46   : >> { %v330_v50 = vld [vmem:[%s3964_s17 + $0x104] sm:$0xff]  ;;  %317 = vst [vmem:[%s3960_s16 + $0x78] sm:$0xff] %v316_v48  ;;  %319 = vst [vmem:[%s3960_s16 + $0x80] sm:$0xff] %v318_v49  ;;  %v334_v52 = vld [vmem:[%s3964_s17 + $0x114] sm:$0xff] }
  0x47   : >> { %331 = vst [vmem:[%s3960_s16 + $0x8c] sm:$0xff] %v330_v50  ;;  %v346_v53 = vld [vmem:[%s3964_s17 + $0x138] sm:$0xff]  ;;  %333 = vst [vmem:[%s3960_s16 + $0x94] sm:$0xff] %v332_v51  ;;  %v348_v54 = vld [vmem:[%s3964_s17 + $0x140] sm:$0xff] }
  0x48   : >> { %335 = vst [vmem:[%s3960_s16 + $0x9c] sm:$0xff] %v334_v52  ;;  %347 = vst [vmem:[%s3960_s16 + $0xa8] sm:$0xff] %v346_v53  ;;  %v350_v55 = vld [vmem:[%s3964_s17 + $0x148] sm:$0xff]  ;;  %v364_v57 = vld [vmem:[%s3964_s17 + $0x174] sm:$0xff] }
  0x49   : >> { %v362_v56 = vld [vmem:[%s3964_s17 + $0x16c] sm:$0xff]  ;;  %349 = vst [vmem:[%s3960_s16 + $0xb0] sm:$0xff] %v348_v54  ;;  %351 = vst [vmem:[%s3960_s16 + $0xb8] sm:$0xff] %v350_v55  ;;  %v366_v58 = vld [vmem:[%s3964_s17 + $0x17c] sm:$0xff]  ;;  %246 = sbr.rel (!%p243_p0) target bundleno = 45 (0x2d), region = 246 }
  0x4a   : >> { %363 = vst [vmem:[%s3960_s16 + $0xc4] sm:$0xff] %v362_v56  ;;  %v368_v59 = vld [vmem:[%s3964_s17 + $0x184] sm:$0xff]  ;;  %365 = vst [vmem:[%s3960_s16 + $0xcc] sm:$0xff] %v364_v57  ;;  %v370_v60 = vld [vmem:[%s3964_s17 + $0x18c] sm:$0xff] }
  0x4b   : >> { %367 = vst [vmem:[%s3960_s16 + $0xd4] sm:$0xff] %v366_v58  ;;  %369 = vst [vmem:[%s3960_s16 + $0xdc] sm:$0xff] %v368_v59  ;;  %v372_v61 = vld [vmem:[%s3964_s17 + $0x194] sm:$0xff]  ;;  %v374_v62 = vld [vmem:[%s3964_s17 + $0x19c] sm:$0xff] }
  0x4c   : >> { %371 = vst [vmem:[%s3960_s16 + $0xe4] sm:$0xff] %v370_v60  ;;  %373 = vst [vmem:[%s3960_s16 + $0xec] sm:$0xff] %v372_v61  ;;  %v376_v63 = vld [vmem:[%s3964_s17 + $0x1a4] sm:$0xff]  ;;  %s5492_s17 = smov %s4262_s29 }
  0x4d   : >> { %375 = vst [vmem:[%s3960_s16 + $0xf4] sm:$0xff] %v374_v62  ;;  %377 = vst [vmem:[%s3960_s16 + $0xfc] sm:$0xff] %v376_v63  ;;  %s5491_s16 = smov %s4265_s30 }
  0x4e PF: > { %s4359_s6 = sand.u32 7, %s237_s14   ;;  %s3207_s7 = sshll.u32 %s4180_s15, 10 }
  0x4f   : > { %s389_s8 = sshra.s32 %s3207_s7, 4  ;;  %p3028_p1 = scmp.le.s32.totalorder %s4359_s6, 0 }
  0x50   : > { %s4363_s10 = scalar_lea.vmem %s4165_s9, %s389_s8   ;;  %s4366_s28 = scalar_lea.vmem %s4169_s12, %s389_s8 [#allocation2]  }
  0x51   : > { %2893 = sbr.rel (%p3028_p1) target bundleno = 94 (0x5e), region = 251  ;;  %s5494_s16 = smov (!%p3028_p1), %s4366_s28 }
  0x52   : > { %s5495_s17 = smov (!%p3028_p1), %s4363_s10  ;;  %s4375_s23 = smov (!%p3028_p1), 0  }
  0x53   : > { %s4377_s24 = smov (!%p3028_p1), 0  }
  0x56 LB: >> { %v405_v0 = vld [vmem:[%s3980_s17] sm:$0xff]  ;;  %v407_v1 = vld [vmem:[%s3980_s17 + $0x34] sm:$0xff]  ;;  %v409_v2 = vld [vmem:[%s3980_s17 + $0x68] sm:$0xff]  ;;  %s421_s14 = sadd.s32 1, %s3984_s23  ;;  %s399_s24 = sadd.s32 1, %s3988_s24   ;;  %s3988_s24 = sphi %s4377_s24, %s399_s24   ;;  %s3984_s23 = sphi %s4375_s23, %s5496_s23   ;;  %s3980_s17 = sphi %s5495_s17, %s426_s17   ;;  %s3976_s16 = sphi %s5494_s16, %s427_s16  }
  0x57   : >> { %406 = vst [vmem:[%s3976_s16] sm:$0xff] %v405_v0  ;;  %408 = vst [vmem:[%s3976_s16 + $0x1c] sm:$0xff] %v407_v1  ;;  %v411_v3 = vld [vmem:[%s3980_s17 + $0x9c] sm:$0xff]  ;;  %v413_v4 = vld [vmem:[%s3980_s17 + $0xd0] sm:$0xff]  ;;  %p422_p2 = scmp.ge.s32.totalorder %s421_s14, %s4359_s6  ;;  %p398_p3 = scmp.ge.s32.totalorder %s399_s24, %s4359_s6 }
  0x58   : >> { %410 = vst [vmem:[%s3976_s16 + $0x38] sm:$0xff] %v409_v2  ;;  %v415_v5 = vld [vmem:[%s3980_s17 + $0x104] sm:$0xff]  ;;  %412 = vst [vmem:[%s3976_s16 + $0x54] sm:$0xff] %v411_v3  ;;  %v417_v6 = vld [vmem:[%s3980_s17 + $0x138] sm:$0xff] }
  0x59   : >> { %414 = vst [vmem:[%s3976_s16 + $0x70] sm:$0xff] %v413_v4  ;;  %416 = vst [vmem:[%s3976_s16 + $0x8c] sm:$0xff] %v415_v5  ;;  %v419_v7 = vld [vmem:[%s3980_s17 + $0x16c] sm:$0xff]  ;;  %s5524_s14 = smov (%p422_p2, %s421_s14), 0  ;;  %401 = sbr.rel (!%p398_p3) target bundleno = 86 (0x56), region = 257 }
  0x5a   : >> { %418 = vst [vmem:[%s3976_s16 + $0xa8] sm:$0xff] %v417_v6  ;;  %420 = vst [vmem:[%s3976_s16 + $0xc4] sm:$0xff] %v419_v7  ;;  %s3029_s15 = sshll.u32 %s5524_s14, 3  ;;  %s5496_s23 = smov %s5524_s14 }
  0x5b   : >> { %s426_s17 = scalar_lea.vmem %s4363_s10, %s3029_s15   ;;  %s427_s16 = scalar_lea.vmem %s4366_s28, %s3029_s15 [#allocation2]  }
  0x5e PF: > { %430 = sbr.rel (%p233_p10) target bundleno = 164 (0xa4), region = 73  ;;  %s432_s27 = ssub.s32 (!%p233_p10), %s4167_s11, %s4173_s13 }
  0x5f   : > { %s436_s29 = sshrl.u32 (!%p233_p10), %s4167_s11, 3  ;;  %s4401_s30 = scalar_lea.vmem (!%p233_p10), %s4165_s9, %s432_s27 }
  0x60   : > { %s4404_s7 = scalar_lea.vmem (!%p233_p10), %s4169_s12, %s432_s27 [#allocation2]  ;;  %s4408_s8 = sshrl.u32 (!%p233_p10), %s436_s29, 3 }
  0x61   : > { %p3031_p4 = scmp.le.s32.totalorder (!%p233_p10), %s4408_s8, 0 }
  0x63   : > { %2907 = sbr.rel (%p3031_p4) target bundleno = 137 (0x89), region = 262  ;;  %s5497_s6 = smov (!%p3031_p4), %s4169_s12 }
  0x64   : > { %s5498_s10 = smov (!%p3031_p4), %s4165_s9  ;;  %s4417_s28 = smov (!%p3031_p4), 0  }
  0x65   : > { %s4419_s16 = smov (!%p3031_p4), 0  }
  0x68 LB: >> { %v461_v8 = vld [vmem:[%s3996_s10 + $0x30] sm:$0xff]  ;;  %v463_v9 = vld [vmem:[%s3996_s10 + $0x38] sm:$0xff]  ;;  %v477_v10 = vld [vmem:[%s3996_s10 + $0x64] sm:$0xff]  ;;  %s577_s17 = sadd.s32 1, %s4000_s28  ;;  %s443_s16 = sadd.s32 1, %s4004_s16   ;;  %s4004_s16 = sphi %s4419_s16, %s443_s16   ;;  %s4000_s28 = sphi %s4417_s28, %s5501_s28   ;;  %s3996_s10 = sphi %s5498_s10, %s5500_s10   ;;  %s3992_s6 = sphi %s5497_s6, %s5499_s6  }
  0x69   : >> { %462 = vst [vmem:[%s3992_s6 + $0x30] sm:$0xff] %v461_v8  ;;  %464 = vst [vmem:[%s3992_s6 + $0x38] sm:$0xff] %v463_v9  ;;  %v479_v11 = vld [vmem:[%s3996_s10 + $0x6c] sm:$0xff]  ;;  %v493_v12 = vld [vmem:[%s3996_s10 + $0x98] sm:$0xff]  ;;  %p578_p6 = scmp.ge.s32.totalorder %s577_s17, %s4408_s8  ;;  %p442_p7 = scmp.ge.s32.totalorder %s443_s16, %s4408_s8 }
  0x6a   : >> { %478 = vst [vmem:[%s3992_s6 + $0x4c] sm:$0xff] %v477_v10  ;;  %v495_v13 = vld [vmem:[%s3996_s10 + $0xa0] sm:$0xff]  ;;  %480 = vst [vmem:[%s3992_s6 + $0x54] sm:$0xff] %v479_v11  ;;  %v509_v14 = vld [vmem:[%s3996_s10 + $0xcc] sm:$0xff] }
  0x6b   : >> { %494 = vst [vmem:[%s3992_s6 + $0x68] sm:$0xff] %v493_v12  ;;  %496 = vst [vmem:[%s3992_s6 + $0x70] sm:$0xff] %v495_v13  ;;  %v511_v15 = vld [vmem:[%s3996_s10 + $0xd4] sm:$0xff]  ;;  %v525_v16 = vld [vmem:[%s3996_s10 + $0x100] sm:$0xff]  ;;  %s5526_s17 = smov (%p578_p6, %s577_s17), 0 }
  0x6c   : >> { %510 = vst [vmem:[%s3992_s6 + $0x84] sm:$0xff] %v509_v14  ;;  %512 = vst [vmem:[%s3992_s6 + $0x8c] sm:$0xff] %v511_v15  ;;  %v527_v17 = vld [vmem:[%s3996_s10 + $0x108] sm:$0xff]  ;;  %v541_v18 = vld [vmem:[%s3996_s10 + $0x134] sm:$0xff]  ;;  %s3032_s23 = sshll.u32 %s5526_s17, 6  ;;  %s5501_s28 = smov %s5526_s17 }
  0x6d   : >> { %526 = vst [vmem:[%s3992_s6 + $0xa0] sm:$0xff] %v525_v16  ;;  %v543_v19 = vld [vmem:[%s3996_s10 + $0x13c] sm:$0xff]  ;;  %528 = vst [vmem:[%s3992_s6 + $0xa8] sm:$0xff] %v527_v17  ;;  %v459_v22 = vld [vmem:[%s3996_s10 + $0x28] sm:$0xff]  ;;  %s4490_s24 = scalar_lea.vmem %s4165_s9, %s3032_s23   ;;  %s4493_s14 = scalar_lea.vmem %s4169_s12, %s3032_s23 [#allocation2]  }
  0x6e   : >> { %542 = vst [vmem:[%s3992_s6 + $0xbc] sm:$0xff] %v541_v18  ;;  %544 = vst [vmem:[%s3992_s6 + $0xc4] sm:$0xff] %v543_v19  ;;  %v455_v20 = vld [vmem:[%s3996_s10 + $0x18] sm:$0xff]  ;;  %v457_v21 = vld [vmem:[%s3996_s10 + $0x20] sm:$0xff] }
  0x6f   : >> { %456 = vst [vmem:[%s3992_s6 + $0x18] sm:$0xff] %v455_v20  ;;  %458 = vst [vmem:[%s3992_s6 + $0x20] sm:$0xff] %v457_v21  ;;  %v471_v23 = vld [vmem:[%s3996_s10 + $0x4c] sm:$0xff]  ;;  %v473_v24 = vld [vmem:[%s3996_s10 + $0x54] sm:$0xff] }
  0x70   : >> { %460 = vst [vmem:[%s3992_s6 + $0x28] sm:$0xff] %v459_v22  ;;  %v475_v25 = vld [vmem:[%s3996_s10 + $0x5c] sm:$0xff]  ;;  %472 = vst [vmem:[%s3992_s6 + $0x34] sm:$0xff] %v471_v23  ;;  %v489_v27 = vld [vmem:[%s3996_s10 + $0x88] sm:$0xff] }
  0x71   : >> { %474 = vst [vmem:[%s3992_s6 + $0x3c] sm:$0xff] %v473_v24  ;;  %476 = vst [vmem:[%s3992_s6 + $0x44] sm:$0xff] %v475_v25  ;;  %v487_v26 = vld [vmem:[%s3996_s10 + $0x80] sm:$0xff]  ;;  %v491_v28 = vld [vmem:[%s3996_s10 + $0x90] sm:$0xff] }
  0x72   : >> { %488 = vst [vmem:[%s3992_s6 + $0x50] sm:$0xff] %v487_v26  ;;  %490 = vst [vmem:[%s3992_s6 + $0x58] sm:$0xff] %v489_v27  ;;  %v503_v29 = vld [vmem:[%s3996_s10 + $0xb4] sm:$0xff]  ;;  %v505_v30 = vld [vmem:[%s3996_s10 + $0xbc] sm:$0xff] }
  0x73   : >> { %492 = vst [vmem:[%s3992_s6 + $0x60] sm:$0xff] %v491_v28  ;;  %v507_v31 = vld [vmem:[%s3996_s10 + $0xc4] sm:$0xff]  ;;  %504 = vst [vmem:[%s3992_s6 + $0x6c] sm:$0xff] %v503_v29  ;;  %v521_v33 = vld [vmem:[%s3996_s10 + $0xf0] sm:$0xff] }
  0x74   : >> { %506 = vst [vmem:[%s3992_s6 + $0x74] sm:$0xff] %v505_v30  ;;  %508 = vst [vmem:[%s3992_s6 + $0x7c] sm:$0xff] %v507_v31  ;;  %v519_v32 = vld [vmem:[%s3996_s10 + $0xe8] sm:$0xff]  ;;  %v523_v34 = vld [vmem:[%s3996_s10 + $0xf8] sm:$0xff] }
  0x75   : >> { %520 = vst [vmem:[%s3992_s6 + $0x88] sm:$0xff] %v519_v32  ;;  %522 = vst [vmem:[%s3992_s6 + $0x90] sm:$0xff] %v521_v33  ;;  %v535_v35 = vld [vmem:[%s3996_s10 + $0x11c] sm:$0xff]  ;;  %v537_v36 = vld [vmem:[%s3996_s10 + $0x124] sm:$0xff] }
  0x76   : >> { %524 = vst [vmem:[%s3992_s6 + $0x98] sm:$0xff] %v523_v34  ;;  %v539_v37 = vld [vmem:[%s3996_s10 + $0x12c] sm:$0xff]  ;;  %536 = vst [vmem:[%s3992_s6 + $0xa4] sm:$0xff] %v535_v35  ;;  %v553_v39 = vld [vmem:[%s3996_s10 + $0x158] sm:$0xff] }
  0x77   : >> { %538 = vst [vmem:[%s3992_s6 + $0xac] sm:$0xff] %v537_v36  ;;  %540 = vst [vmem:[%s3992_s6 + $0xb4] sm:$0xff] %v539_v37  ;;  %v551_v38 = vld [vmem:[%s3996_s10 + $0x150] sm:$0xff]  ;;  %v555_v40 = vld [vmem:[%s3996_s10 + $0x160] sm:$0xff] }
  0x78   : >> { %552 = vst [vmem:[%s3992_s6 + $0xc0] sm:$0xff] %v551_v38  ;;  %554 = vst [vmem:[%s3992_s6 + $0xc8] sm:$0xff] %v553_v39  ;;  %v557_v41 = vld [vmem:[%s3996_s10 + $0x168] sm:$0xff]  ;;  %v559_v42 = vld [vmem:[%s3996_s10 + $0x170] sm:$0xff] }
  0x79   : >> { %556 = vst [vmem:[%s3992_s6 + $0xd0] sm:$0xff] %v555_v40  ;;  %v449_v43 = vld [vmem:[%s3996_s10] sm:$0xff]  ;;  %558 = vst [vmem:[%s3992_s6 + $0xd8] sm:$0xff] %v557_v41  ;;  %v451_v44 = vld [vmem:[%s3996_s10 + $0x8] sm:$0xff] }
  0x7a   : >> { %560 = vst [vmem:[%s3992_s6 + $0xe0] sm:$0xff] %v559_v42  ;;  %450 = vst [vmem:[%s3992_s6] sm:$0xff] %v449_v43  ;;  %v453_v45 = vld [vmem:[%s3996_s10 + $0x10] sm:$0xff]  ;;  %v467_v47 = vld [vmem:[%s3996_s10 + $0x3c] sm:$0xff] }
  0x7b   : >> { %v465_v46 = vld [vmem:[%s3996_s10 + $0x34] sm:$0xff]  ;;  %452 = vst [vmem:[%s3992_s6 + $0x8] sm:$0xff] %v451_v44  ;;  %454 = vst [vmem:[%s3992_s6 + $0x10] sm:$0xff] %v453_v45  ;;  %v469_v48 = vld [vmem:[%s3996_s10 + $0x44] sm:$0xff] }
  0x7c   : >> { %466 = vst [vmem:[%s3992_s6 + $0x1c] sm:$0xff] %v465_v46  ;;  %v481_v49 = vld [vmem:[%s3996_s10 + $0x68] sm:$0xff]  ;;  %468 = vst [vmem:[%s3992_s6 + $0x24] sm:$0xff] %v467_v47  ;;  %v483_v50 = vld [vmem:[%s3996_s10 + $0x70] sm:$0xff] }
  0x7d   : >> { %470 = vst [vmem:[%s3992_s6 + $0x2c] sm:$0xff] %v469_v48  ;;  %482 = vst [vmem:[%s3992_s6 + $0x38] sm:$0xff] %v481_v49  ;;  %v485_v51 = vld [vmem:[%s3996_s10 + $0x78] sm:$0xff]  ;;  %v499_v53 = vld [vmem:[%s3996_s10 + $0xa4] sm:$0xff] }
  0x7e   : >> { %v497_v52 = vld [vmem:[%s3996_s10 + $0x9c] sm:$0xff]  ;;  %484 = vst [vmem:[%s3992_s6 + $0x40] sm:$0xff] %v483_v50  ;;  %486 = vst [vmem:[%s3992_s6 + $0x48] sm:$0xff] %v485_v51  ;;  %v501_v54 = vld [vmem:[%s3996_s10 + $0xac] sm:$0xff] }
  0x7f   : >> { %498 = vst [vmem:[%s3992_s6 + $0x54] sm:$0xff] %v497_v52  ;;  %v513_v55 = vld [vmem:[%s3996_s10 + $0xd0] sm:$0xff]  ;;  %500 = vst [vmem:[%s3992_s6 + $0x5c] sm:$0xff] %v499_v53  ;;  %v515_v56 = vld [vmem:[%s3996_s10 + $0xd8] sm:$0xff] }
  0x80   : >> { %502 = vst [vmem:[%s3992_s6 + $0x64] sm:$0xff] %v501_v54  ;;  %514 = vst [vmem:[%s3992_s6 + $0x70] sm:$0xff] %v513_v55  ;;  %v517_v57 = vld [vmem:[%s3996_s10 + $0xe0] sm:$0xff]  ;;  %v531_v59 = vld [vmem:[%s3996_s10 + $0x10c] sm:$0xff] }
  0x81   : >> { %v529_v58 = vld [vmem:[%s3996_s10 + $0x104] sm:$0xff]  ;;  %516 = vst [vmem:[%s3992_s6 + $0x78] sm:$0xff] %v515_v56  ;;  %518 = vst [vmem:[%s3992_s6 + $0x80] sm:$0xff] %v517_v57  ;;  %v533_v60 = vld [vmem:[%s3996_s10 + $0x114] sm:$0xff] }
  0x82   : >> { %530 = vst [vmem:[%s3992_s6 + $0x8c] sm:$0xff] %v529_v58  ;;  %v545_v61 = vld [vmem:[%s3996_s10 + $0x138] sm:$0xff]  ;;  %532 = vst [vmem:[%s3992_s6 + $0x94] sm:$0xff] %v531_v59  ;;  %v547_v62 = vld [vmem:[%s3996_s10 + $0x140] sm:$0xff] }
  0x83   : >> { %534 = vst [vmem:[%s3992_s6 + $0x9c] sm:$0xff] %v533_v60  ;;  %546 = vst [vmem:[%s3992_s6 + $0xa8] sm:$0xff] %v545_v61  ;;  %v549_v63 = vld [vmem:[%s3996_s10 + $0x148] sm:$0xff]  ;;  %v563_v1 = vld [vmem:[%s3996_s10 + $0x174] sm:$0xff] }
  0x84   : >> { %v561_v0 = vld [vmem:[%s3996_s10 + $0x16c] sm:$0xff]  ;;  %548 = vst [vmem:[%s3992_s6 + $0xb0] sm:$0xff] %v547_v62  ;;  %550 = vst [vmem:[%s3992_s6 + $0xb8] sm:$0xff] %v549_v63  ;;  %v565_v2 = vld [vmem:[%s3996_s10 + $0x17c] sm:$0xff]  ;;  %445 = sbr.rel (!%p442_p7) target bundleno = 104 (0x68), region = 268 }
  0x85   : >> { %562 = vst [vmem:[%s3992_s6 + $0xc4] sm:$0xff] %v561_v0  ;;  %v567_v3 = vld [vmem:[%s3996_s10 + $0x184] sm:$0xff]  ;;  %564 = vst [vmem:[%s3992_s6 + $0xcc] sm:$0xff] %v563_v1  ;;  %v569_v4 = vld [vmem:[%s3996_s10 + $0x18c] sm:$0xff] }
  0x86   : >> { %566 = vst [vmem:[%s3992_s6 + $0xd4] sm:$0xff] %v565_v2  ;;  %568 = vst [vmem:[%s3992_s6 + $0xdc] sm:$0xff] %v567_v3  ;;  %v571_v5 = vld [vmem:[%s3996_s10 + $0x194] sm:$0xff]  ;;  %v573_v6 = vld [vmem:[%s3996_s10 + $0x19c] sm:$0xff] }
  0x87   : >> { %570 = vst [vmem:[%s3992_s6 + $0xe4] sm:$0xff] %v569_v4  ;;  %572 = vst [vmem:[%s3992_s6 + $0xec] sm:$0xff] %v571_v5  ;;  %v575_v7 = vld [vmem:[%s3996_s10 + $0x1a4] sm:$0xff]  ;;  %s5500_s10 = smov %s4490_s24 }
  0x88   : >> { %574 = vst [vmem:[%s3992_s6 + $0xf4] sm:$0xff] %v573_v6  ;;  %576 = vst [vmem:[%s3992_s6 + $0xfc] sm:$0xff] %v575_v7  ;;  %s5499_s6 = smov %s4493_s14 }
  0x89 PF: > { %s4587_s15 = sand.u32 7, %s436_s29   ;;  %s3209_s27 = sshll.u32 %s4408_s8, 10 }
  0x8a   : > { %s588_s23 = sshra.s32 %s3209_s27, 4  ;;  %p3037_p8 = scmp.le.s32.totalorder %s4587_s15, 0 }
  0x8b   : > { %s4591_s21 = scalar_lea.vmem %s4165_s9, %s588_s23   ;;  %s4594_s14 = scalar_lea.vmem %s4169_s12, %s588_s23 [#allocation2]  }
  0x8c   : > { %2921 = sbr.rel (%p3037_p8) target bundleno = 153 (0x99), region = 273  ;;  %s5502_s6 = smov (!%p3037_p8), %s4594_s14 }
  0x8d   : > { %s5503_s10 = smov (!%p3037_p8), %s4591_s21  ;;  %s4603_s28 = smov (!%p3037_p8), 0  }
  0x8e   : > { %s4605_s16 = smov (!%p3037_p8), 0  }
  0x91 LB: >> { %v604_v8 = vld [vmem:[%s4012_s10] sm:$0xff]  ;;  %v606_v9 = vld [vmem:[%s4012_s10 + $0x34] sm:$0xff]  ;;  %v608_v10 = vld [vmem:[%s4012_s10 + $0x68] sm:$0xff]  ;;  %s620_s29 = sadd.s32 1, %s4016_s28  ;;  %s598_s16 = sadd.s32 1, %s4020_s16   ;;  %s4020_s16 = sphi %s4605_s16, %s598_s16   ;;  %s4016_s28 = sphi %s4603_s28, %s5504_s28   ;;  %s4012_s10 = sphi %s5503_s10, %s625_s10   ;;  %s4008_s6 = sphi %s5502_s6, %s626_s6  }
  0x92   : >> { %605 = vst [vmem:[%s4008_s6] sm:$0xff] %v604_v8  ;;  %607 = vst [vmem:[%s4008_s6 + $0x1c] sm:$0xff] %v606_v9  ;;  %v610_v11 = vld [vmem:[%s4012_s10 + $0x9c] sm:$0xff]  ;;  %v612_v12 = vld [vmem:[%s4012_s10 + $0xd0] sm:$0xff]  ;;  %p621_p9 = scmp.ge.s32.totalorder %s620_s29, %s4587_s15  ;;  %p597_p10 = scmp.ge.s32.totalorder %s598_s16, %s4587_s15 }
  0x93   : >> { %609 = vst [vmem:[%s4008_s6 + $0x38] sm:$0xff] %v608_v10  ;;  %v614_v13 = vld [vmem:[%s4012_s10 + $0x104] sm:$0xff]  ;;  %611 = vst [vmem:[%s4008_s6 + $0x54] sm:$0xff] %v610_v11  ;;  %v616_v14 = vld [vmem:[%s4012_s10 + $0x138] sm:$0xff] }
  0x94   : >> { %613 = vst [vmem:[%s4008_s6 + $0x70] sm:$0xff] %v612_v12  ;;  %615 = vst [vmem:[%s4008_s6 + $0x8c] sm:$0xff] %v614_v13  ;;  %v618_v15 = vld [vmem:[%s4012_s10 + $0x16c] sm:$0xff]  ;;  %s5528_s29 = smov (%p621_p9, %s620_s29), 0  ;;  %600 = sbr.rel (!%p597_p10) target bundleno = 145 (0x91), region = 279 }
  0x95   : >> { %617 = vst [vmem:[%s4008_s6 + $0xa8] sm:$0xff] %v616_v14  ;;  %619 = vst [vmem:[%s4008_s6 + $0xc4] sm:$0xff] %v618_v15  ;;  %s3038_s8 = sshll.u32 %s5528_s29, 3  ;;  %s5504_s28 = smov %s5528_s29 }
  0x96   : >> { %s625_s10 = scalar_lea.vmem %s4591_s21, %s3038_s8   ;;  %s626_s6 = scalar_lea.vmem %s4594_s14, %s3038_s8 [#allocation2]  }
  0x99 PF: > { %s4086_s17 = smov 1  }
  0x9a   : > { %s627_s24 = sshll.u32 %s4086_s17, %s4173_s13 }
  0x9b   : > { %s3040_s27 = sadd.s32 4294967295, %s627_s24 }
  0x9c   : > { %v637_v16 = vld [vmem:[%s4401_s30] sm:%s3040_s27]  ;;  %v639_v17 = vld [vmem:[%s4401_s30 + $0x34] sm:%s3040_s27] }
  0x9d   : > { %638 = vst [vmem:[%s4404_s7] sm:%s3040_s27] %v637_v16  ;;  %640 = vst [vmem:[%s4404_s7 + $0x1c] sm:%s3040_s27] %v639_v17 }
  0x9e   : > { %v641_v18 = vld [vmem:[%s4401_s30 + $0x68] sm:%s3040_s27]  ;;  %v643_v19 = vld [vmem:[%s4401_s30 + $0x9c] sm:%s3040_s27] }
  0x9f   : > { %642 = vst [vmem:[%s4404_s7 + $0x38] sm:%s3040_s27] %v641_v18  ;;  %644 = vst [vmem:[%s4404_s7 + $0x54] sm:%s3040_s27] %v643_v19 }
  0xa0   : > { %v645_v20 = vld [vmem:[%s4401_s30 + $0xd0] sm:%s3040_s27]  ;;  %v647_v21 = vld [vmem:[%s4401_s30 + $0x104] sm:%s3040_s27] }
  0xa1   : > { %646 = vst [vmem:[%s4404_s7 + $0x70] sm:%s3040_s27] %v645_v20  ;;  %648 = vst [vmem:[%s4404_s7 + $0x8c] sm:%s3040_s27] %v647_v21 }
  0xa2   : > { %v649_v22 = vld [vmem:[%s4401_s30 + $0x138] sm:%s3040_s27]  ;;  %v651_v23 = vld [vmem:[%s4401_s30 + $0x16c] sm:%s3040_s27] }
  0xa3   : > { %650 = vst [vmem:[%s4404_s7 + $0xa8] sm:%s3040_s27] %v649_v22  ;;  %652 = vst [vmem:[%s4404_s7 + $0xc4] sm:%s3040_s27] %v651_v23 }
  0xa4 PF: > { %p3041_p11 = scmp.ge.u32.totalorder %s4167_s11, 8 }
  0xa5   : > { %s4087_s21 = smov (!%p3041_p11), 1  }
  0xa6   : > { %205 = sbr.rel (%p3041_p11) target bundleno = 179 (0xb3), region = 44  ;;  %s206_s13 = sshll.u32 (!%p3041_p11), %s4087_s21, %s4167_s11 }
  0xa7   : > { %s3042_s30 = sadd.s32 (!%p3041_p11), 4294967295, %s206_s13 }
  0xab   : > { %v216_v24 = vld [vmem:[%s4165_s9] sm:%s3042_s30]  ;;  %v218_v25 = vld [vmem:[%s4165_s9 + $0x34] sm:%s3042_s30] }
  0xac   : > { %217 = vst [vmem:[%s4169_s12] sm:%s3042_s30] %v216_v24  ;;  %219 = vst [vmem:[%s4169_s12 + $0x1c] sm:%s3042_s30] %v218_v25 }
  0xad   : > { %v220_v26 = vld [vmem:[%s4165_s9 + $0x68] sm:%s3042_s30]  ;;  %v222_v27 = vld [vmem:[%s4165_s9 + $0x9c] sm:%s3042_s30] }
  0xae   : > { %221 = vst [vmem:[%s4169_s12 + $0x38] sm:%s3042_s30] %v220_v26  ;;  %223 = vst [vmem:[%s4169_s12 + $0x54] sm:%s3042_s30] %v222_v27 }
  0xaf   : > { %v224_v28 = vld [vmem:[%s4165_s9 + $0xd0] sm:%s3042_s30]  ;;  %v226_v29 = vld [vmem:[%s4165_s9 + $0x104] sm:%s3042_s30] }
  0xb0   : > { %225 = vst [vmem:[%s4169_s12 + $0x70] sm:%s3042_s30] %v224_v28  ;;  %227 = vst [vmem:[%s4169_s12 + $0x8c] sm:%s3042_s30] %v226_v29 }
  0xb1   : > { %v228_v30 = vld [vmem:[%s4165_s9 + $0x138] sm:%s3042_s30]  ;;  %v230_v31 = vld [vmem:[%s4165_s9 + $0x16c] sm:%s3042_s30] }
  0xb2   : > { %229 = vst [vmem:[%s4169_s12 + $0xa8] sm:%s3042_s30] %v228_v30  ;;  %231 = vst [vmem:[%s4169_s12 + $0xc4] sm:%s3042_s30] %v230_v31 }
  0xb3 PF: > { %p3043_p12 = scmp.ge.s32.totalorder %s3956_s20, 1  ;;  %p671_p13 = scmp.lt.s32.totalorder %s3956_s20, 3 }
  0xb5   : > { %p672_p0 = pnand %p3043_p12, %p671_p13 }
  0xb6   : > { %s678_s16 = sand.u32 (!%p672_p0), 1, %s3948_s18   ;;  %s5505_s27 = sadd.s32 (!%p672_p0), 4294967295, %s3956_s20  }
  0xb7   : > { %675 = sbr.rel (%p672_p0) target bundleno = 863 (0x35f), region = 102 }
  0xb8   : > { %s3376_s29 = smul.u32 (!%p672_p0), 224, %s678_s16 }
  0xb9   : > { %s5033_s21 = smul.u32 (!%p672_p0), 7, %s5505_s27 }
  0xba   : > { %s4988_s8 = scalar_lea.vmem (!%p672_p0), [#allocation2], %s3376_s29  ;;  %s3377_s20 = smul.u32 (!%p672_p0), 7, %s678_s16 }
  0xbb   : > { %p722_p1 = scmp.lt.s32.totalorder (!%p672_p0), %s5033_s21, 12 }
  0xbc   : > { %v3666_v32 = vld [vmem:[%s5482_s1 + $0x78] sm:$0xff]   ;;  %v3670_v36 = vld [vmem:[%s5482_s1 + $0x70] sm:$0xff]   ;;  %v3674_v40 = vld [vmem:[%s5482_s1 + $0x68] sm:$0xff]   ;;  %v947_v60 = vlaneseq  ;;  %v4088_v4 = vmov 1966171168   ;;  %vm4090_vm0 = vmmov 0   ;;  %s5065_s18 = scalar_lea.vmem (%p4154_p5), %s5486_s5, %s5033_s21  }
  0xbd   : > { %v3667_v33 = vld [vmem:[%s5482_s1 + $0xf8] sm:$0xff]   ;;  %3215 = vmatprep.subr.bf16.mxu0 %v3666_v32  ;;  %v3671_v37 = vld [vmem:[%s5482_s1 + $0xf0] sm:$0xff]   ;;  %v3675_v41 = vld [vmem:[%s5482_s1 + $0xe8] sm:$0xff]   ;;  %v945_v5 = vunpack.c.l.s4 %v4088_v4  ;;  %vm1631_vm1 = vcmask 261120   ;;  %vm2129_vm2 = vcmask 523264   ;;  %s723_s13 = scalar_select %p722_p1, %s5033_s21, 12 }
  0xbe   : > { %v3668_v34 = vld [vmem:[%s5482_s1 + $0x38] sm:$0xff]   ;;  %3237 = vmatprep.subr.bf16.mxu1 %v3667_v33  ;;  %v3672_v38 = vld [vmem:[%s5482_s1 + $0x30] sm:$0xff]   ;;  %v3676_v42 = vld [vmem:[%s5482_s1 + $0x28] sm:$0xff]   ;;  %v4756_v1 = vshrl.u32 %v947_v60, 7  ;;  %s5055_s15 = scalar_lea.vmem [#allocation3], %s3377_s20   ;;  %s2375_s23 = ssub.s32 (%p4154_p5), 13, %s5033_s21 }
  0xbf   : > { %v3669_v35 = vld [vmem:[%s5482_s1 + $0xb8] sm:$0xff]   ;;  %3216 = vmatpush3.bf16.msra.mxu0 %v3668_v34  ;;  %v3673_v39 = vld [vmem:[%s5482_s1 + $0xb0] sm:$0xff]   ;;  %v3677_v43 = vld [vmem:[%s5482_s1 + $0xa8] sm:$0xff]   ;;  %v946_v8 = vunpack.c.0.s8 %v945_v5  ;;  %s724_s7 = scalar_lea.vmem %s5485_s4, %s723_s13  ;;  %p2376_p2 = scmp.lt.s32.totalorder (%p4154_p5), %s2375_s23, 7 }
  0xc0   : > { %3238 = vmatpush3.bf16.msra.mxu1 %v3669_v35  ;;  %3217 = vmatprep.subr.bf16.mxu0 %v3670_v36  ;;  %v3678_v44 = vld [vmem:[%s5482_s1 + $0x60] sm:$0xff]   ;;  %v3682_v48 = vld [vmem:[%s5482_s1 + $0x58] sm:$0xff]   ;;  %v3686_v52 = vld [vmem:[%s5482_s1 + $0x50] sm:$0xff]  }
  0xc1   : > { %3239 = vmatprep.subr.bf16.mxu1 %v3671_v37  ;;  %v3679_v45 = vld [vmem:[%s5482_s1 + $0xe0] sm:$0xff]   ;;  %v3683_v49 = vld [vmem:[%s5482_s1 + $0xd8] sm:$0xff]   ;;  %v3687_v53 = vld [vmem:[%s5482_s1 + $0xd0] sm:$0xff]   ;;  %v4768_v9 = vsub.s32 %v946_v8, %v4756_v1 }
  0xc2   : > { %v3680_v46 = vld [vmem:[%s5482_s1 + $0x20] sm:$0xff]   ;;  %v3684_v50 = vld [vmem:[%s5482_s1 + $0x18] sm:$0xff]   ;;  %v3688_v54 = vld [vmem:[%s5482_s1 + $0x10] sm:$0xff]  }
  0xc3   : > { %3218 = vmatpush3.bf16.msra.mxu0 %v3672_v38  ;;  %v3681_v47 = vld [vmem:[%s5482_s1 + $0xa0] sm:$0xff]   ;;  %v3685_v51 = vld [vmem:[%s5482_s1 + $0x98] sm:$0xff]   ;;  %v3689_v55 = vld [vmem:[%s5482_s1 + $0x90] sm:$0xff]  }
  0xc4   : > { %3240 = vmatpush3.bf16.msra.mxu1 %v3673_v39  ;;  %3219 = vmatprep.subr.bf16.mxu0 %v3674_v40  ;;  %v3690_v56 = vld [vmem:[%s5482_s1 + $0x48] sm:$0xff]   ;;  %v3694_v61 = vld [vmem:[%s5482_s1 + $0x40] sm:$0xff]   ;;  %v3699_v3 = vld [vmem:[%s5482_s1 + $0x178] sm:$0xff]  }
  0xc5   : > { %3241 = vmatprep.subr.bf16.mxu1 %v3675_v41  ;;  %v3691_v57 = vld [vmem:[%s5482_s1 + $0xc8] sm:$0xff]   ;;  %v3695_v62 = vld [vmem:[%s5482_s1 + $0xc0] sm:$0xff]   ;;  %v3700_v6 = vld [vmem:[%s5482_s1 + $0x1f8] sm:$0xff]  }
  0xc6   : > { %v3692_v58 = vld [vmem:[%s5482_s1 + $0x8] sm:$0xff]   ;;  %v3696_v63 = vld [vmem:[%s5482_s1] sm:$0xff]   ;;  %v3701_v16 = vld [vmem:[%s5482_s1 + $0x138] sm:$0xff]  }
  0xc7   : > { %3220 = vmatpush3.bf16.msra.mxu0 %v3676_v42  ;;  %v3693_v59 = vld [vmem:[%s5482_s1 + $0x88] sm:$0xff]   ;;  %v3697_v0 = vld [vmem:[%s5482_s1 + $0x80] sm:$0xff]   ;;  %v3703_v19 = vld [vmem:[%s5482_s1 + $0x170] sm:$0xff]  }
  0xc8   : > { %3242 = vmatpush3.bf16.msra.mxu1 %v3677_v43  ;;  %3221 = vmatprep.subr.bf16.mxu0 %v3678_v44  ;;  %v736_v2 = vld [vmem:[%s5481_s0] sm:$0xff]  ;;  %v3702_v21 = vld [vmem:[%s5482_s1 + $0x1b8] sm:$0xff]   ;;  %v3704_v22 = vld [vmem:[%s5482_s1 + $0x1f0] sm:$0xff]  }
  0xc9   : > { %3243 = vmatprep.subr.bf16.mxu1 %v3679_v45  ;;  %v943_v7 = vcombine.high %v736_v2, %v736_v2  ;;  %v950_v10 = vrot.slane %v736_v2, %v4768_v9  ;;  %v3705_v24 = vld [vmem:[%s5482_s1 + $0x130] sm:$0xff]   ;;  %v3707_v25 = vld [vmem:[%s5482_s1 + $0x168] sm:$0xff]   ;;  %v3711_v29 = vld [vmem:[%s5482_s1 + $0x160] sm:$0xff]  }
  0xca   : > { %v3706_v26 = vld [vmem:[%s5482_s1 + $0x1b0] sm:$0xff]   ;;  %v3708_v27 = vld [vmem:[%s5482_s1 + $0x1e8] sm:$0xff]   ;;  %v3712_v31 = vld [vmem:[%s5482_s1 + $0x1e0] sm:$0xff]  }
  0xcb   : > { %3222 = vmatpush3.bf16.msra.mxu0 %v3680_v46  ;;  %v4772_v11 = vrot.slane %v943_v7, %v4768_v9  ;;  %v958_v12 = vcombine.high %v950_v10, %v950_v10  ;;  %v966_v13 = vrot.slane %v950_v10, %v4768_v9  ;;  %v3709_v28 = vld [vmem:[%s5482_s1 + $0x128] sm:$0xff]   ;;  %v3713_v32 = vld [vmem:[%s5482_s1 + $0x120] sm:$0xff]   ;;  %v3715_v33 = vld [vmem:[%s5482_s1 + $0x158] sm:$0xff]  }
  0xcc   : > { %3244 = vmatpush3.bf16.msra.mxu1 %v3681_v47  ;;  %3223 = vmatprep.subr.bf16.mxu0 %v3682_v48  ;;  %v3710_v30 = vld [vmem:[%s5482_s1 + $0x1a8] sm:$0xff]   ;;  %v3714_v34 = vld [vmem:[%s5482_s1 + $0x1a0] sm:$0xff]   ;;  %v3716_v35 = vld [vmem:[%s5482_s1 + $0x1d8] sm:$0xff]  }
  0xcd   : > { %3245 = vmatprep.subr.bf16.mxu1 %v3683_v49  ;;  %v959_v14 = vcombine.high %v4772_v11, %v4772_v11  ;;  %v980_v15 = vrot.slane %v958_v12, %v4768_v9  ;;  %v988_v18 = vcombine.high %v966_v13, %v966_v13  ;;  %v3717_v36 = vld [vmem:[%s5482_s1 + $0x118] sm:$0xff]   ;;  %v3719_v37 = vld [vmem:[%s5482_s1 + $0x150] sm:$0xff]   ;;  %v3723_v41 = vld [vmem:[%s5482_s1 + $0x148] sm:$0xff]   ;;  %v973_v49 = vrot.slane %v4772_v11, %v4768_v9 }
  0xce   : > { %v3718_v38 = vld [vmem:[%s5482_s1 + $0x198] sm:$0xff]   ;;  %v3720_v39 = vld [vmem:[%s5482_s1 + $0x1d0] sm:$0xff]   ;;  %v3724_v43 = vld [vmem:[%s5482_s1 + $0x1c8] sm:$0xff]  }
  0xcf   : > { %3224 = vmatpush3.bf16.msra.mxu0 %v3684_v50  ;;  %v987_v17 = vrot.slane %v959_v14, %v4768_v9  ;;  %1667 = vmatprep.mubr.bf16.mxu0 %v980_v15  ;;  %v990_v20 = vcombine.high %v980_v15, %v980_v15  ;;  %v3721_v40 = vld [vmem:[%s5482_s1 + $0x110] sm:$0xff]   ;;  %v3725_v44 = vld [vmem:[%s5482_s1 + $0x108] sm:$0xff]   ;;  %v3727_v45 = vld [vmem:[%s5482_s1 + $0x140] sm:$0xff]  }
  0xd0   : > { %3246 = vmatpush3.bf16.msra.mxu1 %v3685_v51  ;;  %3225 = vmatprep.subr.bf16.mxu0 %v3686_v52  ;;  %v3722_v42 = vld [vmem:[%s5482_s1 + $0x190] sm:$0xff]   ;;  %v3726_v46 = vld [vmem:[%s5482_s1 + $0x188] sm:$0xff]   ;;  %v3728_v47 = vld [vmem:[%s5482_s1 + $0x1c0] sm:$0xff]  }
  0xd1   : > { %3247 = vmatprep.subr.bf16.mxu1 %v3687_v53  ;;  %v991_v23 = vcombine.high %v987_v17, %v987_v17  ;;  %1707 = vmatprep.mubr.bf16.mxu1 %v990_v20  ;;  %v3729_v48 = vld [vmem:[%s5482_s1 + $0x100] sm:$0xff]   ;;  %v3731_v50 = vld [vmem:[%s5482_s1 + $0x278] sm:$0xff]   ;;  %v3738_v60 = vld [vmem:[%s5482_s1 + $0x2b0] sm:$0xff]  }
  0xd2   : > { %v3730_v51 = vld [vmem:[%s5482_s1 + $0x180] sm:$0xff]   ;;  %v3732_v52 = vld [vmem:[%s5482_s1 + $0x2f8] sm:$0xff]   ;;  %v3751_v8 = vld [vmem:[%s5482_s1 + $0x250] sm:$0xff]  }
  0xd3   : > { %3226 = vmatpush3.bf16.msra.mxu0 %v3688_v54  ;;  %v3733_v53 = vld [vmem:[%s5482_s1 + $0x238] sm:$0xff]   ;;  %v989_v54 = vcombine.high %v973_v49, %v973_v49  ;;  %v3744_v2 = vld [vmem:[%s5482_s1 + $0x2e0] sm:$0xff]   ;;  %v3752_v11 = vld [vmem:[%s5482_s1 + $0x2d0] sm:$0xff]  }
  0xd4   : > { %3248 = vmatpush3.bf16.msra.mxu1 %v3689_v55  ;;  %3227 = vmatprep.subr.bf16.mxu0 %v3690_v56  ;;  %v3735_v55 = vld [vmem:[%s5482_s1 + $0x270] sm:$0xff]   ;;  %v3734_v56 = vld [vmem:[%s5482_s1 + $0x2b8] sm:$0xff]   ;;  %v3746_v5 = vld [vmem:[%s5482_s1 + $0x2a0] sm:$0xff]  }
  0xd5   : > { %3249 = vmatprep.subr.bf16.mxu1 %v3691_v57  ;;  %v3736_v57 = vld [vmem:[%s5482_s1 + $0x2f0] sm:$0xff]   ;;  %v3747_v4 = vld [vmem:[%s5482_s1 + $0x258] sm:$0xff]   ;;  %v737_v14 = vld [vmem:[%s5481_s0 + $0x8] sm:$0x1f] }
  0xd6   : > { %v3749_v7 = vld [vmem:[%s5482_s1 + $0x218] sm:$0xff]   ;;  %v3753_v12 = vld [vmem:[%s5482_s1 + $0x210] sm:$0xff]   ;;  %v3759_v20 = vld [vmem:[%s5482_s1 + $0x240] sm:$0xff]  }
  0xd7   : > { %3228 = vmatpush3.bf16.msra.mxu0 %v3692_v58  ;;  %v3737_v58 = vld [vmem:[%s5482_s1 + $0x230] sm:$0xff]   ;;  %v3750_v10 = vld [vmem:[%s5482_s1 + $0x298] sm:$0xff]  }
  0xd8   : > { %3250 = vmatpush3.bf16.msra.mxu1 %v3693_v59  ;;  %3229 = vmatprep.subr.bf16.mxu0 %v3694_v61  ;;  %v3739_v59 = vld [vmem:[%s5482_s1 + $0x268] sm:$0xff]   ;;  %v3754_v15 = vld [vmem:[%s5482_s1 + $0x290] sm:$0xff]  }
  0xd9   : > { %3251 = vmatprep.subr.bf16.mxu1 %v3695_v62  ;;  %v3740_v61 = vld [vmem:[%s5482_s1 + $0x2e8] sm:$0xff]  }
  0xda   : > { %v3741_v62 = vld [vmem:[%s5482_s1 + $0x228] sm:$0xff]  }
  0xdb   : > { %3230 = vmatpush3.bf16.msra.mxu0 %v3696_v63  ;;  %v3743_v63 = vld [vmem:[%s5482_s1 + $0x260] sm:$0xff]  }
  0xdc   : > { %3252 = vmatpush3.bf16.msra.mxu1 %v3697_v0  ;;  %3259 = vmatprep.subr.bf16.mxu0 %v3699_v3  ;;  %v3742_v0 = vld [vmem:[%s5482_s1 + $0x2a8] sm:$0xff]   ;;  %v3745_v3 = vld [vmem:[%s5482_s1 + $0x220] sm:$0xff]  }
  0xdd   : > { %3281 = vmatprep.subr.bf16.mxu1 %v3700_v6  ;;  %v3748_v6 = vld [vmem:[%s5482_s1 + $0x2d8] sm:$0xff]  }
  0xde   : > { %1668 = vmatmul.mubr.bf16.vlgmr.msra.gmra.mxu0 %v966_v13  ;;  %v3755_v13 = vld [vmem:[%s5482_s1 + $0x248] sm:$0xff]  }
  0xdf   : > { %3260 = vmatpush3.bf16.msra.mxu0 %v3701_v16  ;;  %1708 = vmatmul.mubr.bf16.vlgmr.msra.gmra.mxu1 %v988_v18  ;;  %v999_v16 = vrot.slane %v737_v14, %v4768_v9  ;;  %v3757_v18 = vld [vmem:[%s5482_s1 + $0x208] sm:$0xff]  }
  0xe0   : > { %3261 = vmatprep.subr.bf16.mxu0 %v3703_v19  ;;  %3282 = vmatpush3.bf16.msra.mxu1 %v3702_v21  ;;  %v3758_v21 = vld [vmem:[%s5482_s1 + $0x288] sm:$0xff]  }
  0xe1   : > { %1747 = vmatprep.mubr.bf16.mxu0 %v987_v17  ;;  %3283 = vmatprep.subr.bf16.mxu1 %v3704_v22  ;;  %v3756_v17 = vld [vmem:[%s5482_s1 + $0x2c8] sm:$0xff]   ;;  %v1007_v19 = vcombine.high %v999_v16, %v999_v16 }
  0xe2   : > { %1787 = vmatprep.mubr.bf16.mxu1 %v991_v23  ;;  %v3760_v23 = vld [vmem:[%s5482_s1 + $0x2c0] sm:$0xff]  }
  0xe3   : > { %3262 = vmatpush3.bf16.msra.mxu0 %v3705_v24  ;;  %v1028_v22 = vrot.slane %v1007_v19, %v4768_v9  ;;  %v3761_v24 = vld [vmem:[%s5482_s1 + $0x200] sm:$0xff]  }
  0xe4   : > { %3263 = vmatprep.subr.bf16.mxu0 %v3707_v25  ;;  %3284 = vmatpush3.bf16.msra.mxu1 %v3706_v26  ;;  %v1014_v26 = vrot.slane %v999_v16, %v4768_v9 }
  0xe5   : > { %3285 = vmatprep.subr.bf16.mxu1 %v3708_v27  ;;  %v1030_v25 = vcombine.high %v1028_v22, %v1028_v22  ;;  %v3762_v27 = vld [vmem:[%s5482_s1 + $0x280] sm:$0xff]  }
  0xe7   : > { %3264 = vmatpush3.bf16.msra.mxu0 %v3709_v28  ;;  %v992_v28 = vcombine.high %v737_v14, %v737_v14 }
  0xe8   : > { %3265 = vmatprep.subr.bf16.mxu0 %v3711_v29  ;;  %3286 = vmatpush3.bf16.msra.mxu1 %v3710_v30  ;;  %v3764_v29 = vld [vmem:[%s5482_s1 + $0x308] sm:$0xff]   ;;  %v1029_v30 = vcombine.high %v1014_v26, %v1014_v26 }
  0xe9   : > { %3287 = vmatprep.subr.bf16.mxu1 %v3712_v31  ;;  %v4089_v31 = vmov 0.0  }
  0xeb   : > { %3266 = vmatpush3.bf16.msra.mxu0 %v3713_v32  ;;  %v1006_v32 = vrot.slane %v992_v28, %v4768_v9 }
  0xec   : > { %3267 = vmatprep.subr.bf16.mxu0 %v3715_v33  ;;  %3288 = vmatpush3.bf16.msra.mxu1 %v3714_v34  ;;  %v3765_v33 = vld [vmem:[%s5482_s1 + $0x300] sm:$0xff]  }
  0xed   : > { %3289 = vmatprep.subr.bf16.mxu1 %v3716_v35  ;;  %v1021_v34 = vrot.slane %v1006_v32, %v4768_v9  ;;  %v3766_v35 = vld [vmem:[%s4988_s8 + $0xa8] ss:$28 sps:$4 sm:$0xff]   ;;  %v3790_v32 = vld [vmem:[%s4988_s8 + $0xb8] ss:$28 sps:$4 sm:$0xff]  }
  0xef   : > { %3268 = vmatpush3.bf16.msra.mxu0 %v3717_v36  ;;  %v3768_v36 = vld [vmem:[%s4988_s8 + $0xac] ss:$28 sps:$4 sm:$0xff]  }
  0xf0   : > { %3269 = vmatprep.subr.bf16.mxu0 %v3719_v37  ;;  %3290 = vmatpush3.bf16.msra.mxu1 %v3718_v38  ;;  %v3769_v37 = vld [vmem:[%s4988_s8 + $0xb0] ss:$28 sps:$4 sm:$0xff]  }
  0xf1   : > { %3291 = vmatprep.subr.bf16.mxu1 %v3720_v39  ;;  %v3771_v38 = vld [vmem:[%s4988_s8 + $0xb4] ss:$28 sps:$4 sm:$0xff]  }
  0xf2   : > { %v3774_v39 = vld [vmem:[%s4988_s8 + $0x74] ss:$28 sps:$4 sm:$0xff]  }
  0xf3   : > { %3270 = vmatpush3.bf16.msra.mxu0 %v3721_v40  ;;  %v3777_v40 = vld [vmem:[%s4988_s8 + $0x7c] ss:$28 sps:$4 sm:$0xff]  }
  0xf4   : > { %3271 = vmatprep.subr.bf16.mxu0 %v3723_v41  ;;  %3292 = vmatpush3.bf16.msra.mxu1 %v3722_v42  ;;  %v3772_v41 = vld [vmem:[%s4988_s8 + $0x70] ss:$28 sps:$4 sm:$0xff]   ;;  %v3775_v42 = vld [vmem:[%s4988_s8 + $0x78] ss:$28 sps:$4 sm:$0xff]  }
  0xf5   : > { %3293 = vmatprep.subr.bf16.mxu1 %v3724_v43  ;;  %v3780_v43 = vld [vmem:[%s4988_s8 + $0x3c] ss:$28 sps:$4 sm:$0xff]  }
  0xf7   : > { %3272 = vmatpush3.bf16.msra.mxu0 %v3725_v44  ;;  %v3783_v44 = vld [vmem:[%s4988_s8 + $0x44] ss:$28 sps:$4 sm:$0xff]  }
  0xf8   : > { %3273 = vmatprep.subr.bf16.mxu0 %v3727_v45  ;;  %3294 = vmatpush3.bf16.msra.mxu1 %v3726_v46  ;;  %v3778_v45 = vld [vmem:[%s4988_s8 + $0x38] ss:$28 sps:$4 sm:$0xff]   ;;  %v3781_v46 = vld [vmem:[%s4988_s8 + $0x40] ss:$28 sps:$4 sm:$0xff]  }
  0xf9   : > { %3295 = vmatprep.subr.bf16.mxu1 %v3728_v47  ;;  %v3786_v47 = vld [vmem:[%s4988_s8 + $0x4] ss:$28 sps:$4 sm:$0xff]  }
  0xfb   : > { %3274 = vmatpush3.bf16.msra.mxu0 %v3729_v48  ;;  %v3789_v48 = vld [vmem:[%s4988_s8 + $0xc] ss:$28 sps:$4 sm:$0xff]  }
  0xfc   : > { %3303 = vmatprep.subr.bf16.mxu0 %v3731_v50  ;;  %3296 = vmatpush3.bf16.msra.mxu1 %v3730_v51  ;;  %v3787_v50 = vld [vmem:[%s4988_s8 + $0x8] ss:$28 sps:$4 sm:$0xff]   ;;  %v3792_v51 = vld [vmem:[%s4988_s8 + $0xbc] ss:$28 sps:$4 sm:$0xff]  }
  0xfd   : > { %3325 = vmatprep.subr.bf16.mxu1 %v3732_v52  ;;  %v4091_v52 = vmov 0  }
  0xfe   : > { %1748 = vmatmul.mubr.bf16.vlgmr.msra.gmra.mxu0 %v973_v49  ;;  %v3784_v49 = vld [vmem:[%s4988_s8] ss:$28 sps:$4 sm:$0xff]  }
  0xff   : > { %3304 = vmatpush3.bf16.msra.mxu0 %v3733_v53  ;;  %1788 = vmatmul.mubr.bf16.vlgmr.msra.gmra.mxu1 %v989_v54 }
 0x100   : > { %3305 = vmatprep.subr.bf16.mxu0 %v3735_v55  ;;  %3326 = vmatpush3.bf16.msra.mxu1 %v3734_v56 }
 0x101   : > { %3327 = vmatprep.subr.bf16.mxu1 %v3736_v57  ;;  %1827 = vmatprep.mubr.bf16.mxu0 %v1028_v22 }
 0x102   : > { %1867 = vmatprep.mubr.bf16.mxu1 %v1030_v25 }
 0x103   : > { %3306 = vmatpush3.bf16.msra.mxu0 %v3737_v58 }
 0x104   : > { %3307 = vmatprep.subr.bf16.mxu0 %v3739_v59  ;;  %3328 = vmatpush3.bf16.msra.mxu1 %v3738_v60 }
 0x105   : > { %3329 = vmatprep.subr.bf16.mxu1 %v3740_v61 }
 0x107   : > { %3308 = vmatpush3.bf16.msra.mxu0 %v3741_v62 }
 0x108   : > { %3309 = vmatprep.subr.bf16.mxu0 %v3743_v63  ;;  %3330 = vmatpush3.bf16.msra.mxu1 %v3742_v0 }
 0x109   : > { %3331 = vmatprep.subr.bf16.mxu1 %v3744_v2 }
 0x10b   : > { %3310 = vmatpush3.bf16.msra.mxu0 %v3745_v3 }
 0x10c   : > { %3311 = vmatprep.subr.bf16.mxu0 %v3747_v4  ;;  %3332 = vmatpush3.bf16.msra.mxu1 %v3746_v5 }
 0x10d   : > { %3333 = vmatprep.subr.bf16.mxu1 %v3748_v6 }
 0x10f   : > { %3312 = vmatpush3.bf16.msra.mxu0 %v3749_v7  ;;  %v3044_v7 = vld [vmem:[%s5483_s2] ss:$0 sm:$0xff] }
 0x110   : > { %3313 = vmatprep.subr.bf16.mxu0 %v3751_v8  ;;  %3334 = vmatpush3.bf16.msra.mxu1 %v3750_v10 }
 0x111   : > { %3335 = vmatprep.subr.bf16.mxu1 %v3752_v11 }
 0x113   : > { %3314 = vmatpush3.bf16.msra.mxu0 %v3753_v12 }
 0x114   : > { %3315 = vmatprep.subr.bf16.mxu0 %v3755_v13  ;;  %3336 = vmatpush3.bf16.msra.mxu1 %v3754_v15 }
 0x115   : > { %3337 = vmatprep.subr.bf16.mxu1 %v3756_v17 }
 0x117   : > { %3316 = vmatpush3.bf16.msra.mxu0 %v3757_v18 }
 0x118   : > { %3317 = vmatprep.subr.bf16.mxu0 %v3759_v20  ;;  %3338 = vmatpush3.bf16.msra.mxu1 %v3758_v21 }
 0x119   : > { %3339 = vmatprep.subr.bf16.mxu1 %v3760_v23 }
 0x11b   : > { %3318 = vmatpush3.bf16.msra.mxu0 %v3761_v24 }
 0x11c   : > { %3355 = vmatprep.subr.bf16.mxu0 %v4089_v31  ;;  %3340 = vmatpush3.bf16.msra.mxu1 %v3762_v27 }
 0x11d   : > { %2141 = vmatprep.subr.bf16.mxu1 %v3768_v36 }
 0x11e   : > { %1828 = vmatmul.mubr.bf16.vlgmr.msra.gmra.mxu0 %v1014_v26 }
 0x11f   : > { %3356 = vmatpush3.bf16.msra.mxu0 %v3764_v29  ;;  %3359 = vmatprep.mubr.msk.bf16.mxu0 %vm4090_vm0, %v4089_v31 }
 0x120   : > { %1868 = vmatmul.mubr.bf16.vlgmr.msra.gmra.mxu1 %v1029_v30  ;;  %3357 = vmatprep.subr.bf16.mxu0 %v4089_v31 }
 0x121   : > { %2142 = vmatpush1.bf16.msra.mxu1 %v3766_v35  ;;  %2165 = vmatprep.mubr.bf16.mxu1 %v4091_v52  ;;  %v3796_v35 = vld [vmem:[%s4988_s8 + $0x84] ss:$28 sps:$4 sm:$0xff]  }
 0x122   : > { %2143 = vmatprep.subr.bf16.mxu1 %v3774_v39  ;;  %v3797_v39 = vld [vmem:[%s4988_s8 + $0x88] ss:$28 sps:$4 sm:$0xff]  }
 0x123   : > { %3358 = vmatpush3.bf16.msra.mxu0 %v3765_v33  ;;  %v3793_v33 = vld [vmem:[%s4988_s8 + $0xc0] ss:$28 sps:$4 sm:$0xff]  }
 0x124   : > { %2182 = vmatprep.subr.bf16.mxu0 %v3771_v38  ;;  %v3794_v38 = vld [vmem:[%s4988_s8 + $0x80] ss:$28 sps:$4 sm:$0xff]  }
 0x125   : > { %2144 = vmatpush1.bf16.msra.mxu1 %v3772_v41  ;;  %v3798_v41 = vld [vmem:[%s4988_s8 + $0x48] ss:$28 sps:$4 sm:$0xff]  }
 0x126   : > { %3360 = vmatmul.mubr.msk.bf16.vlgmr.msra.gmra.mxu0 %vm1631_vm1, %v1021_v34  ;;  %2145 = vmatprep.subr.bf16.mxu1 %v3780_v43  ;;  %v3804_v43 = vld [vmem:[%s4988_s8 + $0x14] ss:$28 sps:$4 sm:$0xff]  }
 0x127   : > { %2183 = vmatpush1.bf16.msra.mxu0 %v3769_v37  ;;  %2206 = vmatprep.mubr.bf16.mxu0 %v4091_v52 }
 0x128   : > { %2184 = vmatprep.subr.bf16.mxu0 %v3777_v40  ;;  %v3800_v40 = vld [vmem:[%s4988_s8 + $0x4c] ss:$28 sps:$4 sm:$0xff]  }
 0x129   : > { %2146 = vmatpush1.bf16.msra.mxu1 %v3778_v45  ;;  %v3805_v45 = vld [vmem:[%s4988_s8 + $0x18] ss:$28 sps:$4 sm:$0xff]  }
 0x12a   : > { %2147 = vmatprep.subr.bf16.mxu1 %v3786_v47 }
 0x12b   : > { %2185 = vmatpush1.bf16.msra.mxu0 %v3775_v42  ;;  %v3801_v42 = vld [vmem:[%s4988_s8 + $0x50] ss:$28 sps:$4 sm:$0xff]  }
 0x12c   : > { %2186 = vmatprep.subr.bf16.mxu0 %v3783_v44  ;;  %v3802_v44 = vld [vmem:[%s4988_s8 + $0x10] ss:$28 sps:$4 sm:$0xff]  }
 0x12d   : > { %2148 = vmatpush1.bf16.msra.mxu1 %v3784_v49  ;;  %v1952_v49 = vsub.s32 0, %v4756_v1 }
 0x12e   : > { %2223 = vmatprep.subr.bf16.mxu1 %v3792_v51 }
 0x12f   : > { %2187 = vmatpush1.bf16.msra.mxu0 %v3781_v46 }
 0x130   : > { %2188 = vmatprep.subr.bf16.mxu0 %v3789_v48  ;;  %v1964_v48 = vsub.s32 3, %v4756_v1 }
 0x133   : > { %2189 = vmatpush1.bf16.msra.mxu0 %v3787_v50 }
 0x134   : > { %3363 = vmatprep.subr.bf16.mxu0 %v4089_v31 }
 0x19e   : > { %v3231_v53 = vpop.f32.mrf.mxu0 }
 0x19f   : > { %v3253_v54 = vpop.f32.mrf.mxu1 }
 0x1a0   : > { %v3232_v55 = vpop.f32.mrf.mxu0 }
 0x1a1   : > { %v3254_v56 = vpop.f32.mrf.mxu1  ;;  %v3233_v6 = vadd.f32 %v3232_v55, %v3231_v53  ;;  %v1960_v53 = vsub.s32 2, %v4756_v1 }
 0x1a2   : > { %v3234_v57 = vpop.f32.mrf.mxu0  ;;  %v3255_v10 = vadd.f32 %v3254_v56, %v3253_v54 }
 0x1a3   : > { %v3256_v58 = vpop.f32.mrf.mxu1  ;;  %v1670_v8 = vadd.f32 %v3233_v6, %v3044_v7 }
 0x1a4   : > { %v3235_v59 = vpop.f32.mrf.mxu0 }
 0x1a5   : > { %v3257_v60 = vpop.f32.mrf.mxu1  ;;  %v1710_v12 = vadd.f32 %v3255_v10, %v1670_v8 }
 0x1be   : > { %v3275_v61 = vpop.f32.mrf.mxu0 }
 0x1bf   : > { %v3297_v62 = vpop.f32.mrf.mxu1 }
 0x1c0   : > { %v3276_v63 = vpop.f32.mrf.mxu0 }
 0x1c1   : > { %v3298_v0 = vpop.f32.mrf.mxu1  ;;  %v3277_v11 = vadd.f32 %v3276_v63, %v3275_v61 }
 0x1c2   : > { %v3278_v2 = vpop.f32.mrf.mxu0  ;;  %v3299_v14 = vadd.f32 %v3298_v0, %v3297_v62  ;;  %v1968_v0 = vsub.s32 4, %v4756_v1 }
 0x1c3   : > { %v3300_v3 = vpop.f32.mrf.mxu1  ;;  %v1750_v13 = vadd.f32 %v3277_v11, %v1710_v12  ;;  %v1976_v2 = vsub.s32 6, %v4756_v1 }
 0x1c4   : > { %v3279_v4 = vpop.f32.mrf.mxu0 }
 0x1c5   : > { %v3301_v5 = vpop.f32.mrf.mxu1  ;;  %v1790_v18 = vadd.f32 %v3299_v14, %v1750_v13 }
 0x1c6   : > { %v1972_v5 = vsub.s32 5, %v4756_v1 }
 0x1de   : > { %v3319_v15 = vpop.f32.mrf.mxu0 }
 0x1e0   : > { %v3341_v16 = vpop.f32.mrf.mxu1  ;;  %v3320_v17 = vpop.f32.mrf.mxu0 }
 0x1e1   : > { %v3321_v19 = vadd.f32 %v3320_v17, %v3319_v15 }
 0x1e2   : > { %v3342_v20 = vpop.f32.mrf.mxu1  ;;  %v3322_v21 = vpop.f32.mrf.mxu0 }
 0x1e3   : > { %v1830_v22 = vadd.f32 %v3321_v19, %v1790_v18  ;;  %v3343_v23 = vadd.f32 %v3342_v20, %v3341_v16 }
 0x1e4   : > { %v3344_v24 = vpop.f32.mrf.mxu1  ;;  %v3323_v25 = vpop.f32.mrf.mxu0 }
 0x1e5   : > { %v1870_v26 = vadd.f32 %v3343_v23, %v1830_v22 }
 0x1e6   : > { %v3345_v27 = vpop.f32.mrf.mxu1  ;;  %v1909_v28 = vpop.f32.mrf.mxu0 }
 0x1e7   : > { %v1910_v29 = vadd.f32 %v1909_v28, %v1870_v26 }
 0x1e8   : > { %v3361_v30 = vpop.f32.mrf.mxu0 }
 0x1e9   : > { %v1915_v34 = vpack.c.bf16 %v1910_v29, %v1910_v29 }
 0x1ea   : > { %v1912_v36 = vpop.f32.mrf.mxu0 }
 0x1eb   : > { %3172 = vmatmul.mubr.msk.bf16.vlgmr.msra.gmra.mxu1 %vm2129_vm2, %v1915_v34  ;;  %3173 = vmatmul.mubr.msk.bf16.vlgmr.msra.gmra.mxu0 %vm2129_vm2, %v1915_v34 }
 0x1ec   : > { %2224 = vmatpush1.bf16.msra.mxu1 %v3790_v32  ;;  %3364 = vmatpush3.bf16.msra.mxu0 %v3793_v33  ;;  %v3362_v37 = vpop.f32.mrf.mxu0 }
 0x1ed   : > { %2225 = vmatprep.subr.bf16.mxu1 %v3796_v35  ;;  %3365 = vmatprep.subr.bf16.mxu0 %v4089_v31 }
 0x1ee   : > { %2247 = vmatprep.mubr.bf16.mxu1 %v4091_v52  ;;  %3371 = vmatprep.mubr.msk.bf16.mxu0 %vm4090_vm0, %v4089_v31  ;;  %v1948_v52 = vld [vmem:[%s724_s7] sm:$0xff] }
 0x1ef   : > { %v1965_v57 = vrot.slane %v1948_v52, %v1964_v48  ;;  %v1953_v58 = vrot.slane %v1948_v52, %v1952_v49  ;;  %v1961_v61 = vrot.slane %v1948_v52, %v1960_v53  ;;  %v1969_v8 = vrot.slane %v1948_v52, %v1968_v0 }
 0x1f0   : > { %2226 = vmatpush1.bf16.msra.mxu1 %v3794_v38  ;;  %3366 = vmatpush3.bf16.msra.mxu0 %v3797_v39  ;;  %v1977_v10 = vrot.slane %v1948_v52, %v1976_v2  ;;  %v1973_v13 = vrot.slane %v1948_v52, %v1972_v5 }
 0x1f1   : > { %2227 = vmatprep.subr.bf16.mxu1 %v3800_v40  ;;  %3367 = vmatprep.subr.bf16.mxu0 %v4089_v31 }
 0x1f4   : > { %2228 = vmatpush1.bf16.msra.mxu1 %v3798_v41  ;;  %3368 = vmatpush3.bf16.msra.mxu0 %v3801_v42 }
 0x1f5   : > { %2229 = vmatprep.subr.bf16.mxu1 %v3804_v43  ;;  %3369 = vmatprep.subr.bf16.mxu0 %v4089_v31  ;;  %v1956_v31 = vsub.s32 1, %v4756_v1 }
 0x1f7   : > { %v1957_v54 = vrot.slane %v1948_v52, %v1956_v31 }
 0x1f8   : > { %2230 = vmatpush1.bf16.msra.mxu1 %v3802_v44  ;;  %3370 = vmatpush3.bf16.msra.mxu0 %v3805_v45 }
 0x1fb   : > { %3174 = vmatmul.mubr.msk.bf16.vlgmr.msra.gmra.mxu1 %vm2129_vm2, %v1915_v34  ;;  %3372 = vmatmul.mubr.msk.bf16.vlgmr.msra.gmra.mxu0 %vm2129_vm2, %v1915_v34 }
 0x2ab   : > { %v2167_v46 = vpop.f32.mrf.mxu1  ;;  %v2208_v47 = vpop.f32.mrf.mxu0 }
 0x2ac   : > { %v2168_v3 = vadd.f32 %v2167_v46, %v1953_v58  ;;  %v2209_v4 = vadd.f32 %v2208_v47, %v1961_v61 }
 0x2ad   : > { %v2169_v50 = vpop.f32.mrf.mxu1  ;;  %v2210_v51 = vpop.f32.mrf.mxu0 }
 0x2ae   : > { %v2170_v62 = vadd.f32 %v2169_v50, %v1957_v54  ;;  %v2211_v63 = vadd.f32 %v2210_v51, %v1965_v57  ;;  %v2296_v11 = vmax.f32 %v2168_v3, 0.0  ;;  %v2298_v12 = vmax.f32 %v2209_v4, 0.0 }
 0x2af   : > { %v2171_v55 = vpop.f32.mrf.mxu1  ;;  %v2212_v56 = vpop.f32.mrf.mxu0 }
 0x2b0   : > { %v2297_v6 = vmax.f32 %v2170_v62, 0.0  ;;  %v2299_v7 = vmax.f32 %v2211_v63, 0.0 }
 0x2b1   : > { %v2172_v59 = vpop.f32.mrf.mxu1  ;;  %v2213_v60 = vpop.f32.mrf.mxu0 }
 0x2b2   : > { %v3176_v14 = vpack.c.bf16 %v2297_v6, %v2296_v11  ;;  %v3177_v17 = vpack.c.bf16 %v2299_v7, %v2298_v12 }
 0x2b4   : > { %v2326_v1 = vrot.slane %v3176_v14, %v4768_v9  ;;  %v2333_v26 = vrot.slane %v3177_v17, %v4768_v9 }
 0x2b6   : > { %v2348_v34 = vcombine.low %v2326_v1, %v2333_v26 }
 0x2b8   : > { %v2356_v38 = vrot.slane %v2348_v34, %v4768_v9 }
 0x2bb   : > { %v2249_v15 = vpop.f32.mrf.mxu1  ;;  %v2290_v16 = vpop.f32.mrf.mxu0 }
 0x2bc   : > { %v2250_v18 = vadd.f32 %v2249_v15, %v1969_v8  ;;  %v2291_v19 = vadd.f32 %v2290_v16, %v1977_v10 }
 0x2bd   : > { %v2251_v20 = vpop.f32.mrf.mxu1  ;;  %v3373_v21 = vpop.f32.mrf.mxu0 }
 0x2be   : > { %v2302_v22 = vmax.f32 %v2291_v19, 0.0  ;;  %v2252_v23 = vadd.f32 %v2251_v20, %v1973_v13  ;;  %v2300_v27 = vmax.f32 %v2250_v18, 0.0 }
 0x2bf   : > { %v2253_v24 = vpop.f32.mrf.mxu1  ;;  %v2293_v25 = vpop.f32.mrf.mxu0 }
 0x2c0   : > { %v2309_v28 = vpack.c.bf16 %v2302_v22, %v2302_v22  ;;  %v2301_v29 = vmax.f32 %v2252_v23, 0.0 }
 0x2c1   : > { %v2254_v30 = vpop.f32.mrf.mxu1  ;;  %v3374_v32 = vpop.f32.mrf.mxu0 }
 0x2c2   : > { %v3178_v33 = vpack.c.bf16 %v2301_v29, %v2300_v27  ;;  %v2347_v35 = vrot.slane %v2309_v28, %v4768_v9 }
 0x2c4   : > { %v2340_v36 = vrot.slane %v3178_v33, %v4768_v9 }
 0x2c6   : > { %v2349_v37 = vcombine.low %v2340_v36, %v2347_v35 }
 0x2c8   : > { %v2363_v39 = vrot.slane %v2349_v37, %v4768_v9  ;;  %2373 = sbr.rel (!%p4154_p5) target bundleno = 863 (0x35f), region = 110 }
 0x2ca   : > { %v2364_v40 = vcombine.low %v2356_v38, %v2363_v39 }
 0x2cc   : > { %2366 = vst [vmem:[%s5055_s15] sm:$0x7f] %v2364_v40 }
 0x2cd   : > { %s5530_s23 = smov (!%p2376_p2, %s2375_s23), 7 }
 0x2ce   : > { %s3179_s14 = sshll.u32 %s5530_s23, 4 }
 0x2cf   : > { %p3181_p3 = scmp.eq.s32.totalorder %s3179_s14, 0 }
 0x2d0   : > { %p2384_p4 = scmp.lt.u32.totalorder (!%p3181_p3), %s5530_s23, 8 }
 0x2d1   : > { %2383 = sbr.rel (%p3181_p3) target bundleno = 863 (0x35f), region = 114 }
 0x2d6   : > { %2387 = sbr.rel (%p2384_p4) target bundleno = 854 (0x356), region = 118  ;;  %s5072_s26 = sand.u32 (!%p2384_p4), 7, %s5530_s23  }
 0x2d7   : > { %p2404_p5 = scmp.eq.s32.totalorder (!%p2384_p4), %s5072_s26, 0  ;;  %p3182_p6 = scmp.ne.s32.totalorder (!%p2384_p4), %s5072_s26, 0 }
 0x2db   : > { %2407 = sbr.rel (%p3182_p6) target bundleno = 790 (0x316), region = 133  ;;  %s2408_s6 = sshrl.u32 (!%p3182_p6), %s5530_s23, 3 }
 0x2dc   : > { %s5079_s10 = sshrl.u32 (!%p3182_p6), %s2408_s6, 6 }
 0x2dd   : > { %p3183_p7 = scmp.le.s32.totalorder (!%p3182_p6), %s5079_s10, 0 }
 0x2e0   : > { %2935 = sbr.rel (%p3183_p7) target bundleno = 774 (0x306), region = 284  ;;  %s5506_s28 = smov (!%p3183_p7), %s5065_s18 }
 0x2e1   : > { %s5507_s16 = smov (!%p3183_p7), %s5055_s15  ;;  %s5088_s29 = smov (!%p3183_p7), 0  }
 0x2e2   : > { %s5090_s8 = smov (!%p3183_p7), 0  }
 0x2e5 LB: >> { %v2421_v9 = vld [vmem:[%s4028_s16] sm:$0xff]  ;;  %v2423_v41 = vld [vmem:[%s4028_s16 + $0x8] sm:$0xff]  ;;  %v2425_v42 = vld [vmem:[%s4028_s16 + $0x10] sm:$0xff]  ;;  %s2549_s17 = sadd.s32 1, %s4032_s29  ;;  %s2415_s8 = sadd.s32 1, %s4036_s8   ;;  %s4036_s8 = sphi %s5090_s8, %s2415_s8   ;;  %s4032_s29 = sphi %s5088_s29, %s5510_s29   ;;  %s4028_s16 = sphi %s5507_s16, %s5509_s16   ;;  %s4024_s28 = sphi %s5506_s28, %s5508_s28  }
 0x2e6   : >> { %2422 = vst [vmem:[%s4024_s28] sm:$0xff] %v2421_v9  ;;  %2424 = vst [vmem:[%s4024_s28 + $0x8] sm:$0xff] %v2423_v41  ;;  %v2427_v43 = vld [vmem:[%s4028_s16 + $0x18] sm:$0xff]  ;;  %v2429_v44 = vld [vmem:[%s4028_s16 + $0x20] sm:$0xff]  ;;  %p2550_p8 = scmp.ge.s32.totalorder %s2549_s17, %s5079_s10  ;;  %p2414_p9 = scmp.ge.s32.totalorder %s2415_s8, %s5079_s10 }
 0x2e7   : >> { %2426 = vst [vmem:[%s4024_s28 + $0x10] sm:$0xff] %v2425_v42  ;;  %v2431_v45 = vld [vmem:[%s4028_s16 + $0x28] sm:$0xff]  ;;  %2428 = vst [vmem:[%s4024_s28 + $0x18] sm:$0xff] %v2427_v43  ;;  %v2433_v46 = vld [vmem:[%s4028_s16 + $0x30] sm:$0xff] }
 0x2e8   : >> { %2430 = vst [vmem:[%s4024_s28 + $0x20] sm:$0xff] %v2429_v44  ;;  %2432 = vst [vmem:[%s4024_s28 + $0x28] sm:$0xff] %v2431_v45  ;;  %v2435_v47 = vld [vmem:[%s4028_s16 + $0x38] sm:$0xff]  ;;  %v2437_v31 = vld [vmem:[%s4028_s16 + $0x40] sm:$0xff]  ;;  %s5532_s17 = smov (%p2550_p8, %s2549_s17), 0 }
 0x2e9   : >> { %2434 = vst [vmem:[%s4024_s28 + $0x30] sm:$0xff] %v2433_v46  ;;  %2436 = vst [vmem:[%s4024_s28 + $0x38] sm:$0xff] %v2435_v47  ;;  %v2439_v48 = vld [vmem:[%s4028_s16 + $0x48] sm:$0xff]  ;;  %v2441_v49 = vld [vmem:[%s4028_s16 + $0x50] sm:$0xff]  ;;  %s3184_s24 = sshll.u32 %s5532_s17, 9  ;;  %s5510_s29 = smov %s5532_s17 }
 0x2ea   : >> { %2438 = vst [vmem:[%s4024_s28 + $0x40] sm:$0xff] %v2437_v31  ;;  %v2443_v50 = vld [vmem:[%s4028_s16 + $0x58] sm:$0xff]  ;;  %2440 = vst [vmem:[%s4024_s28 + $0x48] sm:$0xff] %v2439_v48  ;;  %v2445_v51 = vld [vmem:[%s4028_s16 + $0x60] sm:$0xff]  ;;  %s5146_s27 = scalar_lea.vmem %s5055_s15, %s3184_s24 [#allocation3]   ;;  %s5149_s21 = scalar_lea.vmem %s5065_s18, %s3184_s24  }
 0x2eb   : >> { %2442 = vst [vmem:[%s4024_s28 + $0x50] sm:$0xff] %v2441_v49  ;;  %2444 = vst [vmem:[%s4024_s28 + $0x58] sm:$0xff] %v2443_v50  ;;  %v2447_v52 = vld [vmem:[%s4028_s16 + $0x68] sm:$0xff]  ;;  %v2449_v53 = vld [vmem:[%s4028_s16 + $0x70] sm:$0xff] }
 0x2ec   : >> { %2446 = vst [vmem:[%s4024_s28 + $0x60] sm:$0xff] %v2445_v51  ;;  %2448 = vst [vmem:[%s4024_s28 + $0x68] sm:$0xff] %v2447_v52  ;;  %v2451_v54 = vld [vmem:[%s4028_s16 + $0x78] sm:$0xff]  ;;  %v2453_v55 = vld [vmem:[%s4028_s16 + $0x80] sm:$0xff] }
 0x2ed   : >> { %2450 = vst [vmem:[%s4024_s28 + $0x70] sm:$0xff] %v2449_v53  ;;  %v2455_v56 = vld [vmem:[%s4028_s16 + $0x88] sm:$0xff]  ;;  %2452 = vst [vmem:[%s4024_s28 + $0x78] sm:$0xff] %v2451_v54  ;;  %v2457_v57 = vld [vmem:[%s4028_s16 + $0x90] sm:$0xff] }
 0x2ee   : >> { %2454 = vst [vmem:[%s4024_s28 + $0x80] sm:$0xff] %v2453_v55  ;;  %2456 = vst [vmem:[%s4024_s28 + $0x88] sm:$0xff] %v2455_v56  ;;  %v2459_v58 = vld [vmem:[%s4028_s16 + $0x98] sm:$0xff]  ;;  %v2461_v59 = vld [vmem:[%s4028_s16 + $0xa0] sm:$0xff] }
 0x2ef   : >> { %2458 = vst [vmem:[%s4024_s28 + $0x90] sm:$0xff] %v2457_v57  ;;  %2460 = vst [vmem:[%s4024_s28 + $0x98] sm:$0xff] %v2459_v58  ;;  %v2463_v60 = vld [vmem:[%s4028_s16 + $0xa8] sm:$0xff]  ;;  %v2465_v61 = vld [vmem:[%s4028_s16 + $0xb0] sm:$0xff] }
 0x2f0   : >> { %2462 = vst [vmem:[%s4024_s28 + $0xa0] sm:$0xff] %v2461_v59  ;;  %v2467_v62 = vld [vmem:[%s4028_s16 + $0xb8] sm:$0xff]  ;;  %2464 = vst [vmem:[%s4024_s28 + $0xa8] sm:$0xff] %v2463_v60  ;;  %v2469_v63 = vld [vmem:[%s4028_s16 + $0xc0] sm:$0xff] }
 0x2f1   : >> { %2466 = vst [vmem:[%s4024_s28 + $0xb0] sm:$0xff] %v2465_v61  ;;  %2468 = vst [vmem:[%s4024_s28 + $0xb8] sm:$0xff] %v2467_v62  ;;  %v2471_v0 = vld [vmem:[%s4028_s16 + $0xc8] sm:$0xff]  ;;  %v2473_v2 = vld [vmem:[%s4028_s16 + $0xd0] sm:$0xff] }
 0x2f2   : >> { %2470 = vst [vmem:[%s4024_s28 + $0xc0] sm:$0xff] %v2469_v63  ;;  %2472 = vst [vmem:[%s4024_s28 + $0xc8] sm:$0xff] %v2471_v0  ;;  %v2475_v3 = vld [vmem:[%s4028_s16 + $0xd8] sm:$0xff]  ;;  %v2477_v4 = vld [vmem:[%s4028_s16 + $0xe0] sm:$0xff] }
 0x2f3   : >> { %2474 = vst [vmem:[%s4024_s28 + $0xd0] sm:$0xff] %v2473_v2  ;;  %v2479_v5 = vld [vmem:[%s4028_s16 + $0xe8] sm:$0xff]  ;;  %2476 = vst [vmem:[%s4024_s28 + $0xd8] sm:$0xff] %v2475_v3  ;;  %v2481_v6 = vld [vmem:[%s4028_s16 + $0xf0] sm:$0xff] }
 0x2f4   : >> { %2478 = vst [vmem:[%s4024_s28 + $0xe0] sm:$0xff] %v2477_v4  ;;  %2480 = vst [vmem:[%s4024_s28 + $0xe8] sm:$0xff] %v2479_v5  ;;  %v2483_v7 = vld [vmem:[%s4028_s16 + $0xf8] sm:$0xff]  ;;  %v2485_v8 = vld [vmem:[%s4028_s16 + $0x100] sm:$0xff] }
 0x2f5   : >> { %2482 = vst [vmem:[%s4024_s28 + $0xf0] sm:$0xff] %v2481_v6  ;;  %2484 = vst [vmem:[%s4024_s28 + $0xf8] sm:$0xff] %v2483_v7  ;;  %v2487_v10 = vld [vmem:[%s4028_s16 + $0x108] sm:$0xff]  ;;  %v2489_v11 = vld [vmem:[%s4028_s16 + $0x110] sm:$0xff] }
 0x2f6   : >> { %2486 = vst [vmem:[%s4024_s28 + $0x100] sm:$0xff] %v2485_v8  ;;  %v2491_v12 = vld [vmem:[%s4028_s16 + $0x118] sm:$0xff]  ;;  %2488 = vst [vmem:[%s4024_s28 + $0x108] sm:$0xff] %v2487_v10  ;;  %v2493_v13 = vld [vmem:[%s4028_s16 + $0x120] sm:$0xff] }
 0x2f7   : >> { %2490 = vst [vmem:[%s4024_s28 + $0x110] sm:$0xff] %v2489_v11  ;;  %2492 = vst [vmem:[%s4024_s28 + $0x118] sm:$0xff] %v2491_v12  ;;  %v2495_v14 = vld [vmem:[%s4028_s16 + $0x128] sm:$0xff]  ;;  %v2497_v15 = vld [vmem:[%s4028_s16 + $0x130] sm:$0xff] }
 0x2f8   : >> { %2494 = vst [vmem:[%s4024_s28 + $0x120] sm:$0xff] %v2493_v13  ;;  %2496 = vst [vmem:[%s4024_s28 + $0x128] sm:$0xff] %v2495_v14  ;;  %v2499_v16 = vld [vmem:[%s4028_s16 + $0x138] sm:$0xff]  ;;  %v2501_v17 = vld [vmem:[%s4028_s16 + $0x140] sm:$0xff] }
 0x2f9   : >> { %2498 = vst [vmem:[%s4024_s28 + $0x130] sm:$0xff] %v2497_v15  ;;  %v2503_v18 = vld [vmem:[%s4028_s16 + $0x148] sm:$0xff]  ;;  %2500 = vst [vmem:[%s4024_s28 + $0x138] sm:$0xff] %v2499_v16  ;;  %v2505_v19 = vld [vmem:[%s4028_s16 + $0x150] sm:$0xff] }
 0x2fa   : >> { %2502 = vst [vmem:[%s4024_s28 + $0x140] sm:$0xff] %v2501_v17  ;;  %2504 = vst [vmem:[%s4024_s28 + $0x148] sm:$0xff] %v2503_v18  ;;  %v2507_v20 = vld [vmem:[%s4028_s16 + $0x158] sm:$0xff]  ;;  %v2509_v21 = vld [vmem:[%s4028_s16 + $0x160] sm:$0xff] }
 0x2fb   : >> { %2506 = vst [vmem:[%s4024_s28 + $0x150] sm:$0xff] %v2505_v19  ;;  %2508 = vst [vmem:[%s4024_s28 + $0x158] sm:$0xff] %v2507_v20  ;;  %v2511_v22 = vld [vmem:[%s4028_s16 + $0x168] sm:$0xff]  ;;  %v2513_v23 = vld [vmem:[%s4028_s16 + $0x170] sm:$0xff] }
 0x2fc   : >> { %2510 = vst [vmem:[%s4024_s28 + $0x160] sm:$0xff] %v2509_v21  ;;  %v2515_v1 = vld [vmem:[%s4028_s16 + $0x178] sm:$0xff]  ;;  %2512 = vst [vmem:[%s4024_s28 + $0x168] sm:$0xff] %v2511_v22  ;;  %v2517_v24 = vld [vmem:[%s4028_s16 + $0x180] sm:$0xff] }
 0x2fd   : >> { %2514 = vst [vmem:[%s4024_s28 + $0x170] sm:$0xff] %v2513_v23  ;;  %2516 = vst [vmem:[%s4024_s28 + $0x178] sm:$0xff] %v2515_v1  ;;  %v2519_v25 = vld [vmem:[%s4028_s16 + $0x188] sm:$0xff]  ;;  %v2521_v26 = vld [vmem:[%s4028_s16 + $0x190] sm:$0xff] }
 0x2fe   : >> { %2518 = vst [vmem:[%s4024_s28 + $0x180] sm:$0xff] %v2517_v24  ;;  %2520 = vst [vmem:[%s4024_s28 + $0x188] sm:$0xff] %v2519_v25  ;;  %v2523_v27 = vld [vmem:[%s4028_s16 + $0x198] sm:$0xff]  ;;  %v2525_v28 = vld [vmem:[%s4028_s16 + $0x1a0] sm:$0xff] }
 0x2ff   : >> { %2522 = vst [vmem:[%s4024_s28 + $0x190] sm:$0xff] %v2521_v26  ;;  %v2527_v29 = vld [vmem:[%s4028_s16 + $0x1a8] sm:$0xff]  ;;  %2524 = vst [vmem:[%s4024_s28 + $0x198] sm:$0xff] %v2523_v27  ;;  %v2529_v30 = vld [vmem:[%s4028_s16 + $0x1b0] sm:$0xff] }
 0x300   : >> { %2526 = vst [vmem:[%s4024_s28 + $0x1a0] sm:$0xff] %v2525_v28  ;;  %2528 = vst [vmem:[%s4024_s28 + $0x1a8] sm:$0xff] %v2527_v29  ;;  %v2531_v32 = vld [vmem:[%s4028_s16 + $0x1b8] sm:$0xff]  ;;  %v2533_v33 = vld [vmem:[%s4028_s16 + $0x1c0] sm:$0xff] }
 0x301   : >> { %2530 = vst [vmem:[%s4024_s28 + $0x1b0] sm:$0xff] %v2529_v30  ;;  %2532 = vst [vmem:[%s4024_s28 + $0x1b8] sm:$0xff] %v2531_v32  ;;  %v2535_v34 = vld [vmem:[%s4028_s16 + $0x1c8] sm:$0xff]  ;;  %v2537_v35 = vld [vmem:[%s4028_s16 + $0x1d0] sm:$0xff]  ;;  %2417 = sbr.rel (!%p2414_p9) target bundleno = 741 (0x2e5), region = 290 }
 0x302   : >> { %2534 = vst [vmem:[%s4024_s28 + $0x1c0] sm:$0xff] %v2533_v33  ;;  %v2539_v36 = vld [vmem:[%s4028_s16 + $0x1d8] sm:$0xff]  ;;  %2536 = vst [vmem:[%s4024_s28 + $0x1c8] sm:$0xff] %v2535_v34  ;;  %v2541_v37 = vld [vmem:[%s4028_s16 + $0x1e0] sm:$0xff] }
 0x303   : >> { %2538 = vst [vmem:[%s4024_s28 + $0x1d0] sm:$0xff] %v2537_v35  ;;  %2540 = vst [vmem:[%s4024_s28 + $0x1d8] sm:$0xff] %v2539_v36  ;;  %v2543_v38 = vld [vmem:[%s4028_s16 + $0x1e8] sm:$0xff]  ;;  %v2545_v39 = vld [vmem:[%s4028_s16 + $0x1f0] sm:$0xff] }
 0x304   : >> { %2542 = vst [vmem:[%s4024_s28 + $0x1e0] sm:$0xff] %v2541_v37  ;;  %2544 = vst [vmem:[%s4024_s28 + $0x1e8] sm:$0xff] %v2543_v38  ;;  %v2547_v40 = vld [vmem:[%s4028_s16 + $0x1f8] sm:$0xff]  ;;  %s5509_s16 = smov %s5146_s27 }
 0x305   : >> { %2546 = vst [vmem:[%s4024_s28 + $0x1f0] sm:$0xff] %v2545_v39  ;;  %2548 = vst [vmem:[%s4024_s28 + $0x1f8] sm:$0xff] %v2547_v40  ;;  %s5508_s28 = smov %s5149_s21 }
 0x306 PF: > { %s5255_s13 = sand.u32 63, %s2408_s6   ;;  %s3211_s30 = sshll.u32 %s5079_s10, 13 }
 0x307   : > { %s2560_s11 = sshra.s32 %s3211_s30, 4  ;;  %p3189_p10 = scmp.le.s32.totalorder %s5255_s13, 0 }
 0x308   : > { %s2561_s7 = scalar_lea.vmem %s5055_s15, %s2560_s11 [#allocation3]   ;;  %s2564_s20 = scalar_lea.vmem %s5065_s18, %s2560_s11  }
 0x309   : > { %2949 = sbr.rel (%p3189_p10) target bundleno = 790 (0x316), region = 295  ;;  %s4038_s9 = smov (!%p3189_p10), %s2564_s20  }
 0x30a   : > { %s4042_s12 = smov (!%p3189_p10), %s2561_s7   ;;  %s4046_s14 = smov (!%p3189_p10), 0  }
 0x30b   : > { %s4050_s8 = smov (!%p3189_p10), 0  }
 0x30e LB: >> { %v2576_v9 = vld [vmem:[%s4044_s12] sm:$0xff]  ;;  %s2578_s6 = sadd.s32 1, %s4048_s14  ;;  %s2570_s8 = sadd.s32 1, %s4052_s8   ;;  %s4052_s8 = sphi %s4050_s8, %s2570_s8   ;;  %s4048_s14 = sphi %s4046_s14, %s4047_s14   ;;  %s4044_s12 = sphi %s4042_s12, %s2583_s12   ;;  %s4040_s9 = sphi %s4038_s9, %s2584_s9  }
 0x30f   : >> { %2577 = vst [vmem:[%s4040_s9] sm:$0xff] %v2576_v9  ;;  %p2579_p11 = scmp.ge.s32.totalorder %s2578_s6, %s5255_s13  ;;  %p2569_p12 = scmp.ge.s32.totalorder %s2570_s8, %s5255_s13 }
 0x311   : >> { %s5534_s6 = smov (%p2579_p11, %s2578_s6), 0  ;;  %2572 = sbr.rel (!%p2569_p12) target bundleno = 782 (0x30e), region = 301 }
 0x312   : >> { %s3190_s10 = sshll.u32 %s5534_s6, 3  ;;  %s4047_s14 = smov %s5534_s6  }
 0x313   : >> { %s2583_s12 = scalar_lea.vmem %s2561_s7, %s3190_s10 [#allocation3]   ;;  %s2584_s9 = scalar_lea.vmem %s2564_s20, %s3190_s10  }
 0x316 PF: > { %2587 = sbr.rel (%p2404_p5) target bundleno = 854 (0x356), region = 151  ;;  %s5267_s28 = ssub.s32 (!%p2404_p5), %s5530_s23, %s5072_s26 }
 0x317   : > { %s2593_s16 = sshrl.u32 (!%p2404_p5), %s5530_s23, 3  ;;  %s2590_s29 = scalar_lea.vmem (!%p2404_p5), %s5055_s15, %s5267_s28 [#allocation3] }
 0x318   : > { %s2592_s17 = scalar_lea.vmem (!%p2404_p5), %s5065_s18, %s5267_s28  ;;  %s5276_s24 = sshrl.u32 (!%p2404_p5), %s2593_s16, 6 }
 0x319   : > { %p3192_p13 = scmp.le.s32.totalorder (!%p2404_p5), %s5276_s24, 0 }
 0x31b   : > { %2963 = sbr.rel (%p3192_p13) target bundleno = 833 (0x341), region = 306  ;;  %s5511_s27 = smov (!%p3192_p13), %s5065_s18 }
 0x31c   : > { %s5512_s21 = smov (!%p3192_p13), %s5055_s15  ;;  %s5285_s13 = smov (!%p3192_p13), 0  }
 0x31d   : > { %s5287_s30 = smov (!%p3192_p13), 0  }
 0x320 LB: >> { %v2606_v41 = vld [vmem:[%s4060_s21] sm:$0xff]  ;;  %v2608_v42 = vld [vmem:[%s4060_s21 + $0x8] sm:$0xff]  ;;  %v2610_v43 = vld [vmem:[%s4060_s21 + $0x10] sm:$0xff]  ;;  %s2734_s11 = sadd.s32 1, %s4064_s13  ;;  %s2600_s30 = sadd.s32 1, %s4068_s30   ;;  %s4068_s30 = sphi %s5287_s30, %s2600_s30   ;;  %s4064_s13 = sphi %s5285_s13, %s5515_s13   ;;  %s4060_s21 = sphi %s5512_s21, %s5514_s21   ;;  %s4056_s27 = sphi %s5511_s27, %s5513_s27  }
 0x321   : >> { %2607 = vst [vmem:[%s4056_s27] sm:$0xff] %v2606_v41  ;;  %2609 = vst [vmem:[%s4056_s27 + $0x8] sm:$0xff] %v2608_v42  ;;  %v2612_v44 = vld [vmem:[%s4060_s21 + $0x18] sm:$0xff]  ;;  %v2614_v45 = vld [vmem:[%s4060_s21 + $0x20] sm:$0xff]  ;;  %p2735_p0 = scmp.ge.s32.totalorder %s2734_s11, %s5276_s24  ;;  %p2599_p1 = scmp.ge.s32.totalorder %s2600_s30, %s5276_s24 }
 0x322   : >> { %2611 = vst [vmem:[%s4056_s27 + $0x10] sm:$0xff] %v2610_v43  ;;  %v2616_v46 = vld [vmem:[%s4060_s21 + $0x28] sm:$0xff]  ;;  %2613 = vst [vmem:[%s4056_s27 + $0x18] sm:$0xff] %v2612_v44  ;;  %v2618_v47 = vld [vmem:[%s4060_s21 + $0x30] sm:$0xff] }
 0x323   : >> { %2615 = vst [vmem:[%s4056_s27 + $0x20] sm:$0xff] %v2614_v45  ;;  %2617 = vst [vmem:[%s4056_s27 + $0x28] sm:$0xff] %v2616_v46  ;;  %v2620_v31 = vld [vmem:[%s4060_s21 + $0x38] sm:$0xff]  ;;  %v2622_v48 = vld [vmem:[%s4060_s21 + $0x40] sm:$0xff]  ;;  %s5536_s11 = smov (%p2735_p0, %s2734_s11), 0 }
 0x324   : >> { %2619 = vst [vmem:[%s4056_s27 + $0x30] sm:$0xff] %v2618_v47  ;;  %2621 = vst [vmem:[%s4056_s27 + $0x38] sm:$0xff] %v2620_v31  ;;  %v2624_v49 = vld [vmem:[%s4060_s21 + $0x48] sm:$0xff]  ;;  %v2626_v50 = vld [vmem:[%s4060_s21 + $0x50] sm:$0xff]  ;;  %s3193_s7 = sshll.u32 %s5536_s11, 9  ;;  %s5515_s13 = smov %s5536_s11 }
 0x325   : >> { %2623 = vst [vmem:[%s4056_s27 + $0x40] sm:$0xff] %v2622_v48  ;;  %v2628_v51 = vld [vmem:[%s4060_s21 + $0x58] sm:$0xff]  ;;  %2625 = vst [vmem:[%s4056_s27 + $0x48] sm:$0xff] %v2624_v49  ;;  %v2630_v52 = vld [vmem:[%s4060_s21 + $0x60] sm:$0xff]  ;;  %s5343_s20 = scalar_lea.vmem %s5055_s15, %s3193_s7 [#allocation3]   ;;  %s5346_s9 = scalar_lea.vmem %s5065_s18, %s3193_s7  }
 0x326   : >> { %2627 = vst [vmem:[%s4056_s27 + $0x50] sm:$0xff] %v2626_v50  ;;  %2629 = vst [vmem:[%s4056_s27 + $0x58] sm:$0xff] %v2628_v51  ;;  %v2632_v53 = vld [vmem:[%s4060_s21 + $0x68] sm:$0xff]  ;;  %v2634_v54 = vld [vmem:[%s4060_s21 + $0x70] sm:$0xff] }
 0x327   : >> { %2631 = vst [vmem:[%s4056_s27 + $0x60] sm:$0xff] %v2630_v52  ;;  %2633 = vst [vmem:[%s4056_s27 + $0x68] sm:$0xff] %v2632_v53  ;;  %v2636_v55 = vld [vmem:[%s4060_s21 + $0x78] sm:$0xff]  ;;  %v2638_v56 = vld [vmem:[%s4060_s21 + $0x80] sm:$0xff] }
 0x328   : >> { %2635 = vst [vmem:[%s4056_s27 + $0x70] sm:$0xff] %v2634_v54  ;;  %v2640_v57 = vld [vmem:[%s4060_s21 + $0x88] sm:$0xff]  ;;  %2637 = vst [vmem:[%s4056_s27 + $0x78] sm:$0xff] %v2636_v55  ;;  %v2642_v58 = vld [vmem:[%s4060_s21 + $0x90] sm:$0xff] }
 0x329   : >> { %2639 = vst [vmem:[%s4056_s27 + $0x80] sm:$0xff] %v2638_v56  ;;  %2641 = vst [vmem:[%s4056_s27 + $0x88] sm:$0xff] %v2640_v57  ;;  %v2644_v59 = vld [vmem:[%s4060_s21 + $0x98] sm:$0xff]  ;;  %v2646_v60 = vld [vmem:[%s4060_s21 + $0xa0] sm:$0xff] }
 0x32a   : >> { %2643 = vst [vmem:[%s4056_s27 + $0x90] sm:$0xff] %v2642_v58  ;;  %2645 = vst [vmem:[%s4056_s27 + $0x98] sm:$0xff] %v2644_v59  ;;  %v2648_v61 = vld [vmem:[%s4060_s21 + $0xa8] sm:$0xff]  ;;  %v2650_v62 = vld [vmem:[%s4060_s21 + $0xb0] sm:$0xff] }
 0x32b   : >> { %2647 = vst [vmem:[%s4056_s27 + $0xa0] sm:$0xff] %v2646_v60  ;;  %v2652_v63 = vld [vmem:[%s4060_s21 + $0xb8] sm:$0xff]  ;;  %2649 = vst [vmem:[%s4056_s27 + $0xa8] sm:$0xff] %v2648_v61  ;;  %v2654_v0 = vld [vmem:[%s4060_s21 + $0xc0] sm:$0xff] }
 0x32c   : >> { %2651 = vst [vmem:[%s4056_s27 + $0xb0] sm:$0xff] %v2650_v62  ;;  %2653 = vst [vmem:[%s4056_s27 + $0xb8] sm:$0xff] %v2652_v63  ;;  %v2656_v2 = vld [vmem:[%s4060_s21 + $0xc8] sm:$0xff]  ;;  %v2658_v3 = vld [vmem:[%s4060_s21 + $0xd0] sm:$0xff] }
 0x32d   : >> { %2655 = vst [vmem:[%s4056_s27 + $0xc0] sm:$0xff] %v2654_v0  ;;  %2657 = vst [vmem:[%s4056_s27 + $0xc8] sm:$0xff] %v2656_v2  ;;  %v2660_v4 = vld [vmem:[%s4060_s21 + $0xd8] sm:$0xff]  ;;  %v2662_v5 = vld [vmem:[%s4060_s21 + $0xe0] sm:$0xff] }
 0x32e   : >> { %2659 = vst [vmem:[%s4056_s27 + $0xd0] sm:$0xff] %v2658_v3  ;;  %v2664_v6 = vld [vmem:[%s4060_s21 + $0xe8] sm:$0xff]  ;;  %2661 = vst [vmem:[%s4056_s27 + $0xd8] sm:$0xff] %v2660_v4  ;;  %v2666_v7 = vld [vmem:[%s4060_s21 + $0xf0] sm:$0xff] }
 0x32f   : >> { %2663 = vst [vmem:[%s4056_s27 + $0xe0] sm:$0xff] %v2662_v5  ;;  %2665 = vst [vmem:[%s4056_s27 + $0xe8] sm:$0xff] %v2664_v6  ;;  %v2668_v8 = vld [vmem:[%s4060_s21 + $0xf8] sm:$0xff]  ;;  %v2670_v10 = vld [vmem:[%s4060_s21 + $0x100] sm:$0xff] }
 0x330   : >> { %2667 = vst [vmem:[%s4056_s27 + $0xf0] sm:$0xff] %v2666_v7  ;;  %2669 = vst [vmem:[%s4056_s27 + $0xf8] sm:$0xff] %v2668_v8  ;;  %v2672_v11 = vld [vmem:[%s4060_s21 + $0x108] sm:$0xff]  ;;  %v2674_v12 = vld [vmem:[%s4060_s21 + $0x110] sm:$0xff] }
 0x331   : >> { %2671 = vst [vmem:[%s4056_s27 + $0x100] sm:$0xff] %v2670_v10  ;;  %v2676_v13 = vld [vmem:[%s4060_s21 + $0x118] sm:$0xff]  ;;  %2673 = vst [vmem:[%s4056_s27 + $0x108] sm:$0xff] %v2672_v11  ;;  %v2678_v14 = vld [vmem:[%s4060_s21 + $0x120] sm:$0xff] }
 0x332   : >> { %2675 = vst [vmem:[%s4056_s27 + $0x110] sm:$0xff] %v2674_v12  ;;  %2677 = vst [vmem:[%s4056_s27 + $0x118] sm:$0xff] %v2676_v13  ;;  %v2680_v15 = vld [vmem:[%s4060_s21 + $0x128] sm:$0xff]  ;;  %v2682_v16 = vld [vmem:[%s4060_s21 + $0x130] sm:$0xff] }
 0x333   : >> { %2679 = vst [vmem:[%s4056_s27 + $0x120] sm:$0xff] %v2678_v14  ;;  %2681 = vst [vmem:[%s4056_s27 + $0x128] sm:$0xff] %v2680_v15  ;;  %v2684_v17 = vld [vmem:[%s4060_s21 + $0x138] sm:$0xff]  ;;  %v2686_v18 = vld [vmem:[%s4060_s21 + $0x140] sm:$0xff] }
 0x334   : >> { %2683 = vst [vmem:[%s4056_s27 + $0x130] sm:$0xff] %v2682_v16  ;;  %v2688_v19 = vld [vmem:[%s4060_s21 + $0x148] sm:$0xff]  ;;  %2685 = vst [vmem:[%s4056_s27 + $0x138] sm:$0xff] %v2684_v17  ;;  %v2690_v20 = vld [vmem:[%s4060_s21 + $0x150] sm:$0xff] }
 0x335   : >> { %2687 = vst [vmem:[%s4056_s27 + $0x140] sm:$0xff] %v2686_v18  ;;  %2689 = vst [vmem:[%s4056_s27 + $0x148] sm:$0xff] %v2688_v19  ;;  %v2692_v21 = vld [vmem:[%s4060_s21 + $0x158] sm:$0xff]  ;;  %v2694_v22 = vld [vmem:[%s4060_s21 + $0x160] sm:$0xff] }
 0x336   : >> { %2691 = vst [vmem:[%s4056_s27 + $0x150] sm:$0xff] %v2690_v20  ;;  %2693 = vst [vmem:[%s4056_s27 + $0x158] sm:$0xff] %v2692_v21  ;;  %v2696_v23 = vld [vmem:[%s4060_s21 + $0x168] sm:$0xff]  ;;  %v2698_v1 = vld [vmem:[%s4060_s21 + $0x170] sm:$0xff] }
 0x337   : >> { %2695 = vst [vmem:[%s4056_s27 + $0x160] sm:$0xff] %v2694_v22  ;;  %v2700_v24 = vld [vmem:[%s4060_s21 + $0x178] sm:$0xff]  ;;  %2697 = vst [vmem:[%s4056_s27 + $0x168] sm:$0xff] %v2696_v23  ;;  %v2702_v25 = vld [vmem:[%s4060_s21 + $0x180] sm:$0xff] }
 0x338   : >> { %2699 = vst [vmem:[%s4056_s27 + $0x170] sm:$0xff] %v2698_v1  ;;  %2701 = vst [vmem:[%s4056_s27 + $0x178] sm:$0xff] %v2700_v24  ;;  %v2704_v26 = vld [vmem:[%s4060_s21 + $0x188] sm:$0xff]  ;;  %v2706_v27 = vld [vmem:[%s4060_s21 + $0x190] sm:$0xff] }
 0x339   : >> { %2703 = vst [vmem:[%s4056_s27 + $0x180] sm:$0xff] %v2702_v25  ;;  %2705 = vst [vmem:[%s4056_s27 + $0x188] sm:$0xff] %v2704_v26  ;;  %v2708_v28 = vld [vmem:[%s4060_s21 + $0x198] sm:$0xff]  ;;  %v2710_v29 = vld [vmem:[%s4060_s21 + $0x1a0] sm:$0xff] }
 0x33a   : >> { %2707 = vst [vmem:[%s4056_s27 + $0x190] sm:$0xff] %v2706_v27  ;;  %v2712_v30 = vld [vmem:[%s4060_s21 + $0x1a8] sm:$0xff]  ;;  %2709 = vst [vmem:[%s4056_s27 + $0x198] sm:$0xff] %v2708_v28  ;;  %v2714_v32 = vld [vmem:[%s4060_s21 + $0x1b0] sm:$0xff] }
 0x33b   : >> { %2711 = vst [vmem:[%s4056_s27 + $0x1a0] sm:$0xff] %v2710_v29  ;;  %2713 = vst [vmem:[%s4056_s27 + $0x1a8] sm:$0xff] %v2712_v30  ;;  %v2716_v33 = vld [vmem:[%s4060_s21 + $0x1b8] sm:$0xff]  ;;  %v2718_v34 = vld [vmem:[%s4060_s21 + $0x1c0] sm:$0xff] }
 0x33c   : >> { %2715 = vst [vmem:[%s4056_s27 + $0x1b0] sm:$0xff] %v2714_v32  ;;  %2717 = vst [vmem:[%s4056_s27 + $0x1b8] sm:$0xff] %v2716_v33  ;;  %v2720_v35 = vld [vmem:[%s4060_s21 + $0x1c8] sm:$0xff]  ;;  %v2722_v36 = vld [vmem:[%s4060_s21 + $0x1d0] sm:$0xff]  ;;  %2602 = sbr.rel (!%p2599_p1) target bundleno = 800 (0x320), region = 312 }
 0x33d   : >> { %2719 = vst [vmem:[%s4056_s27 + $0x1c0] sm:$0xff] %v2718_v34  ;;  %v2724_v37 = vld [vmem:[%s4060_s21 + $0x1d8] sm:$0xff]  ;;  %2721 = vst [vmem:[%s4056_s27 + $0x1c8] sm:$0xff] %v2720_v35  ;;  %v2726_v38 = vld [vmem:[%s4060_s21 + $0x1e0] sm:$0xff] }
 0x33e   : >> { %2723 = vst [vmem:[%s4056_s27 + $0x1d0] sm:$0xff] %v2722_v36  ;;  %2725 = vst [vmem:[%s4056_s27 + $0x1d8] sm:$0xff] %v2724_v37  ;;  %v2728_v39 = vld [vmem:[%s4060_s21 + $0x1e8] sm:$0xff]  ;;  %v2730_v40 = vld [vmem:[%s4060_s21 + $0x1f0] sm:$0xff] }
 0x33f   : >> { %2727 = vst [vmem:[%s4056_s27 + $0x1e0] sm:$0xff] %v2726_v38  ;;  %2729 = vst [vmem:[%s4056_s27 + $0x1e8] sm:$0xff] %v2728_v39  ;;  %v2732_v9 = vld [vmem:[%s4060_s21 + $0x1f8] sm:$0xff]  ;;  %s5514_s21 = smov %s5343_s20 }
 0x340   : >> { %2731 = vst [vmem:[%s4056_s27 + $0x1f0] sm:$0xff] %v2730_v40  ;;  %2733 = vst [vmem:[%s4056_s27 + $0x1f8] sm:$0xff] %v2732_v9  ;;  %s5513_s27 = smov %s5346_s9 }
 0x341 PF: > { %s5452_s12 = sand.u32 63, %s2593_s16   ;;  %s3213_s14 = sshll.u32 %s5276_s24, 13 }
 0x342   : > { %s2745_s8 = sshra.s32 %s3213_s14, 4  ;;  %p3198_p2 = scmp.le.s32.totalorder %s5452_s12, 0 }
 0x343   : > { %s2746_s6 = scalar_lea.vmem %s5055_s15, %s2745_s8 [#allocation3]   ;;  %s2749_s10 = scalar_lea.vmem %s5065_s18, %s2745_s8  }
 0x344   : > { %2977 = sbr.rel (%p3198_p2) target bundleno = 849 (0x351), region = 317  ;;  %s4070_s7 = smov (!%p3198_p2), %s2749_s10  }
 0x345   : > { %s4074_s11 = smov (!%p3198_p2), %s2746_s6   ;;  %s4078_s20 = smov (!%p3198_p2), 0  }
 0x346   : > { %s4082_s30 = smov (!%p3198_p2), 0  }
 0x349 LB: >> { %v2761_v41 = vld [vmem:[%s4076_s11] sm:$0xff]  ;;  %s2763_s16 = sadd.s32 1, %s4080_s20  ;;  %s2755_s30 = sadd.s32 1, %s4084_s30   ;;  %s4084_s30 = sphi %s4082_s30, %s2755_s30   ;;  %s4080_s20 = sphi %s4078_s20, %s4079_s20   ;;  %s4076_s11 = sphi %s4074_s11, %s2768_s11   ;;  %s4072_s7 = sphi %s4070_s7, %s2769_s7  }
 0x34a   : >> { %2762 = vst [vmem:[%s4072_s7] sm:$0xff] %v2761_v41  ;;  %p2764_p3 = scmp.ge.s32.totalorder %s2763_s16, %s5452_s12  ;;  %p2754_p4 = scmp.ge.s32.totalorder %s2755_s30, %s5452_s12 }
 0x34c   : >> { %s5538_s16 = smov (%p2764_p3, %s2763_s16), 0  ;;  %2757 = sbr.rel (!%p2754_p4) target bundleno = 841 (0x349), region = 323 }
 0x34d   : >> { %s3199_s24 = sshll.u32 %s5538_s16, 3  ;;  %s4079_s20 = smov %s5538_s16  }
 0x34e   : >> { %s2768_s11 = scalar_lea.vmem %s2746_s6, %s3199_s24 [#allocation3]   ;;  %s2769_s7 = scalar_lea.vmem %s2749_s10, %s3199_s24  }
 0x351 PF: > { %s4092_s27 = smov 1  }
 0x352   : > { %s2770_s21 = sshll.u32 %s4092_s27, %s5072_s26 }
 0x353   : > { %s3201_s13 = sadd.s32 4294967295, %s2770_s21 }
 0x354   : > { %v2780_v42 = vld [vmem:[%s2590_s29] sm:%s3201_s13] }
 0x355   : > { %2781 = vst [vmem:[%s2592_s17] sm:%s3201_s13] %v2780_v42 }
 0x356 PF: > { %p3202_p5 = scmp.ge.u32.totalorder %s5530_s23, 8 }
 0x357   : > { %s4093_s9 = smov (!%p3202_p5), 1  }
 0x358   : > { %2390 = sbr.rel (%p3202_p5) target bundleno = 863 (0x35f), region = 122  ;;  %s2391_s12 = sshll.u32 (!%p3202_p5), %s4093_s9, %s5530_s23 }
 0x359   : > { %s3203_s14 = sadd.s32 (!%p3202_p5), 4294967295, %s2391_s12 }
 0x35d   : > { %v2401_v43 = vld [vmem:[%s5055_s15] sm:%s3203_s14] }
 0x35e   : > { %2402 = vst [vmem:[%s5065_s18] sm:%s3203_s14] %v2401_v43 }
 0x35f PF: > { %p12_p6 = scmp.ge.s32.totalorder %s4141_s22, 4   ;;  %s5516_s18 = smov %s3952_s19 }
 0x360   : > { %s5517_s19 = smov %s4152_s25  ;;  %s5518_s20 = smov %s4141_s22 }
 0x361   :  { %14 = sbr.rel (!%p12_p6) target bundleno = 2 (0x2), region = 334 }

// kernel: autoencoder_forward.6
= control target key start
LH: loop header
LB: loop body
LE: loop exit
PB: predicated region body
PF: predicated region fallthrough
CT: control target
= control target key end

     0   :  { %s954_s12 = smov 0   ;;  %s956_s13 = smov 0   ;;  %s1097_s0 = inlined_call_operand.vmem [shape: bf16[98,128], index: 0, kind: input, shape index: {}]   ;;  %s1098_s1 = inlined_call_operand.vmem [shape: bf16[128,64], index: 1, kind: input, shape index: {}]   ;;  %s1099_s2 = inlined_call_operand.vmem [shape: f32[1,64], index: 2, kind: input, shape index: {}]   ;;  %s1100_s3 = inlined_call_operand.vmem [shape: bf16[98,64], index: 3, kind: output, shape index: {}]  }
   0x1   :  { %s958_s14 = smov 0  }
   0x2 LB: > { %s967_s15 = sadd.s32 4294967295, %s900_s14   ;;  %s969_s16 = sadd.s32 1, %s900_s14   ;;  %s900_s14 = sphi %s958_s14, %s1107_s14   ;;  %s896_s13 = sphi %s956_s13, %s1106_s13   ;;  %s892_s12 = sphi %s954_s12, %s1105_s12  }
   0x3   : > { %s85_s17 = ssub.s32 %s900_s14, %s969_s16  ;;  %s88_s18 = sadd.s32 1, %s896_s13 }
   0x4   : > { %p86_p0 = scmp.eq.s32.totalorder %s85_s17, 0  ;;  %p98_p1 = scmp.ne.s32.totalorder %s896_s13, %s892_s12 }
   0x5   : > { %p99_p2 = scmp.eq.s32.totalorder %s967_s15, 1  ;;  %p646_p3 = scmp.ge.s32.totalorder %s900_s14, 1 }
   0x6   : > { %s977_s19 = scalar_select %p86_p0, %s896_s13, %s88_s18  }
   0x7   : > { %p979_p4 = por %p99_p2, %p98_p1  ;;  %p146_p5 = scmp.lt.s32.totalorder %s900_s14, 3 }
   0x9   : > { %p147_p6 = pnand %p646_p3, %p146_p5 }
   0xa   : > { %s987_s23 = smul.u32 (!%p147_p6), 7, %s967_s15  ;;  %s170_s22 = sand.u32 (!%p147_p6), 1, %s892_s12  }
   0xb   : > { %150 = sbr.rel (%p147_p6) target bundleno = 314 (0x13a), region = 32 }
   0xc   : > { %p178_p7 = scmp.lt.s32.totalorder (!%p147_p6), %s987_s23, 12  ;;  %s740_s26 = smul.u32 (!%p147_p6), 28, %s170_s22 }
   0xe   : > { %s1025_s12 = scalar_lea.vmem (!%p147_p6), [#allocation2], %s740_s26  }
  0x10   : > { %v830_v0 = vld [vmem:[%s1098_s1 + $0x38] sm:$0xff]   ;;  %v831_v1 = vld [vmem:[%s1098_s1 + $0x30] sm:$0xff]   ;;  %v832_v2 = vld [vmem:[%s1098_s1 + $0x28] sm:$0xff]   ;;  %s179_s28 = scalar_select %p178_p7, %s987_s23, 12  ;;  %vm393_vm0 = vcmask 519168  }
  0x11   : > { %700 = vmatprep.subr.bf16.mxu0 %v830_v0  ;;  %724 = vmatprep.subr.bf16.mxu1 %v830_v0  ;;  %v833_v3 = vld [vmem:[%s1098_s1 + $0x20] sm:$0xff]   ;;  %v834_v6 = vld [vmem:[%s1098_s1 + $0x18] sm:$0xff]   ;;  %v835_v7 = vld [vmem:[%s1098_s1 + $0x10] sm:$0xff]   ;;  %s409_s27 = ssub.s32 (%p979_p4), 13, %s987_s23 }
  0x12   : > { %701 = vmatpush3.bf16.msra.mxu0 %v830_v0  ;;  %732 = vmatpush3.bf16.msra.mxu1 %v830_v0  ;;  %s647_s29 = sshll.u32 %s179_s28, 2  ;;  %v836_v8 = vld [vmem:[%s1098_s1 + $0x8] sm:$0xff]   ;;  %v837_v9 = vld [vmem:[%s1098_s1] sm:$0xff]   ;;  %s687_s28 = smul.u32 (%p979_p4), 28, %s967_s15 }
  0x13   : > { %702 = vmatprep.subr.bf16.mxu0 %v831_v1  ;;  %725 = vmatprep.subr.bf16.mxu1 %v831_v1  ;;  %s1003_s7 = scalar_lea.vmem %s1097_s0, %s647_s29  ;;  %v648_v12 = vld [vmem:[%s1099_s2] ss:$0 sm:$0xff]  ;;  %p410_p8 = scmp.lt.s32.totalorder (%p979_p4), %s409_s27, 7 }
  0x14   : > { %v838_v4 = vld [vmem:[%s1003_s7] sm:$0xff]   ;;  %v839_v5 = vld [vmem:[%s1003_s7 + $0x10] sm:$0xff]   ;;  %v840_v10 = vld [vmem:[%s1003_s7 + $0x8] sm:$0xff]   ;;  %s1048_s4 = scalar_lea.vmem (%p979_p4), %s1100_s3, %s687_s28  }
  0x15   : > { %716 = vmatprep.mubr.bf16.mxu0 %v838_v4  ;;  %720 = vmatprep.mubr.bf16.mxu1 %v839_v5  ;;  %v841_v11 = vld [vmem:[%s1003_s7 + $0x18] ss:$0 sps:$4 sm:$0xff]  }
  0x16   : > { %703 = vmatpush3.bf16.msra.mxu0 %v831_v1  ;;  %733 = vmatpush3.bf16.msra.mxu1 %v831_v1 }
  0x17   : > { %704 = vmatprep.subr.bf16.mxu0 %v832_v2  ;;  %726 = vmatprep.subr.bf16.mxu1 %v832_v2 }
  0x1a   : > { %705 = vmatpush3.bf16.msra.mxu0 %v832_v2  ;;  %734 = vmatpush3.bf16.msra.mxu1 %v832_v2 }
  0x1b   : > { %706 = vmatprep.subr.bf16.mxu0 %v833_v3  ;;  %727 = vmatprep.subr.bf16.mxu1 %v833_v3 }
  0x1e   : > { %707 = vmatpush3.bf16.msra.mxu0 %v833_v3  ;;  %735 = vmatpush3.bf16.msra.mxu1 %v833_v3 }
  0x1f   : > { %708 = vmatprep.subr.bf16.mxu0 %v834_v6  ;;  %728 = vmatprep.subr.bf16.mxu1 %v834_v6 }
  0x22   : > { %709 = vmatpush3.bf16.msra.mxu0 %v834_v6  ;;  %736 = vmatpush3.bf16.msra.mxu1 %v834_v6 }
  0x23   : > { %710 = vmatprep.subr.bf16.mxu0 %v835_v7  ;;  %729 = vmatprep.subr.bf16.mxu1 %v835_v7 }
  0x26   : > { %711 = vmatpush3.bf16.msra.mxu0 %v835_v7  ;;  %737 = vmatpush3.bf16.msra.mxu1 %v835_v7 }
  0x27   : > { %712 = vmatprep.subr.bf16.mxu0 %v836_v8  ;;  %730 = vmatprep.subr.bf16.mxu1 %v836_v8 }
  0x2a   : > { %713 = vmatpush3.bf16.msra.mxu0 %v836_v8  ;;  %738 = vmatpush3.bf16.msra.mxu1 %v836_v8 }
  0x2b   : > { %714 = vmatprep.subr.bf16.mxu0 %v837_v9  ;;  %731 = vmatprep.subr.bf16.mxu1 %v837_v9 }
  0x2e   : > { %715 = vmatpush3.bf16.msra.mxu0 %v837_v9  ;;  %739 = vmatpush3.bf16.msra.mxu1 %v837_v9 }
  0x31   : > { %717 = vmatmul.mubr.bf16.vlgmr.msra.gmra.mxu0 %v840_v10  ;;  %721 = vmatmul.mubr.bf16.vlgmr.msra.gmra.mxu1 %v841_v11 }
  0xf1   : > { %v718_v13 = vpop.f32.mrf.mxu0  ;;  %v722_v14 = vpop.f32.mrf.mxu1 }
  0xf2   : > { %v336_v15 = vadd.f32 %v718_v13, %v648_v12  ;;  %v352_v16 = vadd.f32 %v722_v14, %v648_v12 }
  0xf3   : > { %v327_v17 = vpop.f32.mrf.mxu0  ;;  %v343_v18 = vpop.f32.mrf.mxu1 }
  0xf4   : > { %v359_v19 = vmax.f32 %v336_v15, 0.0  ;;  %v363_v20 = vmax.f32 %v352_v16, 0.0  ;;  %v328_v21 = vadd.f32 %v648_v12, %v327_v17  ;;  %v344_v22 = vadd.f32 %v648_v12, %v343_v18 }
  0xf5   : > { %v719_v23 = vpop.f32.mrf.mxu0  ;;  %v723_v24 = vpop.f32.mrf.mxu1 }
  0xf6   : > { %v682_v25 = vpack.c.bf16 %v359_v19, %v359_v19  ;;  %v686_v26 = vpack.c.bf16 %v363_v20, %v363_v20  ;;  %v357_v27 = vmax.f32 %v328_v21, 0.0  ;;  %v361_v28 = vmax.f32 %v344_v22, 0.0 }
  0xf7   : > { %v339_v29 = vadd.f32 %v719_v23, %v648_v12  ;;  %v330_v30 = vpop.f32.mrf.mxu0  ;;  %v346_v31 = vpop.f32.mrf.mxu1 }
  0xf8   : > { %396 = vst.msk [vmem:[%s1025_s12 + $0x8] sm:$0xf] %vm393_vm0, %v682_v25  ;;  %400 = vst.msk [vmem:[%s1025_s12 + $0x18] sm:$0xf] %vm393_vm0, %v686_v26  ;;  %v680_v32 = vpack.c.bf16 %v357_v27, %v357_v27  ;;  %v684_v33 = vpack.c.bf16 %v361_v28, %v361_v28  ;;  %v331_v34 = vadd.f32 %v648_v12, %v330_v30 }
  0xf9   : > { %v347_v35 = vadd.f32 %v648_v12, %v346_v31  ;;  %v360_v36 = vmax.f32 %v339_v29, 0.0 }
  0xfa   : > { %394 = vst.msk [vmem:[%s1025_s12] sm:$0xf] %vm393_vm0, %v680_v32  ;;  %398 = vst.msk [vmem:[%s1025_s12 + $0x10] sm:$0xf] %vm393_vm0, %v684_v33  ;;  %v358_v37 = vmax.f32 %v331_v34, 0.0 }
  0xfb   : > { %v362_v38 = vmax.f32 %v347_v35, 0.0  ;;  %v683_v39 = vpack.c.bf16 %v360_v36, %v360_v36  ;;  %407 = sbr.rel (!%p979_p4) target bundleno = 314 (0x13a), region = 36 }
  0xfc   : > { %v681_v40 = vpack.c.bf16 %v358_v37, %v358_v37 }
  0xfd   : > { %v685_v41 = vpack.c.bf16 %v362_v38, %v362_v38  ;;  %397 = vst.msk [vmem:[%s1025_s12 + $0xc] sm:$0xf] %vm393_vm0, %v683_v39 }
  0xfe   : > { %395 = vst.msk [vmem:[%s1025_s12 + $0x4] sm:$0xf] %vm393_vm0, %v681_v40 }
  0xff   : > { %399 = vst.msk [vmem:[%s1025_s12 + $0x14] sm:$0xf] %vm393_vm0, %v685_v41 }
 0x100   : > { %s1109_s27 = smov (!%p410_p8, %s409_s27), 7 }
 0x101   : > { %s668_s5 = sshll.u32 %s1109_s27, 6 }
 0x102   : > { %p671_p9 = scmp.eq.s32.totalorder %s668_s5, 0 }
 0x103   : > { %842 = sdivrem.u32 (!%p671_p9), %s1109_s27, 7 }
 0x104   : > { %418 = sbr.rel (%p671_p9) target bundleno = 314 (0x13a), region = 40 }
 0x10c   : > { %s1054_s20 = spop.drf %842 }
 0x10d   : > { %p672_p10 = scmp.le.s32.totalorder %s1054_s20, 0 }
 0x10e   : > { %s1102_s15 = smov (!%p672_p10), %s1048_s4  ;;  %s1103_s23 = smov (!%p672_p10), %s1025_s12 }
 0x10f   : > { %599 = sbr.rel (%p672_p10) target bundleno = 289 (0x121), region = 112  ;;  %s1063_s6 = smov (!%p672_p10), 0  }
 0x110   : > { %s1065_s7 = smov (!%p672_p10), 0  }
 0x114 LB: >> { %v436_v42 = vld [vmem:[%s908_s23] sm:$0xf]  ;;  %v438_v43 = vld [vmem:[%s908_s23 + $0x4] sm:$0xf]  ;;  %v440_v44 = vld [vmem:[%s908_s23 + $0x8] sm:$0xf]  ;;  %s916_s7 = sphi %s1065_s7, %s430_s7   ;;  %s912_s6 = sphi %s1063_s6, %s1104_s6   ;;  %s908_s23 = sphi %s1103_s23, %s455_s23   ;;  %s904_s15 = sphi %s1102_s15, %s456_s15  }
 0x115   : >> { %437 = vst [vmem:[%s904_s15] sm:$0xf] %v436_v42  ;;  %439 = vst [vmem:[%s904_s15 + $0x4] sm:$0xf] %v438_v43  ;;  %v442_v45 = vld [vmem:[%s908_s23 + $0xc] sm:$0xf]  ;;  %s450_s8 = sadd.s32 1, %s912_s6 }
 0x116   : >> { %441 = vst [vmem:[%s904_s15 + $0x8] sm:$0xf] %v440_v44  ;;  %v444_v46 = vld [vmem:[%s908_s23 + $0x10] sm:$0xf]  ;;  %v446_v47 = vld [vmem:[%s908_s23 + $0x14] sm:$0xf]  ;;  %p451_p11 = scmp.ge.s32.totalorder %s450_s8, %s1054_s20 }
 0x117   : >> { %443 = vst [vmem:[%s904_s15 + $0xc] sm:$0xf] %v442_v45  ;;  %445 = vst [vmem:[%s904_s15 + $0x10] sm:$0xf] %v444_v46  ;;  %v448_v48 = vld [vmem:[%s908_s23 + $0x18] sm:$0xf] }
 0x118   : >> { %447 = vst [vmem:[%s904_s15 + $0x14] sm:$0xf] %v446_v47  ;;  %449 = vst [vmem:[%s904_s15 + $0x18] sm:$0xf] %v448_v48  ;;  %s1111_s8 = smov (%p451_p11, %s450_s8), 0  ;;  %s430_s7 = sadd.s32 1, %s916_s7  }
 0x119   : >> { %s453_s9 = smul.u32 28, %s1111_s8  ;;  %p429_p12 = scmp.ge.s32.totalorder %s430_s7, %s1054_s20 }
 0x11a   : >> { %s1104_s6 = smov %s1111_s8 }
 0x11b   : >> { %s455_s23 = scalar_lea.vmem %s1025_s12, %s453_s9 [#allocation2]   ;;  %s456_s15 = scalar_lea.vmem %s1048_s4, %s453_s9  }
 0x11c   : > { %432 = sbr.rel (!%p429_p12) target bundleno = 276 (0x114), region = 118 }
 0x121 PF: > { %844 = sdivrem.u32 %s1109_s27, 7 }
 0x122   : > { %s673_s10 = smul.u32 28, %s1054_s20 }
 0x124   : > { %s461_s11 = scalar_lea.vmem %s1025_s12, %s673_s10 [#allocation2]   ;;  %s463_s14 = scalar_lea.vmem %s1048_s4, %s673_s10  }
 0x12a   : > { %s845_s17 = spop.drf %844 }
 0x12b   : > { %p675_p13 = scmp.le.s32.totalorder %s845_s17, 0 }
 0x12c   : > { %s918_s18 = smov (!%p675_p13), %s463_s14   ;;  %s922_s21 = smov (!%p675_p13), %s461_s11  }
 0x12d   : > { %613 = sbr.rel (%p675_p13) target bundleno = 314 (0x13a), region = 123  ;;  %s926_s22 = smov (!%p675_p13), 0  }
 0x12e   : > { %s930_s24 = smov (!%p675_p13), 0  }
 0x132 LB: >> { %v473_v49 = vld [vmem:[%s924_s21] sm:$0xf]  ;;  %s475_s25 = sadd.s32 1, %s928_s22  ;;  %s467_s24 = sadd.s32 1, %s932_s24   ;;  %s932_s24 = sphi %s930_s24, %s467_s24   ;;  %s928_s22 = sphi %s926_s22, %s927_s22   ;;  %s924_s21 = sphi %s922_s21, %s480_s21   ;;  %s920_s18 = sphi %s918_s18, %s481_s18  }
 0x133   : >> { %474 = vst [vmem:[%s920_s18] sm:$0xf] %v473_v49  ;;  %p476_p0 = scmp.ge.s32.totalorder %s475_s25, %s845_s17  ;;  %p466_p1 = scmp.ge.s32.totalorder %s467_s24, %s845_s17 }
 0x135   : >> { %s1113_s25 = smov (%p476_p0, %s475_s25), 0  ;;  %469 = sbr.rel (!%p466_p1) target bundleno = 306 (0x132), region = 129 }
 0x136   : >> { %s676_s26 = sshll.u32 %s1113_s25, 2  ;;  %s927_s22 = smov %s1113_s25  }
 0x137   : >> { %s480_s21 = scalar_lea.vmem %s461_s11, %s676_s26 [#allocation2]   ;;  %s481_s18 = scalar_lea.vmem %s463_s14, %s676_s26  }
 0x13a PF: > { %p10_p2 = scmp.ge.s32.totalorder %s969_s16, 4   ;;  %s1105_s12 = smov %s896_s13 }
 0x13b   : > { %s1106_s13 = smov %s977_s19  ;;  %s1107_s14 = smov %s969_s16 }
 0x13c   :  { %12 = sbr.rel (!%p10_p2) target bundleno = 2 (0x2), region = 140 }

// kernel: autoencoder_forward.7
= control target key start
LH: loop header
LB: loop body
LE: loop exit
PB: predicated region body
PF: predicated region fallthrough
CT: control target
= control target key end

     0   :  { %s523_s12 = smov 0   ;;  %s525_s13 = smov 0   ;;  %s581_s0 = inlined_call_operand.vmem [shape: bf16[4,64], index: 0, kind: input, shape index: {}]   ;;  %s582_s1 = inlined_call_operand.vmem [shape: bf16[64,392], index: 1, kind: input, shape index: {}]   ;;  %s583_s2 = inlined_call_operand.vmem [shape: f32[4,1], index: 2, kind: input, shape index: {}]   ;;  %s584_s3 = inlined_call_operand.vmem [shape: f32[4,392], index: 3, kind: output, shape index: {}]  }
   0x1   :  { %s527_s14 = smov 0  }
   0x2 LB: > { %s413_s15 = sadd.s32 4294967295, %s500_s14   ;;  %s540_s16 = sadd.s32 1, %s500_s14   ;;  %s500_s14 = sphi %s527_s14, %s587_s14   ;;  %s496_s13 = sphi %s525_s13, %s586_s13   ;;  %s492_s12 = sphi %s523_s12, %s585_s12  }
   0x3   : > { %s38_s17 = ssub.s32 %s500_s14, %s540_s16  ;;  %s41_s18 = sadd.s32 1, %s496_s13 }
   0x4   : > { %p39_p0 = scmp.eq.s32.totalorder %s38_s17, 0  ;;  %p48_p1 = scmp.ne.s32.totalorder %s496_s13, %s492_s12 }
   0x5   : > { %p49_p2 = scmp.eq.s32.totalorder %s500_s14, 0  ;;  %p416_p4 = scmp.ge.s32.totalorder %s500_s14, 2 }
   0x6   : > { %s549_s19 = scalar_select %p39_p0, %s496_s13, %s41_s18  }
   0x7   : > { %p50_p3 = por %p49_p2, %p48_p1  ;;  %127 = sbr.rel (%p416_p4) target bundleno = 20 (0x14), region = 24 }
   0xc   : > { %130 = sbr.rel (!%p50_p3) target bundleno = 20 (0x14), region = 28  ;;  %s132_s20 = sand.u32 (%p50_p3), 1, %s496_s13  }
   0xd   : > { %s435_s21 = sshll.u32 (%p50_p3), %s500_s14, 3  ;;  %s417_s22 = sshll.u32 (%p50_p3), %s132_s20, 6 }
   0xe   : > { %s137_s25 = scalar_lea.vmem (%p50_p3), %s582_s1, %s435_s21  ;;  %s134_s26 = scalar_lea.vmem (%p50_p3), [#allocation2], %s417_s22 }
   0xf   : > { %v180_v0 = vld [vmem:[%s137_s25] sm:$0xff] (%p50_p3)  ;;  %v182_v1 = vld [vmem:[%s137_s25 + $0x10] sm:$0xff] (%p50_p3) }
  0x10   : > { %v184_v2 = vld [vmem:[%s137_s25 + $0x20] sm:$0xff] (%p50_p3)  ;;  %181 = vst [vmem:[%s134_s26] sm:$0xff] (%p50_p3), %v180_v0  ;;  %183 = vst [vmem:[%s134_s26 + $0x8] sm:$0xff] (%p50_p3), %v182_v1  ;;  %v186_v3 = vld [vmem:[%s137_s25 + $0x30] sm:$0xff] (%p50_p3) }
  0x11   : > { %185 = vst [vmem:[%s134_s26 + $0x10] sm:$0xff] %v184_v2  ;;  %v188_v4 = vld [vmem:[%s137_s25 + $0x40] sm:$0xff]  ;;  %v190_v5 = vld [vmem:[%s137_s25 + $0x50] sm:$0xff]  ;;  %187 = vst [vmem:[%s134_s26 + $0x18] sm:$0xff] %v186_v3 }
  0x12   : > { %189 = vst [vmem:[%s134_s26 + $0x20] sm:$0xff] %v188_v4  ;;  %191 = vst [vmem:[%s134_s26 + $0x28] sm:$0xff] %v190_v5  ;;  %v192_v6 = vld [vmem:[%s137_s25 + $0x60] sm:$0xff]  ;;  %v194_v7 = vld [vmem:[%s137_s25 + $0x70] sm:$0xff] }
  0x13   : > { %193 = vst [vmem:[%s134_s26 + $0x30] sm:$0xff] %v192_v6  ;;  %195 = vst [vmem:[%s134_s26 + $0x38] sm:$0xff] %v194_v7 }
  0x14 PF: > { %p420_p5 = scmp.ge.s32.totalorder %s500_s14, 1  ;;  %p200_p6 = scmp.lt.s32.totalorder %s500_s14, 3 }
  0x16   : > { %p201_p7 = pnand %p420_p5, %p200_p6 }
  0x17   : > { %s207_s27 = sand.u32 (!%p201_p7), 1, %s492_s12   ;;  %s422_s7 = sshll.u32 (!%p201_p7), %s413_s15, 1 }
  0x18   : > { %204 = sbr.rel (%p201_p7) target bundleno = 267 (0x10b), region = 66  ;;  %s421_s28 = sshll.u32 (!%p201_p7), %s207_s27, 6 }
  0x19   : > { %s209_s4 = scalar_lea.vmem (!%p201_p7), [#allocation2], %s421_s28  ;;  %p232_p8 = scmp.lt.s32.totalorder (!%p201_p7), %s422_s7, 3 }
  0x1d   : > { %v502_v8 = vmov 0   ;;  %v247_v9 = vld [vmem:[%s583_s2] sm:$0xf]  ;;  %v462_v10 = vld [vmem:[%s209_s4 + $0x34] ss:$8 sps:$4 sm:$0xff]   ;;  %vm293_vm0 = vcmask 523264  }
  0x1e   : > { %329 = vmatprep.mubr.bf16.mxu0 %v502_v8  ;;  %461 = vset.pattern.permute.xlu0 %v502_v8  ;;  %v464_v11 = vld [vmem:[%s209_s4 + $0x30] ss:$8 sps:$4 sm:$0xff]   ;;  %v465_v12 = vld [vmem:[%s209_s4 + $0x24] ss:$8 sps:$4 sm:$0xff]   ;;  %v467_v13 = vld [vmem:[%s209_s4 + $0x20] ss:$8 sps:$4 sm:$0xff]  }
  0x1f   : > { %250 = vperm.xlu0 %461, %v247_v9   ;;  %305 = vmatprep.subr.bf16.mxu0 %v462_v10  ;;  %v468_v14 = vld [vmem:[%s209_s4 + $0x14] ss:$8 sps:$4 sm:$0xff]   ;;  %v470_v15 = vld [vmem:[%s209_s4 + $0x10] ss:$8 sps:$4 sm:$0xff]   ;;  %v471_v16 = vld [vmem:[%s209_s4 + $0x4] ss:$8 sps:$4 sm:$0xff]  }
  0x20   : > { %306 = vmatpush1.bf16.msra.mxu0 %v464_v11  ;;  %v473_v17 = vld [vmem:[%s209_s4] ss:$8 sps:$4 sm:$0xff]   ;;  %s589_s7 = smov (!%p232_p8, %s422_s7), 3 }
  0x21   : > { %307 = vmatprep.subr.bf16.mxu0 %v465_v12  ;;  %v238_v18 = vld [vmem:[%s581_s0] sm:$0x3]  ;;  %s423_s8 = sshll.u32 %s589_s7, 2 }
  0x22   : > { %s235_s11 = scalar_lea.vmem %s584_s3, %s423_s8 }
  0x24   : > { %308 = vmatpush1.bf16.msra.mxu0 %v467_v13 }
  0x25   : > { %309 = vmatprep.subr.bf16.mxu0 %v468_v14 }
  0x28   : > { %310 = vmatpush1.bf16.msra.mxu0 %v470_v15 }
  0x29   : > { %311 = vmatprep.subr.bf16.mxu0 %v471_v16 }
  0x2c   : > { %312 = vmatpush1.bf16.msra.mxu0 %v473_v17 }
  0x2f   : > { %432 = vmatmul.mubr.msk.bf16.vlgmr.msra.gmra.mxu0 %vm293_vm0, %v238_v18 }
  0x9a   : > { %v251_v19 = vpop.permute.xlu0 %250 }
  0xef   : > { %v331_v20 = vpop.f32.mrf.mxu0 }
  0xf0   : > { %v332_v21 = vadd.f32 %v331_v20, %v251_v19 }
  0xf1   : > { %v333_v22 = vpop.f32.mrf.mxu0 }
  0xf2   : > { %v338_v23 = vmul.f32 0.5, %v332_v21  ;;  %v334_v24 = vadd.f32 %v333_v22, %v251_v19 }
  0xf3   : > { %v335_v25 = vpop.f32.mrf.mxu0 }
  0xf4   : > { %474 = vtanh.f32 %v338_v23  ;;  %v339_v26 = vmul.f32 0.5, %v334_v24 }
  0xf5   : > { %v336_v27 = vpop.f32.mrf.mxu0 }
  0xf6   : > { %476 = vtanh.f32 %v339_v26 }
 0x101   : > { %v475_v28 = vpop.eup %474 }
 0x102   : > { %v342_v29 = vadd.f32 1.0, %v475_v28 }
 0x103   : > { %v477_v30 = vpop.eup %476 }
 0x104   : > { %v343_v31 = vadd.f32 1.0, %v477_v30  ;;  %v344_v32 = vmul.f32 0.5, %v342_v29 }
 0x106   : > { %v345_v33 = vmul.f32 0.5, %v343_v31 }
 0x108   : > { %v348_v34 = vcombine.low %v344_v32, %v345_v33 }
 0x10a   : > { %350 = vst [vmem:[%s235_s11] sm:$0xff] %v348_v34 }
 0x10b PF: > { %p10_p9 = scmp.ge.s32.totalorder %s540_s16, 4   ;;  %s585_s12 = smov %s496_s13 }
 0x10c   : > { %s586_s13 = smov %s549_s19  ;;  %s587_s14 = smov %s540_s16 }
 0x10d   :  { %12 = sbr.rel (!%p10_p9) target bundleno = 2 (0x2), region = 105 }

</bundles_post_ra>
